<compile_context>
chip_gen: v7x
topology: tpu7x:2x2x1
jax: 0.10.0
libtpu: 0.0.40
codegen_flags: <defaults>
</compile_context>

<pallas_src>
import numpy as np
import jax
import jax.numpy as jnp
from jax.experimental import pallas as pl
from jax.experimental.pallas import tpu as pltpu

KH = KW = 5
C_OUT = 16
H_IN = W_IN = 28
H_CONV = W_CONV = H_IN - KH + 1   # 24
H_POOL = W_POOL = H_CONV // 2     # 12
HW_POOL = H_POOL * W_POOL         # 144
FEAT = C_OUT * HW_POOL            # 2304
N_CLASS = 10
K_TAPS = KH * KW                  # 25
MAX_BLOCK_B = 64                  # samples per grid step (double-buffered input
                                  # block ~7.4 MiB: safe on v5e/v6e/v7x defaults)


def fused_conv_pool_fc_kernel(p_ref, w_ref, b_ref, fcw_ref, fcb_ref, o_ref):
    # p_ref:   (B, 4, 144, 25)  im2col patches; axis 1 = 2x2 pool offsets
    # w_ref:   (25, 16)         conv weight        (broadcast)
    # b_ref:   (1, 16)          conv bias          (broadcast)
    # fcw_ref: (2304, 10)       permuted FC weight (broadcast)
    # fcb_ref: (1, 10)          FC bias            (broadcast)
    # o_ref:   (B, 10)          logits
    blk = p_ref.shape[0]

    # Single MXU matmul for all 4 pool offsets of all samples in the block.
    p = p_ref[...].reshape(blk * 4 * HW_POOL, K_TAPS)
    y = jnp.dot(p, w_ref[...], preferred_element_type=jnp.float32)
    y = y.reshape(blk, 4, HW_POOL, C_OUT)

    m = jnp.max(y, axis=1)                        # 2x2 max-pool (VPU maxes)
    m = jnp.maximum(m + b_ref[...], 0.0)          # bias + ReLU once, after max

    feats = m.reshape(blk, FEAT)                  # lane-dense (B, 2304)
    logits = (jnp.dot(feats, fcw_ref[...], preferred_element_type=jnp.float32)
              + fcb_ref[...])
    o_ref[...] = logits.astype(o_ref.dtype)


def prepare_params(conv_w, conv_b, fc_w, fc_b):
    """One-time parameter re-layouts (hoisted out of the per-call forward)."""
    w2d = conv_w.reshape(C_OUT, K_TAPS).T                      # (25, 16)
    b2d = conv_b.reshape(1, C_OUT)                             # (1, 16)
    # PyTorch flattens pooled (N,16,12,12) as (C,H,W); the kernel's feature
    # order is (H*W, C), so permute the FC weight columns accordingly.
    fcw = fc_w.reshape(N_CLASS, C_OUT, H_POOL, W_POOL)
    fcw = fcw.transpose(0, 2, 3, 1).reshape(N_CLASS, FEAT).T   # (2304, 10)
    fcb = fc_b.reshape(1, N_CLASS)                             # (1, 10)
    return w2d, b2d, fcw, fcb


def model_forward(x, w2d, b2d, fcw, fcb):
    """x: (N, 1, 28, 28) float32 -> logits (N, 10) float32."""
    n = x.shape[0]
    xs = x[:, 0]                                               # (N, 28, 28)

    # --- im2col glue (pure data rearrangement, no FLOPs) ---
    # TODO(synk): patch extraction could be moved in-kernel (DMA raw 28x28
    # blocks) to cut HBM read traffic ~18x; kept host-side for simplicity.
    cols = [xs[:, i:i + H_CONV, j:j + W_CONV]
            for i in range(KH) for j in range(KW)]
    patches = jnp.stack(cols, axis=-1)                         # (N, 24, 24, 25)
    patches = patches.reshape(n, H_POOL, 2, W_POOL, 2, K_TAPS)
    patches = patches.transpose(0, 2, 4, 1, 3, 5)              # (N, 2, 2, 12, 12, 25)
    patches = patches.reshape(n, 4, HW_POOL, K_TAPS)           # (N, 4, 144, 25)

    block_b = min(MAX_BLOCK_B, n)
    n_blocks = -(-n // block_b)
    n_pad = n_blocks * block_b
    if n_pad != n:
        patches = jnp.pad(patches, ((0, n_pad - n), (0, 0), (0, 0), (0, 0)))

    logits = pl.pallas_call(
        fused_conv_pool_fc_kernel,
        out_shape=jax.ShapeDtypeStruct((n_pad, N_CLASS), jnp.float32),
        grid=(n_blocks,),
        in_specs=[
            pl.BlockSpec((block_b, 4, HW_POOL, K_TAPS), lambda i: (i, 0, 0, 0)),
            pl.BlockSpec((K_TAPS, C_OUT), lambda i: (0, 0)),
            pl.BlockSpec((1, C_OUT), lambda i: (0, 0)),
            pl.BlockSpec((FEAT, N_CLASS), lambda i: (0, 0)),
            pl.BlockSpec((1, N_CLASS), lambda i: (0, 0)),
        ],
        out_specs=pl.BlockSpec((block_b, N_CLASS), lambda i: (i, 0)),
        compiler_params=pltpu.CompilerParams(
            dimension_semantics=("parallel",),
            vmem_limit_bytes=32 * 1024 * 1024),
    )(patches, w2d, b2d, fcw, fcb)
    return logits[:n]


if __name__ == "__main__":
    key = jax.random.PRNGKey(0)
    k1, k2, k3, k4, k5 = jax.random.split(key, 5)
    N = 2
    x = jax.random.normal(k1, (N, 1, H_IN, W_IN), jnp.float32)
    # Deterministic synthetic parameters (PyTorch shapes: conv (16,1,5,5), fc (10,2304)).
    conv_w = jax.random.normal(k2, (C_OUT, 1, KH, KW), jnp.float32) * 0.1
    conv_b = jax.random.normal(k3, (C_OUT,), jnp.float32) * 0.1
    fc_w = jax.random.normal(k4, (N_CLASS, FEAT), jnp.float32) * 0.02
    fc_b = jax.random.normal(k5, (N_CLASS,), jnp.float32) * 0.02

    # One-time parameter re-layout, then jitted forward.
    params = jax.block_until_ready(prepare_params(conv_w, conv_b, fc_w, fc_b))
    fwd = jax.jit(model_forward)
    logits = jax.block_until_ready(fwd(x, *params))

    # Pure-JAX reference matching the PyTorch forward semantics.
    hp = jax.lax.Precision.HIGHEST
    y = jax.lax.conv_general_dilated(
        x, conv_w, window_strides=(1, 1), padding="VALID",
        dimension_numbers=("NCHW", "OIHW", "NCHW"), precision=hp)   # (N,16,24,24)
    y = jnp.maximum(y + conv_b[None, :, None, None], 0.0)
    y = y.reshape(N, C_OUT, H_POOL, 2, W_POOL, 2).max(axis=(3, 5))  # (N,16,12,12)
    ref = jnp.dot(y.reshape(N, FEAT), fc_w.T, precision=hp) + fc_b  # (N,10)

    assert logits.shape == (N, N_CLASS)
    np.testing.assert_allclose(np.asarray(logits), np.asarray(ref),
                               rtol=1e-3, atol=1e-3)
    print("KERNEL_OK")
</pallas_src>

<mosaic_0001>
module attributes {stable_mosaic.version = 11 : i64} {
  func.func @fused_conv_pool_fc_kernel(%arg0: i32, %arg1: memref<2x4x144x25xf32, #tpu.memory_space<vmem>>, %arg2: memref<25x16xf32, #tpu.memory_space<vmem>>, %arg3: memref<1x16xf32, #tpu.memory_space<vmem>>, %arg4: memref<2304x10xf32, #tpu.memory_space<vmem>>, %arg5: memref<1x10xf32, #tpu.memory_space<vmem>>, %arg6: memref<2x10xf32, #tpu.memory_space<vmem>>) attributes {dimension_semantics = [#tpu.dimension_semantics<parallel>], iteration_bounds = array<i64: 1>, scalar_prefetch = 0 : i64, scratch_operands = 0 : i64, tpu.core_type = #tpu.core_type<tc>, window_params = [{transform_indices = @transform_0, window_bounds = array<i64: 2, 4, 144, 25>}, {pipeline_mode = #tpu.pipeline_mode<synchronous>, transform_indices = @transform_1, window_bounds = array<i64: 25, 16>}, {pipeline_mode = #tpu.pipeline_mode<synchronous>, transform_indices = @transform_2, window_bounds = array<i64: 1, 16>}, {pipeline_mode = #tpu.pipeline_mode<synchronous>, transform_indices = @transform_3, window_bounds = array<i64: 2304, 10>}, {pipeline_mode = #tpu.pipeline_mode<synchronous>, transform_indices = @transform_4, window_bounds = array<i64: 1, 10>}, {transform_indices = @transform_5, window_bounds = array<i64: 2, 10>}]} {
    %c0 = arith.constant 0 : index
    %c0_0 = arith.constant 0 : index
    %c0_1 = arith.constant 0 : index
    %c0_2 = arith.constant 0 : index
    %0 = vector.load %arg1[%c0, %c0_0, %c0_1, %c0_2] : memref<2x4x144x25xf32, #tpu.memory_space<vmem>>, vector<2x4x144x25xf32>
    %1 = vector.shape_cast %0 : vector<2x4x144x25xf32> to vector<1152x25xf32>
    %c0_3 = arith.constant 0 : index
    %c0_4 = arith.constant 0 : index
    %2 = vector.load %arg2[%c0_3, %c0_4] : memref<25x16xf32, #tpu.memory_space<vmem>>, vector<25x16xf32>
    %cst = arith.constant dense<0.000000e+00> : vector<1152x16xf32>
    %3 = tpu.matmul %1, %2, %cst {dimension_numbers = #tpu.dot_dimension_numbers<[1], [0], [0], [1], [0, 0, 1, 1], [], []>} : vector<1152x25xf32>, vector<25x16xf32>, vector<1152x16xf32> -> vector<1152x16xf32>
    %4 = vector.shape_cast %3 : vector<1152x16xf32> to vector<2x4x144x16xf32>
    %cst_5 = arith.constant dense<0xFF800000> : vector<2x144x16xf32>
    %5 = vector.multi_reduction <maximumf>, %4, %cst_5 [1] : vector<2x4x144x16xf32> to vector<2x144x16xf32>
    %c0_6 = arith.constant 0 : index
    %c0_7 = arith.constant 0 : index
    %6 = vector.load %arg3[%c0_6, %c0_7] : memref<1x16xf32, #tpu.memory_space<vmem>>, vector<1x16xf32>
    %7 = vector.shape_cast %6 : vector<1x16xf32> to vector<1x1x16xf32>
    %8 = vector.broadcast %7 : vector<1x1x16xf32> to vector<2x144x16xf32>
    %9 = arith.addf %5, %8 : vector<2x144x16xf32>
    %cst_8 = arith.constant 0.000000e+00 : f32
    %10 = vector.broadcast %cst_8 : f32 to vector<2x144x16xf32>
    %11 = arith.maximumf %9, %10 : vector<2x144x16xf32>
    %12 = vector.shape_cast %11 : vector<2x144x16xf32> to vector<2x2304xf32>
    %c0_9 = arith.constant 0 : index
    %c0_10 = arith.constant 0 : index
    %13 = vector.load %arg4[%c0_9, %c0_10] : memref<2304x10xf32, #tpu.memory_space<vmem>>, vector<2304x10xf32>
    %cst_11 = arith.constant dense<0.000000e+00> : vector<2x10xf32>
    %14 = tpu.matmul %12, %13, %cst_11 {dimension_numbers = #tpu.dot_dimension_numbers<[1], [0], [0], [1], [0, 0, 1, 1], [], []>} : vector<2x2304xf32>, vector<2304x10xf32>, vector<2x10xf32> -> vector<2x10xf32>
    %c0_12 = arith.constant 0 : index
    %c0_13 = arith.constant 0 : index
    %15 = vector.load %arg5[%c0_12, %c0_13] : memref<1x10xf32, #tpu.memory_space<vmem>>, vector<1x10xf32>
    %16 = vector.broadcast %15 : vector<1x10xf32> to vector<2x10xf32>
    %17 = arith.addf %14, %16 : vector<2x10xf32>
    %c0_14 = arith.constant 0 : index
    %c0_15 = arith.constant 0 : index
    %18 = vector.load %arg6[%c0_14, %c0_15] : memref<2x10xf32, #tpu.memory_space<vmem>>, vector<2x10xf32>
    tpu.vector_store %arg6[%c0_14, %c0_15], %17 {strides = array<i32>} : memref<2x10xf32, #tpu.memory_space<vmem>>, vector<2x10xf32>,
    return
  }
  func.func @transform_0(%arg0: i32) -> (i32, i32, i32, i32) {
    %c0_i32 = arith.constant 0 : i32
    %c0_i32_0 = arith.constant 0 : i32
    %c0_i32_1 = arith.constant 0 : i32
    %c0_i32_2 = arith.constant 0 : i32
    return %arg0, %c0_i32, %c0_i32_0, %c0_i32_1 : i32, i32, i32, i32
  }
  func.func @transform_1(%arg0: i32) -> (i32, i32) {
    %c0_i32 = arith.constant 0 : i32
    %c0_i32_0 = arith.constant 0 : i32
    %c0_i32_1 = arith.constant 0 : i32
    return %c0_i32, %c0_i32_0 : i32, i32
  }
  func.func @transform_2(%arg0: i32) -> (i32, i32) {
    %c0_i32 = arith.constant 0 : i32
    %c0_i32_0 = arith.constant 0 : i32
    %c0_i32_1 = arith.constant 0 : i32
    return %c0_i32, %c0_i32_0 : i32, i32
  }
  func.func @transform_3(%arg0: i32) -> (i32, i32) {
    %c0_i32 = arith.constant 0 : i32
    %c0_i32_0 = arith.constant 0 : i32
    %c0_i32_1 = arith.constant 0 : i32
    return %c0_i32, %c0_i32_0 : i32, i32
  }
  func.func @transform_4(%arg0: i32) -> (i32, i32) {
    %c0_i32 = arith.constant 0 : i32
    %c0_i32_0 = arith.constant 0 : i32
    %c0_i32_1 = arith.constant 0 : i32
    return %c0_i32, %c0_i32_0 : i32, i32
  }
  func.func @transform_5(%arg0: i32) -> (i32, i32) {
    %c0_i32 = arith.constant 0 : i32
    %c0_i32_0 = arith.constant 0 : i32
    return %arg0, %c0_i32 : i32, i32
  }
}

</mosaic_0001>

<bundles_post_ra>
// kernel: model_forward.1
= control target key start
LH: loop header
LB: loop body
LE: loop exit
PB: predicated region body
PF: predicated region fallthrough
CT: control target
= control target key end

     0   :  { %vm602_vm0 = vcmask 1040384   ;;  %vm169_vm1 = vcmask 203776   ;;  %vm5971_vm2 = vmmov 1   ;;  %s9784_s0 = inlined_call_operand.vmem [shape: f32[2,4,144,25], index: 0, kind: input, shape index: {}]   ;;  %s9785_s1 = inlined_call_operand.vmem [shape: f32[25,16], index: 1, kind: input, shape index: {}]   ;;  %s9786_s2 = inlined_call_operand.vmem [shape: f32[1,16], index: 2, kind: input, shape index: {}]   ;;  %s9787_s3 = inlined_call_operand.vmem [shape: f32[2304,10], index: 3, kind: input, shape index: {}]   ;;  %s9788_s4 = inlined_call_operand.vmem [shape: f32[1,10], index: 4, kind: input, shape index: {}]   ;;  %s9789_s5 = inlined_call_operand.hbm [shape: f32[2,10], index: 5, kind: output, shape index: {}]  }
   0x1   :  { %v165_v0 = vld [vmem:[%s9785_s1] sm:$0xff]  ;;  %v166_v1 = vld [vmem:[%s9785_s1 + $0x8] sm:$0xff]  ;;  %v167_v2 = vld [vmem:[%s9785_s1 + $0x10] sm:$0xff] }
   0x2   :  { %v5322_v3 = vpack.c.bf16 %v166_v1, %v165_v0  ;;  %v168_v4 = vld [vmem:[%s9785_s1 + $0x18] sm:$0x1]  ;;  %v21_v5 = vld [vmem:[%s9784_s0] sm:$0xff]  ;;  %vm5327_vm3 = vmpackc.low %vm602_vm0, %vm5971_vm2 }
   0x3   :  { %v5326_v6 = vpack.c.bf16 %v168_v4, %v167_v2  ;;  %5106 = vmatprep.mubr.msk.f32.mxu0 %vm169_vm1, %v21_v5  ;;  %v22_v7 = vld [vmem:[%s9784_s0 + $0x8] sm:$0xff]  ;;  %v23_v8 = vld [vmem:[%s9784_s0 + $0x10] sm:$0xff]  ;;  %v24_v9 = vld [vmem:[%s9784_s0 + $0x18] sm:$0xff] }
   0x4   :  { %5323 = vmatprep.subr.bf16.mxu0 %v5322_v3  ;;  %v25_v10 = vld [vmem:[%s9784_s0 + $0x20] sm:$0xff]  ;;  %v26_v11 = vld [vmem:[%s9784_s0 + $0x28] sm:$0xff]  ;;  %v27_v12 = vld [vmem:[%s9784_s0 + $0x30] sm:$0xff] }
   0x5   :  { %5325 = vmatpush3.bf16.msra.mxu0 %v5322_v3  ;;  %v28_v13 = vld [vmem:[%s9784_s0 + $0x38] sm:$0xff]  ;;  %v29_v14 = vld [vmem:[%s9784_s0 + $0x40] sm:$0xff]  ;;  %v30_v15 = vld [vmem:[%s9784_s0 + $0x48] sm:$0xff] }
   0x6   :  { %5328 = vmatprep.subr.msk.bf16.mxu0 %vm5327_vm3, %v5326_v6  ;;  %v31_v16 = vld [vmem:[%s9784_s0 + $0x50] sm:$0xff] }
   0x9   :  { %5331 = vmatpush3.bf16.msk.msra.mxu0 %vm5327_vm3, %v5326_v6 }
   0xc   :  { %5107 = vmatmul.mubr.msk.f32.vlgmr.msra.gmra.mrb[0].mxu0 %vm169_vm1, %v22_v7 }
   0xd   :  { %5109 = vmatprep.mubr.msk.f32.mxu0 %vm169_vm1, %v23_v8 }
  0x10   :  { %5110 = vmatmul.mubr.msk.f32.gmra.mrb[2].mxu0 %vm169_vm1, %v24_v9 }
  0x11   :  { %5112 = vmatprep.mubr.msk.f32.mxu0 %vm169_vm1, %v25_v10 }
  0x14   :  { %5113 = vmatmul.mubr.msk.f32.gmra.mrb[4].mxu0 %vm169_vm1, %v26_v11 }
  0x15   :  { %5115 = vmatprep.mubr.msk.f32.mxu0 %vm169_vm1, %v27_v12 }
  0x18   :  { %5116 = vmatmul.mubr.msk.f32.gmra.mrb[6].mxu0 %vm169_vm1, %v28_v13 }
  0x19   :  { %5118 = vmatprep.mubr.msk.f32.mxu0 %vm169_vm1, %v29_v14 }
  0x1a   :  { %10 = vsyncpa [#allocation3], 0  ;;  %v32_v17 = vld [vmem:[%s9784_s0 + $0x58] sm:$0xff]  ;;  %v33_v18 = vld [vmem:[%s9784_s0 + $0x60] sm:$0xff]  ;;  %vm1391_vm4 = vcmask 130048   ;;  %s5975_s14 = smov 32  }
  0x1b   :  { %v34_v19 = vld [vmem:[%s9784_s0 + $0x68] sm:$0xff]  ;;  %v35_v20 = vld [vmem:[%s9784_s0 + $0x70] sm:$0xff]  ;;  %v36_v21 = vld [vmem:[%s9784_s0 + $0x78] sm:$0xff]  ;;  %s5976_s15 = smov 48   ;;  %s5977_s16 = smov 16   ;;  %vm3416_vm5 = vcmask 261120  }
  0x1c   :  { %5119 = vmatmul.mubr.msk.f32.gmra.mrb[8].mxu0 %vm169_vm1, %v30_v15  ;;  %v37_v22 = vld [vmem:[%s9784_s0 + $0x80] sm:$0xff]  ;;  %v38_v23 = vld [vmem:[%s9784_s0 + $0x88] sm:$0xff]  ;;  %v39_v24 = vld [vmem:[%s9784_s0 + $0x90] sm:$0xff]  ;;  %s5978_s17 = smov 64   ;;  %s5979_s18 = smov 80   ;;  %vm3418_vm6 = vcmask 392192  }
  0x1d   :  { %5121 = vmatprep.mubr.msk.f32.mxu0 %vm169_vm1, %v31_v16  ;;  %v40_v25 = vld [vmem:[%s9784_s0 + $0x98] sm:$0xff]  ;;  %v41_v26 = vld [vmem:[%s9784_s0 + $0xa0] sm:$0xff]  ;;  %v42_v27 = vld [vmem:[%s9784_s0 + $0xa8] sm:$0xff]  ;;  %s5980_s19 = smov 96   ;;  %s5981_s20 = smov 112   ;;  %vm3420_vm7 = vcmask 523264  }
  0x1e   :  { %v43_v28 = vld [vmem:[%s9784_s0 + $0xb0] sm:$0xff]  ;;  %v44_v29 = vld [vmem:[%s9784_s0 + $0xb8] sm:$0xff]  ;;  %v45_v30 = vld [vmem:[%s9784_s0 + $0xc0] sm:$0xff]  ;;  %vm3422_vm8 = vcmask 654336   ;;  %vm3424_vm9 = vcmask 785408   ;;  %vm3426_vm10 = vcmask 916480  }
  0x1f   :  { %v46_v31 = vld [vmem:[%s9784_s0 + $0xc8] sm:$0xff]  ;;  %v47_v32 = vld [vmem:[%s9784_s0 + $0xd0] sm:$0xff]  ;;  %v48_v33 = vld [vmem:[%s9784_s0 + $0xd8] sm:$0xff]  ;;  %vm4472_vm11 = vcmask 74752  }
  0x20   :  { %5122 = vmatmul.mubr.msk.f32.gmra.mrb[10].mxu0 %vm169_vm1, %v32_v17  ;;  %v49_v34 = vld [vmem:[%s9784_s0 + $0xe0] sm:$0xff]  ;;  %v50_v35 = vld [vmem:[%s9784_s0 + $0xe8] sm:$0xff]  ;;  %v51_v36 = vld [vmem:[%s9784_s0 + $0xf0] sm:$0xff] }
  0x21   :  { %5124 = vmatprep.mubr.msk.f32.mxu0 %vm169_vm1, %v33_v18  ;;  %v52_v37 = vld [vmem:[%s9784_s0 + $0xf8] sm:$0xff]  ;;  %v53_v38 = vld [vmem:[%s9784_s0 + $0x100] sm:$0xff]  ;;  %v54_v39 = vld [vmem:[%s9784_s0 + $0x108] sm:$0xff] }
  0x22   :  { %v55_v40 = vld [vmem:[%s9784_s0 + $0x110] sm:$0xff]  ;;  %v56_v41 = vld [vmem:[%s9784_s0 + $0x118] sm:$0xff]  ;;  %v57_v42 = vld [vmem:[%s9784_s0 + $0x120] sm:$0xff] }
  0x23   :  { %v58_v43 = vld [vmem:[%s9784_s0 + $0x128] sm:$0xff]  ;;  %v59_v44 = vld [vmem:[%s9784_s0 + $0x130] sm:$0xff]  ;;  %v60_v45 = vld [vmem:[%s9784_s0 + $0x138] sm:$0xff] }
  0x24   :  { %5125 = vmatmul.mubr.msk.f32.gmra.mrb[12].mxu0 %vm169_vm1, %v34_v19  ;;  %v61_v46 = vld [vmem:[%s9784_s0 + $0x140] sm:$0xff]  ;;  %v62_v47 = vld [vmem:[%s9784_s0 + $0x148] sm:$0xff]  ;;  %v63_v48 = vld [vmem:[%s9784_s0 + $0x150] sm:$0xff] }
  0x25   :  { %5127 = vmatprep.mubr.msk.f32.mxu0 %vm169_vm1, %v35_v20  ;;  %v64_v49 = vld [vmem:[%s9784_s0 + $0x158] sm:$0xff]  ;;  %v65_v50 = vld [vmem:[%s9784_s0 + $0x160] sm:$0xff]  ;;  %v66_v51 = vld [vmem:[%s9784_s0 + $0x168] sm:$0xff] }
  0x26   :  { %v67_v52 = vld [vmem:[%s9784_s0 + $0x170] sm:$0xff]  ;;  %v68_v53 = vld [vmem:[%s9784_s0 + $0x178] sm:$0xff]  ;;  %v69_v54 = vld [vmem:[%s9784_s0 + $0x180] sm:$0xff] }
  0x27   :  { %v70_v55 = vld [vmem:[%s9784_s0 + $0x188] sm:$0xff]  ;;  %v71_v56 = vld [vmem:[%s9784_s0 + $0x190] sm:$0xff]  ;;  %v72_v57 = vld [vmem:[%s9784_s0 + $0x198] sm:$0xff] }
  0x28   :  { %5128 = vmatmul.mubr.msk.f32.gmra.mrb[14].mxu0 %vm169_vm1, %v36_v21  ;;  %v73_v58 = vld [vmem:[%s9784_s0 + $0x1a0] sm:$0xff]  ;;  %v74_v59 = vld [vmem:[%s9784_s0 + $0x1a8] sm:$0xff]  ;;  %v75_v60 = vld [vmem:[%s9784_s0 + $0x1b0] sm:$0xff] }
  0x29   :  { %5130 = vmatprep.mubr.msk.f32.mxu0 %vm169_vm1, %v37_v22  ;;  %v76_v61 = vld [vmem:[%s9784_s0 + $0x1b8] sm:$0xff]  ;;  %v77_v62 = vld [vmem:[%s9784_s0 + $0x1c0] sm:$0xff]  ;;  %v78_v63 = vld [vmem:[%s9784_s0 + $0x1c8] sm:$0xff] }
  0x2a   :  { %v79_v0 = vld [vmem:[%s9784_s0 + $0x1d0] sm:$0xff]  ;;  %v80_v1 = vld [vmem:[%s9784_s0 + $0x1d8] sm:$0xff]  ;;  %v81_v2 = vld [vmem:[%s9784_s0 + $0x1e0] sm:$0xff] }
  0x2b   :  { %v82_v3 = vld [vmem:[%s9784_s0 + $0x1e8] sm:$0xff]  ;;  %v83_v4 = vld [vmem:[%s9784_s0 + $0x1f0] sm:$0xff]  ;;  %v84_v5 = vld [vmem:[%s9784_s0 + $0x1f8] sm:$0xff] }
  0x2c   :  { %5131 = vmatmul.mubr.msk.f32.gmra.mrb[16].mxu0 %vm169_vm1, %v38_v23  ;;  %v85_v6 = vld [vmem:[%s9784_s0 + $0x200] sm:$0xff]  ;;  %v86_v7 = vld [vmem:[%s9784_s0 + $0x208] sm:$0xff]  ;;  %v87_v8 = vld [vmem:[%s9784_s0 + $0x210] sm:$0xff] }
  0x2d   :  { %5133 = vmatprep.mubr.msk.f32.mxu0 %vm169_vm1, %v39_v24  ;;  %v88_v9 = vld [vmem:[%s9784_s0 + $0x218] sm:$0xff]  ;;  %v89_v10 = vld [vmem:[%s9784_s0 + $0x220] sm:$0xff]  ;;  %v90_v11 = vld [vmem:[%s9784_s0 + $0x228] sm:$0xff] }
  0x2e   :  { %v91_v12 = vld [vmem:[%s9784_s0 + $0x230] sm:$0xff]  ;;  %v92_v13 = vld [vmem:[%s9784_s0 + $0x238] sm:$0xff]  ;;  %v93_v14 = vld [vmem:[%s9784_s0 + $0x240] sm:$0xff] }
  0x2f   :  { %v94_v15 = vld [vmem:[%s9784_s0 + $0x248] sm:$0xff]  ;;  %v95_v16 = vld [vmem:[%s9784_s0 + $0x250] sm:$0xff]  ;;  %v96_v17 = vld [vmem:[%s9784_s0 + $0x258] sm:$0xff] }
  0x30   :  { %5134 = vmatmul.mubr.msk.f32.gmra.mrb[18].mxu0 %vm169_vm1, %v40_v25  ;;  %v97_v18 = vld [vmem:[%s9784_s0 + $0x260] sm:$0xff]  ;;  %v98_v19 = vld [vmem:[%s9784_s0 + $0x268] sm:$0xff]  ;;  %v99_v20 = vld [vmem:[%s9784_s0 + $0x270] sm:$0xff] }
  0x31   :  { %5136 = vmatprep.mubr.msk.f32.mxu0 %vm169_vm1, %v41_v26  ;;  %v100_v21 = vld [vmem:[%s9784_s0 + $0x278] sm:$0xff]  ;;  %v101_v22 = vld [vmem:[%s9784_s0 + $0x280] sm:$0xff]  ;;  %v102_v23 = vld [vmem:[%s9784_s0 + $0x288] sm:$0xff] }
  0x32   :  { %v103_v24 = vld [vmem:[%s9784_s0 + $0x290] sm:$0xff]  ;;  %v104_v25 = vld [vmem:[%s9784_s0 + $0x298] sm:$0xff]  ;;  %v105_v26 = vld [vmem:[%s9784_s0 + $0x2a0] sm:$0xff] }
  0x34   :  { %5137 = vmatmul.mubr.msk.f32.gmra.mrb[20].mxu0 %vm169_vm1, %v42_v27  ;;  %v106_v27 = vld [vmem:[%s9784_s0 + $0x2a8] sm:$0xff] }
  0x35   :  { %5139 = vmatprep.mubr.msk.f32.mxu0 %vm169_vm1, %v43_v28  ;;  %v107_v28 = vld [vmem:[%s9784_s0 + $0x2b0] sm:$0xff] }
  0x38   :  { %5140 = vmatmul.mubr.msk.f32.gmra.mrb[22].mxu0 %vm169_vm1, %v44_v29  ;;  %v108_v29 = vld [vmem:[%s9784_s0 + $0x2b8] sm:$0xff] }
  0x39   :  { %5142 = vmatprep.mubr.msk.f32.mxu0 %vm169_vm1, %v45_v30  ;;  %v109_v30 = vld [vmem:[%s9784_s0 + $0x2c0] sm:$0xff] }
  0x3c   :  { %5143 = vmatmul.mubr.msk.f32.gmra.mrb[24].mxu0 %vm169_vm1, %v46_v31  ;;  %v110_v31 = vld [vmem:[%s9784_s0 + $0x2c8] sm:$0xff] }
  0x3d   :  { %5145 = vmatprep.mubr.msk.f32.mxu0 %vm169_vm1, %v47_v32  ;;  %v111_v32 = vld [vmem:[%s9784_s0 + $0x2d0] sm:$0xff] }
  0x40   :  { %5146 = vmatmul.mubr.msk.f32.gmra.mrb[26].mxu0 %vm169_vm1, %v48_v33  ;;  %v112_v33 = vld [vmem:[%s9784_s0 + $0x2d8] sm:$0xff] }
  0x41   :  { %5148 = vmatprep.mubr.msk.f32.mxu0 %vm169_vm1, %v49_v34  ;;  %v113_v34 = vld [vmem:[%s9784_s0 + $0x2e0] sm:$0xff] }
  0x44   :  { %5149 = vmatmul.mubr.msk.f32.gmra.mrb[28].mxu0 %vm169_vm1, %v50_v35  ;;  %v114_v35 = vld [vmem:[%s9784_s0 + $0x2e8] sm:$0xff] }
  0x45   :  { %5151 = vmatprep.mubr.msk.f32.mxu0 %vm169_vm1, %v51_v36  ;;  %v115_v36 = vld [vmem:[%s9784_s0 + $0x2f0] sm:$0xff] }
  0x48   :  { %5152 = vmatmul.mubr.msk.f32.gmra.mrb[30].mxu0 %vm169_vm1, %v52_v37  ;;  %v116_v37 = vld [vmem:[%s9784_s0 + $0x2f8] sm:$0xff] }
  0x49   :  { %5154 = vmatprep.mubr.msk.f32.mxu0 %vm169_vm1, %v53_v38  ;;  %v117_v38 = vld [vmem:[%s9784_s0 + $0x300] sm:$0xff] }
  0x4c   :  { %5155 = vmatmul.mubr.msk.f32.gmra.mrb[32].mxu0 %vm169_vm1, %v54_v39  ;;  %v118_v39 = vld [vmem:[%s9784_s0 + $0x308] sm:$0xff] }
  0x4d   :  { %5157 = vmatprep.mubr.msk.f32.mxu0 %vm169_vm1, %v55_v40  ;;  %v119_v40 = vld [vmem:[%s9784_s0 + $0x310] sm:$0xff] }
  0x50   :  { %5158 = vmatmul.mubr.msk.f32.gmra.mrb[34].mxu0 %vm169_vm1, %v56_v41  ;;  %v120_v41 = vld [vmem:[%s9784_s0 + $0x318] sm:$0xff] }
  0x51   :  { %5160 = vmatprep.mubr.msk.f32.mxu0 %vm169_vm1, %v57_v42  ;;  %v121_v42 = vld [vmem:[%s9784_s0 + $0x320] sm:$0xff] }
  0x54   :  { %5161 = vmatmul.mubr.msk.f32.gmra.mrb[36].mxu0 %vm169_vm1, %v58_v43  ;;  %v122_v43 = vld [vmem:[%s9784_s0 + $0x328] sm:$0xff] }
  0x55   :  { %5163 = vmatprep.mubr.msk.f32.mxu0 %vm169_vm1, %v59_v44  ;;  %v123_v44 = vld [vmem:[%s9784_s0 + $0x330] sm:$0xff] }
  0x58   :  { %5164 = vmatmul.mubr.msk.f32.gmra.mrb[38].mxu0 %vm169_vm1, %v60_v45  ;;  %v124_v45 = vld [vmem:[%s9784_s0 + $0x338] sm:$0xff] }
  0x59   :  { %5166 = vmatprep.mubr.msk.f32.mxu0 %vm169_vm1, %v61_v46  ;;  %v125_v46 = vld [vmem:[%s9784_s0 + $0x340] sm:$0xff] }
  0x5c   :  { %5167 = vmatmul.mubr.msk.f32.gmra.mrb[40].mxu0 %vm169_vm1, %v62_v47  ;;  %v126_v47 = vld [vmem:[%s9784_s0 + $0x348] sm:$0xff] }
  0x5d   :  { %5169 = vmatprep.mubr.msk.f32.mxu0 %vm169_vm1, %v63_v48  ;;  %v127_v48 = vld [vmem:[%s9784_s0 + $0x350] sm:$0xff] }
  0x60   :  { %5170 = vmatmul.mubr.msk.f32.gmra.mrb[42].mxu0 %vm169_vm1, %v64_v49  ;;  %v128_v49 = vld [vmem:[%s9784_s0 + $0x358] sm:$0xff] }
  0x61   :  { %5172 = vmatprep.mubr.msk.f32.mxu0 %vm169_vm1, %v65_v50  ;;  %v129_v50 = vld [vmem:[%s9784_s0 + $0x360] sm:$0xff] }
  0x64   :  { %5173 = vmatmul.mubr.msk.f32.gmra.mrb[44].mxu0 %vm169_vm1, %v66_v51 }
  0x65   :  { %5175 = vmatprep.mubr.msk.f32.mxu0 %vm169_vm1, %v67_v52 }
  0x68   :  { %5176 = vmatmul.mubr.msk.f32.gmra.mrb[46].mxu0 %vm169_vm1, %v68_v53  ;;  %v130_v53 = vld [vmem:[%s9784_s0 + $0x368] sm:$0xff] }
  0x69   :  { %5178 = vmatprep.mubr.msk.f32.mxu0 %vm169_vm1, %v69_v54  ;;  %v131_v54 = vld [vmem:[%s9784_s0 + $0x370] sm:$0xff] }
  0x6c   :  { %5179 = vmatmul.mubr.msk.f32.gmra.mrb[48].mxu0 %vm169_vm1, %v70_v55 }
  0x6d   :  { %5181 = vmatprep.mubr.msk.f32.mxu0 %vm169_vm1, %v71_v56 }
  0x70   :  { %5182 = vmatmul.mubr.msk.f32.gmra.mrb[50].mxu0 %vm169_vm1, %v72_v57  ;;  %v132_v57 = vld [vmem:[%s9784_s0 + $0x378] sm:$0xff] }
  0x71   :  { %5184 = vmatprep.mubr.msk.f32.mxu0 %vm169_vm1, %v73_v58  ;;  %v133_v58 = vld [vmem:[%s9784_s0 + $0x380] sm:$0xff] }
  0x74   :  { %5185 = vmatmul.mubr.msk.f32.gmra.mrb[52].mxu0 %vm169_vm1, %v74_v59 }
  0x75   :  { %5187 = vmatprep.mubr.msk.f32.mxu0 %vm169_vm1, %v75_v60 }
  0x78   :  { %5188 = vmatmul.mubr.msk.f32.gmra.mrb[54].mxu0 %vm169_vm1, %v76_v61  ;;  %v134_v61 = vld [vmem:[%s9784_s0 + $0x388] sm:$0xff] }
  0x79   :  { %5190 = vmatprep.mubr.msk.f32.mxu0 %vm169_vm1, %v77_v62  ;;  %v135_v62 = vld [vmem:[%s9784_s0 + $0x390] sm:$0xff] }
  0x7c   :  { %5191 = vmatmul.mubr.msk.f32.gmra.mrb[56].mxu0 %vm169_vm1, %v78_v63 }
  0x7d   :  { %5193 = vmatprep.mubr.msk.f32.mxu0 %vm169_vm1, %v79_v0 }
  0x80   :  { %5194 = vmatmul.mubr.msk.f32.gmra.mrb[58].mxu0 %vm169_vm1, %v80_v1  ;;  %v136_v1 = vld [vmem:[%s9784_s0 + $0x398] sm:$0xff] }
  0x81   :  { %5196 = vmatprep.mubr.msk.f32.mxu0 %vm169_vm1, %v81_v2  ;;  %v137_v2 = vld [vmem:[%s9784_s0 + $0x3a0] sm:$0xff] }
  0x84   :  { %5197 = vmatmul.mubr.msk.f32.gmra.mrb[60].mxu0 %vm169_vm1, %v82_v3 }
  0x85   :  { %5199 = vmatprep.mubr.msk.f32.mxu0 %vm169_vm1, %v83_v4 }
  0x88   :  { %5200 = vmatmul.mubr.msk.f32.gmra.mrb[62].mxu0 %vm169_vm1, %v84_v5  ;;  %v138_v5 = vld [vmem:[%s9784_s0 + $0x3a8] sm:$0xff] }
  0x89   :  { %5202 = vmatprep.mubr.msk.f32.mxu0 %vm169_vm1, %v85_v6  ;;  %v139_v6 = vld [vmem:[%s9784_s0 + $0x3b0] sm:$0xff] }
  0x8c   :  { %5203 = vmatmul.mubr.msk.f32.gmra.mrb[64].mxu0 %vm169_vm1, %v86_v7 }
  0x8d   :  { %5205 = vmatprep.mubr.msk.f32.mxu0 %vm169_vm1, %v87_v8 }
  0x90   :  { %5206 = vmatmul.mubr.msk.f32.gmra.mrb[66].mxu0 %vm169_vm1, %v88_v9  ;;  %v140_v9 = vld [vmem:[%s9784_s0 + $0x3b8] sm:$0xff] }
  0x91   :  { %5208 = vmatprep.mubr.msk.f32.mxu0 %vm169_vm1, %v89_v10  ;;  %v141_v10 = vld [vmem:[%s9784_s0 + $0x3c0] sm:$0xff] }
  0x94   :  { %5209 = vmatmul.mubr.msk.f32.gmra.mrb[68].mxu0 %vm169_vm1, %v90_v11 }
  0x95   :  { %5211 = vmatprep.mubr.msk.f32.mxu0 %vm169_vm1, %v91_v12 }
  0x98   :  { %5212 = vmatmul.mubr.msk.f32.gmra.mrb[70].mxu0 %vm169_vm1, %v92_v13  ;;  %v142_v13 = vld [vmem:[%s9784_s0 + $0x3c8] sm:$0xff] }
  0x99   :  { %5214 = vmatprep.mubr.msk.f32.mxu0 %vm169_vm1, %v93_v14  ;;  %v143_v14 = vld [vmem:[%s9784_s0 + $0x3d0] sm:$0xff] }
  0x9c   :  { %5215 = vmatmul.mubr.msk.f32.gmra.mrb[72].mxu0 %vm169_vm1, %v94_v15 }
  0x9d   :  { %5217 = vmatprep.mubr.msk.f32.mxu0 %vm169_vm1, %v95_v16 }
  0xa0   :  { %5218 = vmatmul.mubr.msk.f32.gmra.mrb[74].mxu0 %vm169_vm1, %v96_v17  ;;  %v144_v17 = vld [vmem:[%s9784_s0 + $0x3d8] sm:$0xff] }
  0xa1   :  { %5220 = vmatprep.mubr.msk.f32.mxu0 %vm169_vm1, %v97_v18  ;;  %v145_v18 = vld [vmem:[%s9784_s0 + $0x3e0] sm:$0xff] }
  0xa4   :  { %5221 = vmatmul.mubr.msk.f32.gmra.mrb[76].mxu0 %vm169_vm1, %v98_v19 }
  0xa5   :  { %5223 = vmatprep.mubr.msk.f32.mxu0 %vm169_vm1, %v99_v20 }
  0xa8   :  { %5224 = vmatmul.mubr.msk.f32.gmra.mrb[78].mxu0 %vm169_vm1, %v100_v21  ;;  %v146_v21 = vld [vmem:[%s9784_s0 + $0x3e8] sm:$0xff] }
  0xa9   :  { %5226 = vmatprep.mubr.msk.f32.mxu0 %vm169_vm1, %v101_v22  ;;  %v147_v22 = vld [vmem:[%s9784_s0 + $0x3f0] sm:$0xff] }
  0xac   :  { %5227 = vmatmul.mubr.msk.f32.gmra.mrb[80].mxu0 %vm169_vm1, %v102_v23 }
  0xad   :  { %5229 = vmatprep.mubr.msk.f32.mxu0 %vm169_vm1, %v103_v24 }
  0xb0   :  { %5230 = vmatmul.mubr.msk.f32.gmra.mrb[82].mxu0 %vm169_vm1, %v104_v25 }
  0xb1   :  { %5232 = vmatprep.mubr.msk.f32.mxu0 %vm169_vm1, %v105_v26 }
  0xb4   :  { %5233 = vmatmul.mubr.msk.f32.gmra.mrb[84].mxu0 %vm169_vm1, %v106_v27 }
  0xb5   :  { %5235 = vmatprep.mubr.msk.f32.mxu0 %vm169_vm1, %v107_v28 }
  0xb8   :  { %5236 = vmatmul.mubr.msk.f32.gmra.mrb[86].mxu0 %vm169_vm1, %v108_v29 }
  0xb9   :  { %5238 = vmatprep.mubr.msk.f32.mxu0 %vm169_vm1, %v109_v30  ;;  %v148_v30 = vld [vmem:[%s9784_s0 + $0x3f8] sm:$0xff] }
  0xbc   :  { %5239 = vmatmul.mubr.msk.f32.gmra.mrb[88].mxu0 %vm169_vm1, %v110_v31 }
  0xbd   :  { %5241 = vmatprep.mubr.msk.f32.mxu0 %vm169_vm1, %v111_v32  ;;  %v149_v32 = vld [vmem:[%s9784_s0 + $0x400] sm:$0xff] }
  0xc0   :  { %5242 = vmatmul.mubr.msk.f32.gmra.mrb[90].mxu0 %vm169_vm1, %v112_v33 }
  0xc1   :  { %5244 = vmatprep.mubr.msk.f32.mxu0 %vm169_vm1, %v113_v34 }
  0xc4   :  { %5245 = vmatmul.mubr.msk.f32.gmra.mrb[92].mxu0 %vm169_vm1, %v114_v35 }
  0xc5   :  { %5247 = vmatprep.mubr.msk.f32.mxu0 %vm169_vm1, %v115_v36 }
  0xc8   :  { %5248 = vmatmul.mubr.msk.f32.gmra.mrb[94].mxu0 %vm169_vm1, %v116_v37 }
  0xc9   :  { %5250 = vmatprep.mubr.msk.f32.mxu0 %vm169_vm1, %v117_v38 }
  0xcc   :  { %5251 = vmatmul.mubr.msk.f32.gmra.mrb[96].mxu0 %vm169_vm1, %v118_v39 }
  0xcd   :  { %5253 = vmatprep.mubr.msk.f32.mxu0 %vm169_vm1, %v119_v40  ;;  %v150_v40 = vld [vmem:[%s9784_s0 + $0x408] sm:$0xff] }
  0xd0   :  { %5254 = vmatmul.mubr.msk.f32.gmra.mrb[98].mxu0 %vm169_vm1, %v120_v41 }
  0xd1   :  { %5256 = vmatprep.mubr.msk.f32.mxu0 %vm169_vm1, %v121_v42  ;;  %v151_v42 = vld [vmem:[%s9784_s0 + $0x410] sm:$0xff] }
  0xd4   :  { %5257 = vmatmul.mubr.msk.f32.gmra.mrb[100].mxu0 %vm169_vm1, %v122_v43 }
  0xd5   :  { %5259 = vmatprep.mubr.msk.f32.mxu0 %vm169_vm1, %v123_v44 }
  0xd8   :  { %5260 = vmatmul.mubr.msk.f32.gmra.mrb[102].mxu0 %vm169_vm1, %v124_v45 }
  0xd9   :  { %5262 = vmatprep.mubr.msk.f32.mxu0 %vm169_vm1, %v125_v46 }
  0xdc   :  { %5263 = vmatmul.mubr.msk.f32.gmra.mrb[104].mxu0 %vm169_vm1, %v126_v47 }
  0xdd   :  { %5265 = vmatprep.mubr.msk.f32.mxu0 %vm169_vm1, %v127_v48 }
  0xdf   :  { %v5108_v51 = vpop.f32.mrb[0].mxu0 }
  0xe0   :  { %v672_v52 = vpop.f32.mrb[1].mxu0  ;;  %5266 = vmatmul.mubr.msk.f32.gmra.mrb[106].mxu0 %vm169_vm1, %v128_v49  ;;  %v6562_v24 = vsel %vm1391_vm4, %v5108_v51, -inf }
  0xe1   :  { %5268 = vmatprep.mubr.msk.f32.mxu0 %vm169_vm1, %v129_v50  ;;  %v6569_v27 = vsel %vm1391_vm4, %v672_v52, -inf  ;;  %v152_v50 = vld [vmem:[%s9784_s0 + $0x418] sm:$0xff]  ;;  %v153_v52 = vld [vmem:[%s9784_s0 + $0x420] sm:$0xff] }
  0xe3   :  { %v5111_v55 = vpop.f32.mrb[2].mxu0 }
  0xe4   :  { %v6467_v56 = vpop.f32.mrb[3].mxu0  ;;  %5269 = vmatmul.mubr.msk.f32.gmra.mrb[108].mxu0 %vm169_vm1, %v130_v53  ;;  %v6586_v34 = vsel %vm1391_vm4, %v5111_v55, -inf }
  0xe5   :  { %5271 = vmatprep.mubr.msk.f32.mxu0 %vm169_vm1, %v131_v54  ;;  %v6594_v37 = vsel %vm1391_vm4, %v6467_v56, -inf }
  0xe7   :  { %v6477_v59 = vpop.f32.mrb[4].mxu0 }
  0xe8   :  { %v6479_v60 = vpop.f32.mrb[5].mxu0  ;;  %5272 = vmatmul.mubr.msk.f32.gmra.mrb[110].mxu0 %vm169_vm1, %v132_v57  ;;  %v6612_v44 = vsel %vm1391_vm4, %v6477_v59, -inf }
  0xe9   :  { %5274 = vmatprep.mubr.msk.f32.mxu0 %vm169_vm1, %v133_v58  ;;  %v6620_v47 = vsel %vm1391_vm4, %v6479_v60, -inf  ;;  %v154_v60 = vld [vmem:[%s9784_s0 + $0x428] sm:$0xff] }
  0xeb   :  { %v6489_v63 = vpop.f32.mrb[6].mxu0 }
  0xec   :  { %v6491_v0 = vpop.f32.mrb[7].mxu0  ;;  %5275 = vmatmul.mubr.msk.f32.gmra.mrb[112].mxu0 %vm169_vm1, %v134_v61  ;;  %v6638_v54 = vsel %vm1391_vm4, %v6489_v63, -inf }
  0xed   :  { %5277 = vmatprep.mubr.msk.f32.mxu0 %vm169_vm1, %v135_v62  ;;  %v6646_v57 = vsel %vm1391_vm4, %v6491_v0, -inf  ;;  %v155_v62 = vld [vmem:[%s9784_s0 + $0x430] sm:$0xff] }
  0xef   :  { %v6501_v3 = vpop.f32.mrb[8].mxu0 }
  0xf0   :  { %v6503_v4 = vpop.f32.mrb[9].mxu0  ;;  %5278 = vmatmul.mubr.msk.f32.gmra.mrb[114].mxu0 %vm169_vm1, %v136_v1  ;;  %v6664_v0 = vsel %vm1391_vm4, %v6501_v3, -inf  ;;  %v156_v3 = vld [vmem:[%s9784_s0 + $0x438] sm:$0xff] }
  0xf1   :  { %5280 = vmatprep.mubr.msk.f32.mxu0 %vm169_vm1, %v137_v2 }
  0xf3   :  { %v6513_v7 = vpop.f32.mrb[10].mxu0 }
  0xf4   :  { %v6515_v8 = vpop.f32.mrb[11].mxu0  ;;  %5281 = vmatmul.mubr.msk.f32.gmra.mrb[116].mxu0 %vm169_vm1, %v138_v5  ;;  %v6672_v5 = vsel %vm1391_vm4, %v6503_v4, -inf  ;;  %v157_v4 = vld [vmem:[%s9784_s0 + $0x440] sm:$0xff] }
  0xf5   :  { %5283 = vmatprep.mubr.msk.f32.mxu0 %vm169_vm1, %v139_v6 }
  0xf7   :  { %v6525_v11 = vpop.f32.mrb[12].mxu0 }
  0xf8   :  { %v6527_v12 = vpop.f32.mrb[13].mxu0  ;;  %5284 = vmatmul.mubr.msk.f32.gmra.mrb[118].mxu0 %vm169_vm1, %v140_v9 }
  0xf9   :  { %5286 = vmatprep.mubr.msk.f32.mxu0 %vm169_vm1, %v141_v10 }
  0xfb   :  { %v6537_v15 = vpop.f32.mrb[14].mxu0 }
  0xfc   :  { %v6539_v16 = vpop.f32.mrb[15].mxu0  ;;  %5287 = vmatmul.mubr.msk.f32.gmra.mrb[120].mxu0 %vm169_vm1, %v142_v13 }
  0xfd   :  { %5289 = vmatprep.mubr.msk.f32.mxu0 %vm169_vm1, %v143_v14  ;;  %v6690_v14 = vsel %vm1391_vm4, %v6513_v7, -inf  ;;  %v158_v7 = vld [vmem:[%s9784_s0 + $0x448] sm:$0xff] }
  0xff   :  { %v6549_v19 = vpop.f32.mrb[16].mxu0 }
 0x100   :  { %v6551_v20 = vpop.f32.mrb[17].mxu0  ;;  %5290 = vmatmul.mubr.msk.f32.gmra.mrb[122].mxu0 %vm169_vm1, %v144_v17 }
 0x101   :  { %5292 = vmatprep.mubr.msk.f32.mxu0 %vm169_vm1, %v145_v18 }
 0x103   :  { %v5135_v23 = vpop.f32.mrb[18].mxu0 }
 0x104   :  { %v6565_v25 = vsel %vm1391_vm4, %v5135_v23, -inf  ;;  %v762_v26 = vpop.f32.mrb[19].mxu0  ;;  %5293 = vmatmul.mubr.msk.f32.gmra.mrb[124].mxu0 %vm169_vm1, %v146_v21  ;;  %v6698_v21 = vsel %vm1391_vm4, %v6515_v8, -inf  ;;  %v159_v8 = vld [vmem:[%s9784_s0 + $0x450] sm:$0xff] }
 0x105   :  { %v1401_v28 = vmax.f32 %v6562_v24, %v6565_v25  ;;  %v6574_v29 = vsel %vm1391_vm4, %v762_v26, -inf  ;;  %5295 = vmatprep.mubr.msk.f32.mxu0 %vm169_vm1, %v147_v22 }
 0x106   :  { %v1394_v31 = vmax.f32 %v6569_v27, %v6574_v29 }
 0x107   :  { %v5138_v33 = vpop.f32.mrb[20].mxu0 }
 0x108   :  { %v6589_v35 = vsel %vm1391_vm4, %v5138_v33, -inf  ;;  %v772_v36 = vpop.f32.mrb[21].mxu0  ;;  %5296 = vmatmul.mubr.msk.f32.gmra.mrb[126].mxu0 %vm169_vm1, %v148_v30 }
 0x109   :  { %v1415_v38 = vmax.f32 %v6586_v34, %v6589_v35  ;;  %v6599_v39 = vsel %vm1391_vm4, %v772_v36, -inf  ;;  %5298 = vmatprep.mubr.msk.f32.mxu0 %vm169_vm1, %v149_v32  ;;  %v6716_v32 = vsel %vm1391_vm4, %v6525_v11, -inf  ;;  %v160_v11 = vld [vmem:[%s9784_s0 + $0x458] sm:$0xff] }
 0x10a   :  { %v1408_v41 = vmax.f32 %v6594_v37, %v6599_v39 }
 0x10b   :  { %v5141_v43 = vpop.f32.mrb[22].mxu0 }
 0x10c   :  { %v6615_v45 = vsel %vm1391_vm4, %v5141_v43, -inf  ;;  %v782_v46 = vpop.f32.mrb[23].mxu0  ;;  %5299 = vmatmul.mubr.msk.f32.gmra.mrb[128].mxu0 %vm169_vm1, %v150_v40  ;;  %v6724_v40 = vsel %vm1391_vm4, %v6527_v12, -inf  ;;  %v161_v12 = vld [vmem:[%s9784_s0 + $0x460] sm:$0xff] }
 0x10d   :  { %v1429_v48 = vmax.f32 %v6612_v44, %v6615_v45  ;;  %v6625_v49 = vsel %vm1391_vm4, %v782_v46, -inf  ;;  %5301 = vmatprep.mubr.msk.f32.mxu0 %vm169_vm1, %v151_v42 }
 0x10e   :  { %v1422_v51 = vmax.f32 %v6620_v47, %v6625_v49 }
 0x10f   :  { %v5144_v53 = vpop.f32.mrb[24].mxu0 }
 0x110   :  { %v6641_v55 = vsel %vm1391_vm4, %v5144_v53, -inf  ;;  %v792_v56 = vpop.f32.mrb[25].mxu0  ;;  %5302 = vmatmul.mubr.msk.f32.gmra.mrb[130].mxu0 %vm169_vm1, %v152_v50 }
 0x111   :  { %v1443_v58 = vmax.f32 %v6638_v54, %v6641_v55  ;;  %v6651_v59 = vsel %vm1391_vm4, %v792_v56, -inf  ;;  %5304 = vmatprep.mubr.msk.f32.mxu0 %vm169_vm1, %v153_v52  ;;  %v6742_v52 = vsel %vm1391_vm4, %v6537_v15, -inf  ;;  %v162_v15 = vld [vmem:[%s9784_s0 + $0x468] sm:$0xff] }
 0x112   :  { %v1436_v61 = vmax.f32 %v6646_v57, %v6651_v59 }
 0x113   :  { %v5147_v63 = vpop.f32.mrb[26].mxu0 }
 0x114   :  { %v6667_v1 = vsel %vm1391_vm4, %v5147_v63, -inf  ;;  %v802_v2 = vpop.f32.mrb[27].mxu0  ;;  %5305 = vmatmul.mubr.msk.f32.gmra.mrb[132].mxu0 %vm169_vm1, %v154_v60  ;;  %v6750_v60 = vsel %vm1391_vm4, %v6539_v16, -inf  ;;  %v163_v16 = vld [vmem:[%s9784_s0 + $0x470] sm:$0xff] }
 0x115   :  { %v1457_v6 = vmax.f32 %v6664_v0, %v6667_v1  ;;  %v6677_v9 = vsel %vm1391_vm4, %v802_v2, -inf  ;;  %5307 = vmatprep.mubr.msk.f32.mxu0 %vm169_vm1, %v155_v62 }
 0x116   :  { %v1450_v10 = vmax.f32 %v6672_v5, %v6677_v9 }
 0x117   :  { %v5150_v13 = vpop.f32.mrb[28].mxu0 }
 0x118   :  { %v6693_v17 = vsel %vm1391_vm4, %v5150_v13, -inf  ;;  %v812_v18 = vpop.f32.mrb[29].mxu0  ;;  %5308 = vmatmul.mubr.msk.f32.gmra.mrb[134].mxu0 %vm169_vm1, %v156_v3 }
 0x119   :  { %v1471_v22 = vmax.f32 %v6690_v14, %v6693_v17  ;;  %v6703_v23 = vsel %vm1391_vm4, %v812_v18, -inf  ;;  %5310 = vmatprep.mubr.msk.f32.mxu0 %vm169_vm1, %v157_v4  ;;  %v6768_v4 = vsel %vm1391_vm4, %v6549_v19, -inf }
 0x11a   :  { %v1464_v26 = vmax.f32 %v6698_v21, %v6703_v23 }
 0x11b   :  { %v5153_v30 = vpop.f32.mrb[30].mxu0 }
 0x11c   :  { %v6719_v33 = vsel %vm1391_vm4, %v5153_v30, -inf  ;;  %v822_v36 = vpop.f32.mrb[31].mxu0  ;;  %5311 = vmatmul.mubr.msk.f32.gmra.mrb[136].mxu0 %vm169_vm1, %v158_v7  ;;  %v1504_v7 = vsel %vm1391_vm4, %v6551_v20, -inf }
 0x11d   :  { %v1485_v42 = vmax.f32 %v6716_v32, %v6719_v33  ;;  %v6729_v43 = vsel %vm1391_vm4, %v822_v36, -inf  ;;  %5313 = vmatprep.mubr.msk.f32.mxu0 %vm169_vm1, %v159_v8  ;;  %v164_v36 = vld [vmem:[%s9784_s0 + $0x478] sm:$0xff] }
 0x11e   :  { %v1478_v46 = vmax.f32 %v6724_v40, %v6729_v43 }
 0x11f   :  { %v5156_v50 = vpop.f32.mrb[32].mxu0 }
 0x120   :  { %v6745_v53 = vsel %vm1391_vm4, %v5156_v50, -inf  ;;  %v832_v56 = vpop.f32.mrb[33].mxu0  ;;  %5314 = vmatmul.mubr.msk.f32.gmra.mrb[138].mxu0 %vm169_vm1, %v160_v11 }
 0x121   :  { %v1499_v62 = vmax.f32 %v6742_v52, %v6745_v53  ;;  %v6755_v63 = vsel %vm1391_vm4, %v832_v56, -inf  ;;  %5316 = vmatprep.mubr.msk.f32.mxu0 %vm169_vm1, %v161_v12 }
 0x122   :  { %v1492_v2 = vmax.f32 %v6750_v60, %v6755_v63 }
 0x123   :  { %v5159_v3 = vpop.f32.mrb[34].mxu0 }
 0x124   :  { %v1512_v13 = vsel %vm1391_vm4, %v5159_v3, -inf  ;;  %v842_v18 = vpop.f32.mrb[35].mxu0  ;;  %5317 = vmatmul.mubr.msk.f32.gmra.mrb[140].mxu0 %vm169_vm1, %v162_v15 }
 0x125   :  { %v1513_v8 = vmax.f32 %v6768_v4, %v1512_v13  ;;  %v1505_v30 = vsel %vm1391_vm4, %v842_v18, -inf  ;;  %5319 = vmatprep.mubr.msk.f32.mxu0 %vm169_vm1, %v163_v16 }
 0x126   :  { %v1506_v19 = vmax.f32 %v1504_v7, %v1505_v30 }
 0x127   :  { %v5162_v11 = vpop.f32.mrb[36].mxu0 }
 0x128   :  { %v1402_v12 = vsel %vm1391_vm4, %v5162_v11, -inf  ;;  %v852_v50 = vpop.f32.mrb[37].mxu0  ;;  %5320 = vmatmul.mubr.msk.f32.gmra.mrb[142].mxu0 %vm169_vm1, %v164_v36 }
 0x129   :  { %v6785_v20 = vmax.f32 %v1401_v28, %v1402_v12  ;;  %v1395_v56 = vsel %vm1391_vm4, %v852_v50, -inf }
 0x12a   :  { %v6791_v60 = vmax.f32 %v1394_v31, %v1395_v56 }
 0x12b   :  { %v5165_v63 = vpop.f32.mrb[38].mxu0 }
 0x12c   :  { %v1416_v15 = vsel %vm1391_vm4, %v5165_v63, -inf  ;;  %v862_v16 = vpop.f32.mrb[39].mxu0 }
 0x12d   :  { %v6797_v3 = vmax.f32 %v1415_v38, %v1416_v15  ;;  %v1409_v24 = vsel %vm1391_vm4, %v862_v16, -inf }
 0x12e   :  { %v6803_v25 = vmax.f32 %v1408_v41, %v1409_v24 }
 0x12f   :  { %v5168_v28 = vpop.f32.mrb[40].mxu0 }
 0x130   :  { %v1430_v27 = vsel %vm1391_vm4, %v5168_v28, -inf  ;;  %v872_v29 = vpop.f32.mrb[41].mxu0 }
 0x131   :  { %v6809_v31 = vmax.f32 %v1429_v48, %v1430_v27  ;;  %v1423_v34 = vsel %vm1391_vm4, %v872_v29, -inf }
 0x132   :  { %v6815_v35 = vmax.f32 %v1422_v51, %v1423_v34 }
 0x133   :  { %v5171_v38 = vpop.f32.mrb[42].mxu0 }
 0x134   :  { %v1444_v37 = vsel %vm1391_vm4, %v5171_v38, -inf  ;;  %v882_v39 = vpop.f32.mrb[43].mxu0 }
 0x135   :  { %v6821_v41 = vmax.f32 %v1443_v58, %v1444_v37  ;;  %v1437_v44 = vsel %vm1391_vm4, %v882_v39, -inf }
 0x136   :  { %v6827_v45 = vmax.f32 %v1436_v61, %v1437_v44 }
 0x137   :  { %v5174_v48 = vpop.f32.mrb[44].mxu0 }
 0x138   :  { %v1458_v47 = vsel %vm1391_vm4, %v5174_v48, -inf  ;;  %v892_v49 = vpop.f32.mrb[45].mxu0 }
 0x139   :  { %v6833_v51 = vmax.f32 %v1457_v6, %v1458_v47  ;;  %v1451_v54 = vsel %vm1391_vm4, %v892_v49, -inf }
 0x13a   :  { %v6839_v55 = vmax.f32 %v1450_v10, %v1451_v54 }
 0x13b   :  { %v5177_v58 = vpop.f32.mrb[46].mxu0 }
 0x13c   :  { %v1472_v57 = vsel %vm1391_vm4, %v5177_v58, -inf  ;;  %v902_v59 = vpop.f32.mrb[47].mxu0 }
 0x13d   :  { %v6845_v61 = vmax.f32 %v1471_v22, %v1472_v57  ;;  %v1465_v0 = vsel %vm1391_vm4, %v902_v59, -inf }
 0x13e   :  { %v6851_v1 = vmax.f32 %v1464_v26, %v1465_v0 }
 0x13f   :  { %v5180_v6 = vpop.f32.mrb[48].mxu0 }
 0x140   :  { %v1486_v5 = vsel %vm1391_vm4, %v5180_v6, -inf  ;;  %v912_v9 = vpop.f32.mrb[49].mxu0 }
 0x141   :  { %v6857_v10 = vmax.f32 %v1485_v42, %v1486_v5  ;;  %v1479_v14 = vsel %vm1391_vm4, %v912_v9, -inf }
 0x142   :  { %v6863_v17 = vmax.f32 %v1478_v46, %v1479_v14 }
 0x143   :  { %9867 = vst [vmem:[#allocation5_spill] sm:$0xff] %v6857_v10  ;;  %v5183_v22 = vpop.f32.mrb[50].mxu0 }
 0x144   :  { %9868 = vst [vmem:[#allocation6_spill] sm:$0xff] %v6863_v17  ;;  %v1500_v21 = vsel %vm1391_vm4, %v5183_v22, -inf  ;;  %v922_v23 = vpop.f32.mrb[51].mxu0 }
 0x145   :  { %v6869_v26 = vmax.f32 %v1499_v62, %v1500_v21  ;;  %v1493_v32 = vsel %vm1391_vm4, %v922_v23, -inf }
 0x146   :  { %v6872_v33 = vmax.f32 %v1492_v2, %v1493_v32 }
 0x147   :  { %9869 = vst [vmem:[#allocation7_spill] sm:$0xff] %v6869_v26  ;;  %v5186_v42 = vpop.f32.mrb[52].mxu0 }
 0x148   :  { %9870 = vst [vmem:[#allocation8_spill] sm:$0xff] %v6872_v33  ;;  %v1514_v4 = vsel %vm1391_vm4, %v5186_v42, -inf  ;;  %v932_v13 = vpop.f32.mrb[53].mxu0 }
 0x149   :  { %v6875_v40 = vmax.f32 %v1513_v8, %v1514_v4  ;;  %v1507_v43 = vsel %vm1391_vm4, %v932_v13, -inf }
 0x14a   :  { %v6878_v46 = vmax.f32 %v1506_v19, %v1507_v43 }
 0x14b   :  { %9871 = vst [vmem:[#allocation9_spill] sm:$0xff] %v6875_v40  ;;  %v5189_v18 = vpop.f32.mrb[54].mxu0 }
 0x14c   :  { %9872 = vst [vmem:[#allocation10_spill] sm:$0xff] %v6878_v46  ;;  %v6881_v7 = vsel %vm1391_vm4, %v5189_v18, -inf  ;;  %v942_v52 = vpop.f32.mrb[55].mxu0 }
 0x14d   :  { %v6886_v62 = vsel %vm1391_vm4, %v942_v52, -inf }
 0x14f   :  { %v5192_v8 = vpop.f32.mrb[56].mxu0 }
 0x150   :  { %v6891_v30 = vsel %vm1391_vm4, %v5192_v8, -inf  ;;  %v952_v36 = vpop.f32.mrb[57].mxu0 }
 0x151   :  { %v6896_v11 = vsel %vm1391_vm4, %v952_v36, -inf }
 0x153   :  { %v5195_v50 = vpop.f32.mrb[58].mxu0 }
 0x154   :  { %v6901_v56 = vsel %vm1391_vm4, %v5195_v50, -inf  ;;  %v962_v63 = vpop.f32.mrb[59].mxu0 }
 0x155   :  { %v6906_v16 = vsel %vm1391_vm4, %v962_v63, -inf }
 0x157   :  { %v5198_v28 = vpop.f32.mrb[60].mxu0 }
 0x158   :  { %v6911_v27 = vsel %vm1391_vm4, %v5198_v28, -inf  ;;  %v972_v29 = vpop.f32.mrb[61].mxu0 }
 0x159   :  { %v6916_v38 = vsel %vm1391_vm4, %v972_v29, -inf }
 0x15b   :  { %v5201_v39 = vpop.f32.mrb[62].mxu0 }
 0x15c   :  { %v6921_v44 = vsel %vm1391_vm4, %v5201_v39, -inf  ;;  %v982_v48 = vpop.f32.mrb[63].mxu0 }
 0x15d   :  { %v6926_v49 = vsel %vm1391_vm4, %v982_v48, -inf }
 0x15f   :  { %v5204_v58 = vpop.f32.mrb[64].mxu0 }
 0x160   :  { %v6931_v57 = vsel %vm1391_vm4, %v5204_v58, -inf  ;;  %v992_v59 = vpop.f32.mrb[65].mxu0 }
 0x161   :  { %v6936_v6 = vsel %vm1391_vm4, %v992_v59, -inf }
 0x163   :  { %v5207_v9 = vpop.f32.mrb[66].mxu0 }
 0x164   :  { %v6941_v14 = vsel %vm1391_vm4, %v5207_v9, -inf  ;;  %v1002_v22 = vpop.f32.mrb[67].mxu0 }
 0x165   :  { %9873 = vst [vmem:[#allocation11_spill] sm:$0xff] %v6941_v14  ;;  %v6946_v23 = vsel %vm1391_vm4, %v1002_v22, -inf }
 0x166   :  { %9874 = vst [vmem:[#allocation12_spill] sm:$0xff] %v6946_v23 }
 0x167   :  { %v5210_v42 = vpop.f32.mrb[68].mxu0 }
 0x168   :  { %v6951_v4 = vsel %vm1391_vm4, %v5210_v42, -inf  ;;  %v1012_v13 = vpop.f32.mrb[69].mxu0 }
 0x169   :  { %9875 = vst [vmem:[#allocation13_spill] sm:$0xff] %v6951_v4  ;;  %v6956_v18 = vsel %vm1391_vm4, %v1012_v13, -inf }
 0x16a   :  { %9876 = vst [vmem:[#allocation14_spill] sm:$0xff] %v6956_v18 }
 0x16b   :  { %v5213_v8 = vpop.f32.mrb[70].mxu0 }
 0x16c   :  { %v6961_v36 = vsel %vm1391_vm4, %v5213_v8, -inf  ;;  %v1022_v50 = vpop.f32.mrb[71].mxu0 }
 0x16d   :  { %9877 = vst [vmem:[#allocation15_spill] sm:$0xff] %v6961_v36  ;;  %v6966_v28 = vsel %vm1391_vm4, %v1022_v50, -inf }
 0x16e   :  { %9878 = vst [vmem:[#allocation16_spill] sm:$0xff] %v6966_v28 }
 0x16f   :  { %v5216_v39 = vpop.f32.mrb[72].mxu0 }
 0x170   :  { %v1032_v48 = vpop.f32.mrb[73].mxu0  ;;  %v6977_v47 = vsel %vm1391_vm4, %v5216_v39, -inf }
 0x171   :  { %v6983_v24 = vsel %vm1391_vm4, %v1032_v48, -inf }
 0x173   :  { %v5219_v58 = vpop.f32.mrb[74].mxu0 }
 0x174   :  { %v1042_v59 = vpop.f32.mrb[75].mxu0  ;;  %v6993_v39 = vsel %vm1391_vm4, %v5219_v58, -inf }
 0x175   :  { %v6999_v48 = vsel %vm1391_vm4, %v1042_v59, -inf }
 0x177   :  { %v5222_v9 = vpop.f32.mrb[76].mxu0 }
 0x178   :  { %v1052_v22 = vpop.f32.mrb[77].mxu0  ;;  %v7009_v58 = vsel %vm1391_vm4, %v5222_v9, -inf }
 0x179   :  { %v7015_v59 = vsel %vm1391_vm4, %v1052_v22, -inf }
 0x17b   :  { %v5225_v42 = vpop.f32.mrb[78].mxu0 }
 0x17c   :  { %v1062_v13 = vpop.f32.mrb[79].mxu0  ;;  %v7025_v9 = vsel %vm1391_vm4, %v5225_v42, -inf }
 0x17d   :  { %v7031_v22 = vsel %vm1391_vm4, %v1062_v13, -inf }
 0x17f   :  { %v5228_v8 = vpop.f32.mrb[80].mxu0 }
 0x180   :  { %v1072_v52 = vpop.f32.mrb[81].mxu0  ;;  %v7041_v42 = vsel %vm1391_vm4, %v5228_v8, -inf }
 0x181   :  { %v7047_v13 = vsel %vm1391_vm4, %v1072_v52, -inf }
 0x183   :  { %v5231_v43 = vpop.f32.mrb[82].mxu0 }
 0x184   :  { %v1082_v32 = vpop.f32.mrb[83].mxu0  ;;  %v7057_v8 = vsel %vm1391_vm4, %v5231_v43, -inf }
 0x185   :  { %v7063_v52 = vsel %vm1391_vm4, %v1082_v32, -inf }
 0x187   :  { %v5234_v21 = vpop.f32.mrb[84].mxu0 }
 0x188   :  { %v1092_v63 = vpop.f32.mrb[85].mxu0  ;;  %v7073_v43 = vsel %vm1391_vm4, %v5234_v21, -inf }
 0x189   :  { %v7079_v32 = vsel %vm1391_vm4, %v1092_v63, -inf }
 0x18a   :  { %9879 = vst [vmem:[#allocation17_spill] sm:$0xff] %v7079_v32 }
 0x18b   :  { %v5237_v5 = vpop.f32.mrb[86].mxu0 }
 0x18c   :  { %v6970_v50 = vpop.f32.mrb[87].mxu0  ;;  %v7089_v21 = vsel %vm1391_vm4, %v5237_v5, -inf }
 0x18d   :  { %v7096_v63 = vsel %vm1391_vm4, %v6970_v50, -inf }
 0x18e   :  { %9882 = vst [vmem:[#allocation20_spill] sm:$0xff] %v7096_v63 }
 0x18f   :  { %v6972_v0 = vpop.f32.mrb[88].mxu0 }
 0x190   :  { %v6974_v29 = vpop.f32.mrb[89].mxu0  ;;  %v7107_v5 = vsel %vm1391_vm4, %v6972_v0, -inf }
 0x191   :  { %9884 = vst [vmem:[#allocation22_spill] sm:$0xff] %v7107_v5  ;;  %v7114_v50 = vsel %vm1391_vm4, %v6974_v29, -inf }
 0x193   :  { %v5243_v54 = vpop.f32.mrb[90].mxu0 }
 0x194   :  { %v6980_v37 = vsel %vm1391_vm4, %v5243_v54, -inf  ;;  %v1122_v34 = vpop.f32.mrb[91].mxu0 }
 0x195   :  { %v6988_v12 = vsel %vm1391_vm4, %v1122_v34, -inf }
 0x197   :  { %v5246_v2 = vpop.f32.mrb[92].mxu0 }
 0x198   :  { %v6996_v54 = vsel %vm1391_vm4, %v5246_v2, -inf  ;;  %v1132_v53 = vpop.f32.mrb[93].mxu0 }
 0x199   :  { %v7004_v34 = vsel %vm1391_vm4, %v1132_v53, -inf }
 0x19b   :  { %v5249_v28 = vpop.f32.mrb[94].mxu0 }
 0x19c   :  { %v7012_v2 = vsel %vm1391_vm4, %v5249_v28, -inf  ;;  %v1142_v46 = vpop.f32.mrb[95].mxu0 }
 0x19d   :  { %v7020_v53 = vsel %vm1391_vm4, %v1142_v46, -inf }
 0x19f   :  { %v5252_v36 = vpop.f32.mrb[96].mxu0 }
 0x1a0   :  { %v7028_v28 = vsel %vm1391_vm4, %v5252_v36, -inf  ;;  %v1152_v40 = vpop.f32.mrb[97].mxu0 }
 0x1a1   :  { %v7036_v46 = vsel %vm1391_vm4, %v1152_v40, -inf }
 0x1a3   :  { %v5255_v18 = vpop.f32.mrb[98].mxu0 }
 0x1a4   :  { %v7044_v36 = vsel %vm1391_vm4, %v5255_v18, -inf  ;;  %v1162_v33 = vpop.f32.mrb[99].mxu0 }
 0x1a5   :  { %v7052_v40 = vsel %vm1391_vm4, %v1162_v33, -inf }
 0x1a7   :  { %v5258_v4 = vpop.f32.mrb[100].mxu0 }
 0x1a8   :  { %v7060_v18 = vsel %vm1391_vm4, %v5258_v4, -inf  ;;  %v1172_v26 = vpop.f32.mrb[101].mxu0 }
 0x1a9   :  { %v7068_v33 = vsel %vm1391_vm4, %v1172_v26, -inf }
 0x1ab   :  { %v5261_v23 = vpop.f32.mrb[102].mxu0 }
 0x1ac   :  { %v7076_v4 = vsel %vm1391_vm4, %v5261_v23, -inf  ;;  %v1182_v17 = vpop.f32.mrb[103].mxu0 }
 0x1ad   :  { %v7084_v26 = vsel %vm1391_vm4, %v1182_v17, -inf }
 0x1ae   :  { %9880 = vst [vmem:[#allocation18_spill] sm:$0xff] %v7084_v26 }
 0x1af   :  { %v5264_v14 = vpop.f32.mrb[104].mxu0 }
 0x1b0   :  { %v7092_v23 = vsel %vm1391_vm4, %v5264_v14, -inf  ;;  %v1192_v10 = vpop.f32.mrb[105].mxu0 }
 0x1b1   :  { %9881 = vst [vmem:[#allocation19_spill] sm:$0xff] %v7092_v23  ;;  %v7101_v17 = vsel %vm1391_vm4, %v1192_v10, -inf  ;;  %v9888_v10 = vmax.f32 %v6983_v24, %v6988_v12  ;;  %v9890_v12 = vmax.f32 %v6999_v48, %v7004_v34  ;;  %v9893_v48 = vmax.f32 %v7009_v58, %v7012_v2 }
 0x1b2   :  { %9883 = vst [vmem:[#allocation21_spill] sm:$0xff] %v7101_v17  ;;  %v9896_v58 = vmax.f32 %v6803_v25, %v6896_v11  ;;  %v9899_v25 = vmax.f32 %v7031_v22, %v7036_v46  ;;  %v9901_v46 = vmax.f32 %v7041_v42, %v7044_v36  ;;  %v9903_v42 = vmax.f32 %v6821_v41, %v6911_v27 }
 0x1b3   :  { %v5267_v26 = vpop.f32.mrb[106].mxu0  ;;  %v9905_v41 = vmax.f32 %v7057_v8, %v7060_v18  ;;  %v9907_v18 = vmax.f32 %v6833_v51, %v6921_v44  ;;  %v9909_v51 = vmax.f32 %v6845_v61, %v6931_v57  ;;  %v9914_v57 = vld [vmem:[#allocation17_spill] sm:$0xff] }
 0x1b4   :  { %v7110_v14 = vsel %vm1391_vm4, %v5267_v26, -inf  ;;  %v1202_v32 = vpop.f32.mrb[107].mxu0  ;;  %v9887_v26 = vmax.f32 %v6977_v47, %v6980_v37  ;;  %v7145_v47 = vld [vmem:[%s9786_s2] ss:$0 sm:$0xff] }
 0x1b5   :  { %9885 = vst [vmem:[#allocation23_spill] sm:$0xff] %v7110_v14  ;;  %v7119_v15 = vsel %vm1391_vm4, %v1202_v32, -inf  ;;  %v1653_v2 = vadd.f32 %v7145_v47, %v9896_v58  ;;  %v1658_v36 = vadd.f32 %v7145_v47, %v9903_v42  ;;  %v1662_v44 = vadd.f32 %v7145_v47, %v9909_v51 }
 0x1b6   :  { %9886 = vst [vmem:[#allocation24_spill] sm:$0xff] %v7119_v15 }
 0x1b7   :  { %v5270_v17 = vpop.f32.mrb[108].mxu0  ;;  %v1694_v8 = vmax.f32 %v1658_v36, 0.0 }
 0x1b8   :  { %v1528_v0 = vsel %vm1391_vm4, %v5270_v17, -inf  ;;  %v1212_v63 = vpop.f32.mrb[109].mxu0  ;;  %v9889_v17 = vmax.f32 %v6993_v39, %v6996_v54 }
 0x1b9   :  { %v7127_v23 = vmax.f32 %v9887_v26, %v1528_v0  ;;  %v1521_v29 = vsel %vm1391_vm4, %v1212_v63, -inf  ;;  %v5972_v63 = vmov 1983009808   ;;  %v1727_v0 = vlaneseq }
 0x1ba   :  { %v7133_v14 = vmax.f32 %v9888_v10, %v1521_v29  ;;  %v1725_v10 = vunpack.c.l.s4 %v5972_v63  ;;  %v9892_v29 = vmax.f32 %v6791_v60, %v6886_v62  ;;  %v9895_v60 = vmax.f32 %v6797_v3, %v6891_v30 }
 0x1bb   :  { %v5273_v32 = vpop.f32.mrb[110].mxu0  ;;  %v9898_v30 = vmax.f32 %v6809_v31, %v6901_v56 }
 0x1bc   :  { %v1542_v5 = vsel %vm1391_vm4, %v5273_v32, -inf  ;;  %v1222_v19 = vpop.f32.mrb[111].mxu0  ;;  %v1651_v32 = vadd.f32 %v7145_v47, %v9892_v29  ;;  %v1654_v62 = vadd.f32 %v7145_v47, %v9895_v60 }
 0x1bd   :  { %v7139_v15 = vmax.f32 %v9889_v17, %v1542_v5  ;;  %v1535_v37 = vsel %vm1391_vm4, %v1222_v19, -inf  ;;  %v9891_v19 = vmax.f32 %v6785_v20, %v6881_v7  ;;  %v1726_v20 = vunpack.c.0.s8 %v1725_v10 }
 0x1be   :  { %v7150_v24 = vmax.f32 %v9890_v12, %v1535_v37  ;;  %v9894_v37 = vmax.f32 %v7015_v59, %v7020_v53  ;;  %v7172_v7 = vshrl.u32 %v1727_v0, 7  ;;  %v1687_v53 = vmax.f32 %v1651_v32, 0.0 }
 0x1bf   :  { %v5276_v26 = vpop.f32.mrb[112].mxu0  ;;  %v1652_v5 = vadd.f32 %v7145_v47, %v9891_v19  ;;  %v9897_v10 = vmax.f32 %v7025_v9, %v7028_v28  ;;  %v1689_v9 = vmax.f32 %v1653_v2, 0.0  ;;  %v9900_v28 = vmax.f32 %v6815_v35, %v6906_v16 }
 0x1c0   :  { %v1556_v39 = vsel %vm1391_vm4, %v5276_v26, -inf  ;;  %v1232_v54 = vpop.f32.mrb[113].mxu0  ;;  %v7199_v19 = vsub.s32 %v1726_v20, %v7172_v7  ;;  %v9902_v35 = vmax.f32 %v7047_v13, %v7052_v40  ;;  %v9904_v13 = vmax.f32 %v6827_v45, %v6916_v38 }
 0x1c1   :  { %v7164_v34 = vmax.f32 %v9893_v48, %v1556_v39  ;;  %v1549_v17 = vsel %vm1391_vm4, %v1232_v54, -inf  ;;  %v1688_v59 = vmax.f32 %v1652_v5, 0.0  ;;  %v1656_v54 = vadd.f32 %v7145_v47, %v9898_v30 }
 0x1c2   :  { %v7170_v12 = vmax.f32 %v9894_v37, %v1549_v17  ;;  %v1690_v5 = vmax.f32 %v1654_v62, 0.0  ;;  %v1655_v32 = vadd.f32 %v7145_v47, %v9900_v28  ;;  %v9810_v48 = vmov 0.0  }
 0x1c3   :  { %v5279_v63 = vpop.f32.mrb[114].mxu0  ;;  %v1789_v17 = vcombine.high %v1688_v59, %v9810_v48  ;;  %v1723_v22 = vcombine.high %v1687_v53, %v9810_v48  ;;  %v1692_v60 = vmax.f32 %v1656_v54, 0.0  ;;  %v7220_v62 = vrot.slane %v1688_v59, %v7199_v19 }
 0x1c4   :  { %v1570_v26 = vsel %vm1391_vm4, %v5279_v63, -inf  ;;  %v1242_v39 = vpop.f32.mrb[115].mxu0  ;;  %v7223_v63 = vrot.slane %v1687_v53, %v7199_v19  ;;  %v1921_v58 = vcombine.high %v1690_v5, %v9810_v48  ;;  %v1657_v40 = vadd.f32 %v7145_v47, %v9904_v13 }
 0x1c5   :  { %v7186_v0 = vmax.f32 %v9897_v10, %v1570_v26  ;;  %v1563_v3 = vsel %vm1391_vm4, %v1242_v39, -inf  ;;  %v1855_v26 = vcombine.high %v1689_v9, %v9810_v48  ;;  %v1691_v39 = vmax.f32 %v1655_v32, 0.0 }
 0x1c6   :  { %v7196_v11 = vmax.f32 %v9899_v25, %v1563_v3  ;;  %v7237_v10 = vrot.slane %v1789_v17, %v7199_v19  ;;  %v7240_v3 = vrot.slane %v1723_v22, %v7199_v19  ;;  %v7249_v45 = vrot.slane %v1690_v5, %v7199_v19 }
 0x1c7   :  { %v5282_v29 = vpop.f32.mrb[116].mxu0  ;;  %v7252_v38 = vrot.slane %v1689_v9, %v7199_v19  ;;  %v2053_v54 = vcombine.high %v1692_v60, %v9810_v48  ;;  %v9906_v25 = vmax.f32 %v7063_v52, %v7068_v33  ;;  %v7261_v28 = vrot.slane %v1921_v58, %v7199_v19 }
 0x1c8   :  { %v1584_v31 = vsel %vm1391_vm4, %v5282_v29, -inf  ;;  %v1252_v56 = vpop.f32.mrb[117].mxu0  ;;  %v1660_v5 = vadd.f32 %v7145_v47, %v9907_v18  ;;  %v9908_v9 = vmax.f32 %v6839_v55, %v6926_v49  ;;  %v1987_v52 = vcombine.high %v1691_v39, %v9810_v48  ;;  %v9921_v18 = vld [vmem:[#allocation19_spill] sm:$0xff] }
 0x1c9   :  { %v7211_v37 = vmax.f32 %v9901_v46, %v1584_v31  ;;  %v1577_v20 = vsel %vm1391_vm4, %v1252_v56, -inf  ;;  %v7272_v56 = vrot.slane %v1855_v26, %v7199_v19  ;;  %v1693_v33 = vmax.f32 %v1657_v40, 0.0  ;;  %v9918_v40 = vld [vmem:[#allocation5_spill] sm:$0xff] }
 0x1ca   :  { %v7217_v16 = vmax.f32 %v9902_v35, %v1577_v20  ;;  %v1659_v32 = vadd.f32 %v7145_v47, %v9908_v9  ;;  %v9910_v55 = vmax.f32 %v6851_v1, %v6936_v6  ;;  %v9911_v46 = vmax.f32 %v7073_v43, %v7076_v4  ;;  %v9915_v1 = vld [vmem:[#allocation18_spill] sm:$0xff] }
 0x1cb   :  { %v5285_v2 = vpop.f32.mrb[118].mxu0  ;;  %v7291_v58 = vrot.slane %v1692_v60, %v7199_v19  ;;  %v7294_v42 = vrot.slane %v2053_v54, %v7199_v19  ;;  %v7297_v61 = vrot.slane %v1691_v39, %v7199_v19  ;;  %v9916_v6 = vmax.f32 %v9914_v57, %v9915_v1 }
 0x1cc   :  { %v1598_v59 = vsel %vm1391_vm4, %v5285_v2, -inf  ;;  %v1262_v53 = vpop.f32.mrb[119].mxu0  ;;  %v1661_v49 = vadd.f32 %v7145_v47, %v9910_v55  ;;  %v2185_v43 = vcombine.high %v1694_v8, %v9810_v48  ;;  %v1696_v4 = vmax.f32 %v1660_v5, 0.0  ;;  %v9926_v55 = vld [vmem:[#allocation20_spill] sm:$0xff] }
 0x1cd   :  { %v7245_v27 = vmax.f32 %v9905_v41, %v1598_v59  ;;  %v1591_v30 = vsel %vm1391_vm4, %v1262_v53, -inf  ;;  %9912 = vst [vmem:[#allocation25_spill] sm:$0xff] %v7291_v58  ;;  %9913 = vst [vmem:[#allocation26_spill] sm:$0xff] %v7294_v42  ;;  %v1695_v2 = vmax.f32 %v1659_v32, 0.0  ;;  %v7306_v13 = vrot.slane %v1987_v52, %v7199_v19  ;;  %v9919_v59 = vld [vmem:[#allocation11_spill] sm:$0xff]  ;;  %v9923_v52 = vld [vmem:[#allocation6_spill] sm:$0xff] }
 0x1ce   :  { %v7258_v29 = vmax.f32 %v9906_v25, %v1591_v30  ;;  %v2119_v60 = vcombine.high %v1693_v33, %v9810_v48  ;;  %v9920_v53 = vmax.f32 %v9918_v40, %v9919_v59  ;;  %v1698_v54 = vmax.f32 %v1662_v44, 0.0 }
 0x1cf   :  { %v5288_v31 = vpop.f32.mrb[120].mxu0  ;;  %9917 = vst [vmem:[#allocation17_spill] sm:$0xff] %v7306_v13  ;;  %v1697_v25 = vmax.f32 %v1661_v49, 0.0  ;;  %v9922_v5 = vmax.f32 %v7089_v21, %v9921_v18  ;;  %v5974_v49 = vmov 1934713408   ;;  %v7333_v21 = vrot.slane %v2185_v43, %v7199_v19  ;;  %v9932_v18 = vld [vmem:[#allocation22_spill] sm:$0xff] }
 0x1d0   :  { %v1612_v17 = vsel %vm1391_vm4, %v5288_v31, -inf  ;;  %v1272_v22 = vpop.f32.mrb[121].mxu0  ;;  %v1664_v39 = vadd.f32 %v7145_v47, %v9920_v53  ;;  %v7321_v31 = vrot.slane %v1694_v8, %v7199_v19  ;;  %v1756_v57 = vunpack.c.l.s4 %v5974_v49 }
 0x1d1   :  { %v7287_v20 = vmax.f32 %v9911_v46, %v1612_v17  ;;  %v1605_v35 = vsel %vm1391_vm4, %v1272_v22, -inf  ;;  %v9924_v17 = vld [vmem:[#allocation12_spill] sm:$0xff]  ;;  %v9927_v46 = vld [vmem:[#allocation21_spill] sm:$0xff]  ;;  %9929 = vst [vmem:[#allocation18_spill] sm:$0xff] %v7333_v21  ;;  %v7336_v1 = vrot.slane %v1693_v33, %v7199_v19  ;;  %v2317_v8 = vcombine.high %v1696_v4, %v9810_v48 }
 0x1d2   :  { %v7302_v36 = vmax.f32 %v9916_v6, %v1605_v35  ;;  %v9925_v22 = vmax.f32 %v9923_v52, %v9924_v17  ;;  %v9928_v35 = vmax.f32 %v9926_v55, %v9927_v46  ;;  %v2251_v6 = vcombine.high %v1695_v2, %v9810_v48  ;;  %v9936_v55 = vld [vmem:[#allocation13_spill] sm:$0xff]  ;;  %v9938_v46 = vld [vmem:[#allocation24_spill] sm:$0xff] }
 0x1d3   :  { %v5291_v26 = vpop.f32.mrb[122].mxu0  ;;  %v7341_v40 = vrot.slane %v2119_v60, %v7199_v19  ;;  %v7344_v59 = vrot.slane %v1696_v4, %v7199_v19  ;;  %v1700_v53 = vmax.f32 %v1664_v39, 0.0  ;;  %v2449_v43 = vcombine.high %v1698_v54, %v9810_v48 }
 0x1d4   :  { %v1626_v41 = vsel %vm1391_vm4, %v5291_v26, -inf  ;;  %v1282_v30 = vpop.f32.mrb[123].mxu0  ;;  %v1663_v51 = vadd.f32 %v7145_v47, %v9925_v22  ;;  %v2383_v33 = vcombine.high %v1697_v25, %v9810_v48  ;;  %v9935_v22 = vld [vmem:[#allocation7_spill] sm:$0xff]  ;;  %v7365_v48 = vrot.slane %v2317_v8, %v7199_v19 }
 0x1d5   :  { %v7317_v9 = vmax.f32 %v9922_v5, %v1626_v41  ;;  %v1619_v32 = vsel %vm1391_vm4, %v1282_v30, -inf  ;;  %9930 = vst [vmem:[#allocation5_spill] sm:$0xff] %v7341_v40  ;;  %9931 = vst [vmem:[#allocation11_spill] sm:$0xff] %v7344_v59  ;;  %v9933_v5 = vld [vmem:[#allocation23_spill] sm:$0xff]  ;;  %v9937_v4 = vmax.f32 %v9935_v22, %v9936_v55 }
 0x1d6   :  { %v7330_v44 = vmax.f32 %v9928_v35, %v1619_v32  ;;  %v9934_v32 = vmax.f32 %v9932_v18, %v9933_v5  ;;  %v1699_v60 = vmax.f32 %v1663_v51, 0.0  ;;  %v9939_v35 = vmax.f32 %v7114_v50, %v9938_v46  ;;  %9940 = vst [vmem:[#allocation19_spill] sm:$0xff] %v7365_v48  ;;  %v9955_v48 = vld [vmem:[#allocation16_spill] sm:$0xff] }
 0x1d7   :  { %v5294_v26 = vpop.f32.mrb[124].mxu0  ;;  %v1666_v39 = vadd.f32 %v7145_v47, %v9937_v4  ;;  %v7374_v51 = vrot.slane %v1698_v54, %v7199_v19  ;;  %v7377_v5 = vrot.slane %v1697_v25, %v7199_v19  ;;  %v9942_v50 = vmov 0.0  }
 0x1d8   :  { %v1640_v41 = vsel %vm1391_vm4, %v5294_v26, -inf  ;;  %v1292_v30 = vpop.f32.mrb[125].mxu0  ;;  %v1757_v26 = vunpack.c.0.s8 %v1756_v57  ;;  %v9944_v57 = vld [vmem:[#allocation14_spill] sm:$0xff]  ;;  %v7389_v54 = vrot.slane %v2383_v33, %v7199_v19  ;;  %v2515_v46 = vcombine.high %v1699_v60, %v9942_v50 }
 0x1d9   :  { %v7352_v52 = vmax.f32 %v9934_v32, %v1640_v41  ;;  %v1633_v17 = vsel %vm1391_vm4, %v1292_v30, -inf  ;;  %v7368_v41 = vrot.slane %v1695_v2, %v7199_v19  ;;  %v7371_v30 = vrot.slane %v2251_v6, %v7199_v19  ;;  %v3564_v33 = vld [vmem:[%s9787_s3 + $0x88] sm:$0xff] }
 0x1da   :  { %v7362_v49 = vmax.f32 %v9939_v35, %v1633_v17  ;;  %v2581_v32 = vcombine.high %v1700_v53, %v9942_v50  ;;  %v9943_v17 = vld [vmem:[#allocation8_spill] sm:$0xff]  ;;  %v7386_v6 = vrot.slane %v2449_v43, %v7199_v19  ;;  %9947 = vst [vmem:[#allocation20_spill] sm:$0xff] %v7389_v54  ;;  %v1702_v35 = vmax.f32 %v1666_v39, 0.0 }
 0x1db   :  { %9941 = vst [vmem:[#allocation6_spill] sm:$0xff] %v7371_v30  ;;  %v5297_v18 = vpop.f32.mrb[126].mxu0  ;;  %v9945_v22 = vmax.f32 %v9943_v17, %v9944_v57  ;;  %v7396_v57 = vsub.s32 %v1757_v26, %v7172_v7  ;;  %v3563_v43 = vld [vmem:[%s9787_s3 + $0x80] sm:$0xff] }
 0x1dc   :  { %v1530_v2 = vsel %vm1391_vm4, %v5297_v18, -inf  ;;  %v1302_v55 = vpop.f32.mrb[127].mxu0  ;;  %9946 = vst [vmem:[#allocation12_spill] sm:$0xff] %v7386_v6  ;;  %v7408_v18 = vrot.slane %v1699_v60, %v7199_v19  ;;  %v5332_v7 = vpack.c.bf16 %v3564_v33, %v3563_v43  ;;  %v7414_v26 = vrot.slane %v2581_v32, %v7199_v19  ;;  %v3548_v60 = vld [vmem:[%s9787_s3 + $0x8] sm:$0xff]  ;;  %v3565_v6 = vld [vmem:[%s9787_s3 + $0x90] sm:$0xff] }
 0x1dd   :  { %v1665_v8 = vadd.f32 %v7145_v47, %v9945_v22  ;;  %v1531_v4 = vmax.f32 %v7127_v23, %v1530_v2  ;;  %v1523_v25 = vsel %vm1391_vm4, %v1302_v55, -inf  ;;  %v7405_v23 = vrot.slane %v1700_v53, %v7199_v19  ;;  %v3547_v53 = vld [vmem:[%s9787_s3] sm:$0xff] }
 0x1de   :  { %v1524_v17 = vmax.f32 %v7133_v14, %v1523_v25  ;;  %9948 = vst [vmem:[#allocation21_spill] sm:$0xff] %v7414_v26  ;;  %5333 = vmatprep.subr.bf16.mxu1 %v5332_v7  ;;  %v7430_v43 = vrot.slane %v2515_v46, %v7199_v19  ;;  %v2713_v33 = vcombine.high %v1702_v35, %v9942_v50 }
 0x1df   :  { %v7411_v39 = vadd.f32 %v7145_v47, %v1531_v4  ;;  %v5300_v14 = vpop.f32.mrb[128].mxu0  ;;  %v1701_v22 = vmax.f32 %v1665_v8, 0.0  ;;  %v7442_v7 = vrot.slane %v1702_v35, %v7199_v19 }
 0x1e0   :  { %v7417_v2 = vadd.f32 %v7145_v47, %v1524_v17  ;;  %v1544_v55 = vsel %vm1391_vm4, %v5300_v14, -inf  ;;  %v1312_v25 = vpop.f32.mrb[129].mxu0  ;;  %v5334_v17 = vpack.c.bf16 %v3548_v60, %v3547_v53  ;;  %9949 = vst [vmem:[#allocation22_spill] sm:$0xff] %v7430_v43  ;;  %v9952_v53 = vld [vmem:[#allocation15_spill] sm:$0xff] }
 0x1e1   :  { %v9815_v4 = vmax.f32 %v7411_v39, 0.0  ;;  %v1545_v32 = vmax.f32 %v7139_v15, %v1544_v55  ;;  %v1537_v8 = vsel %vm1391_vm4, %v1312_v25, -inf  ;;  %v3566_v15 = vld [vmem:[%s9787_s3 + $0x98] sm:$0xff]  ;;  %9950 = vst [vmem:[#allocation23_spill] sm:$0xff] %v7442_v7  ;;  %v9951_v25 = vld [vmem:[#allocation9_spill] sm:$0xff] }
 0x1e2   :  { %v1705_v14 = vmax.f32 %v7417_v2, 0.0  ;;  %v1538_v26 = vmax.f32 %v7150_v24, %v1537_v8  ;;  %5335 = vmatpush3.bf16.msra.mxu1 %v5334_v17  ;;  %v5336_v55 = vpack.c.bf16 %v3566_v15, %v3565_v6  ;;  %v9953_v60 = vmax.f32 %v9951_v25, %v9952_v53 }
 0x1e3   :  { %v7447_v46 = vrot.slane %v9815_v4, %v7199_v19  ;;  %v7450_v2 = vadd.f32 %v7145_v47, %v1545_v32  ;;  %v5303_v24 = vpop.f32.mrb[130].mxu0  ;;  %v2647_v32 = vcombine.high %v1701_v22, %v9942_v50  ;;  %v7469_v25 = vrot.slane %v1701_v22, %v7199_v19 }
 0x1e4   :  { %v1668_v8 = vadd.f32 %v7145_v47, %v9953_v60  ;;  %v7457_v43 = vrot.slane %v1705_v14, %v7199_v19  ;;  %v7460_v35 = vadd.f32 %v7145_v47, %v1538_v26  ;;  %v1558_v4 = vsel %vm1391_vm4, %v5303_v24, -inf  ;;  %v1322_v54 = vpop.f32.mrb[131].mxu0  ;;  %5337 = vmatprep.subr.bf16.mxu1 %v5336_v55  ;;  %v9954_v60 = vld [vmem:[#allocation10_spill] sm:$0xff] }
 0x1e5   :  { %v9819_v6 = vmax.f32 %v7450_v2, 0.0  ;;  %v1559_v15 = vmax.f32 %v7164_v34, %v1558_v4  ;;  %v1551_v24 = vsel %vm1391_vm4, %v1322_v54, -inf  ;;  %v9956_v30 = vmax.f32 %v9954_v60, %v9955_v48 }
 0x1e6   :  { %v9820_v53 = vmax.f32 %v7460_v35, 0.0  ;;  %v1552_v4 = vmax.f32 %v7170_v12, %v1551_v24  ;;  %v7491_v26 = vrot.slane %v2713_v33, %v7199_v19  ;;  %v1754_v60 = vcombine.high %v7223_v63, %v7457_v43 }
 0x1e7   :  { %v7479_v17 = vadd.f32 %v7145_v47, %v9956_v30  ;;  %v7484_v34 = vrot.slane %v9819_v6, %v7199_v19  ;;  %v7487_v22 = vadd.f32 %v7145_v47, %v1559_v15  ;;  %v5306_v55 = vpop.f32.mrb[132].mxu0  ;;  %v1704_v6 = vmax.f32 %v1668_v8, 0.0 }
 0x1e8   :  { %9957 = vst [vmem:[#allocation7_spill] sm:$0xff] %v7491_v26  ;;  %v7496_v48 = vrot.slane %v9820_v53, %v7199_v19  ;;  %v1572_v30 = vsel %vm1391_vm4, %v5306_v55, -inf  ;;  %v1332_v54 = vpop.f32.mrb[133].mxu0  ;;  %v7505_v33 = vadd.f32 %v7145_v47, %v1552_v4  ;;  %v7508_v24 = vrot.slane %v2647_v32, %v7199_v19 }
 0x1e9   :  { %v9824_v12 = vmax.f32 %v7487_v22, 0.0  ;;  %v1573_v55 = vmax.f32 %v7186_v0, %v1572_v30  ;;  %v1565_v26 = vsel %vm1391_vm4, %v1332_v54, -inf  ;;  %v1703_v8 = vmax.f32 %v7479_v17, 0.0 }
 0x1ea   :  { %9958 = vst [vmem:[#allocation13_spill] sm:$0xff] %v7508_v24  ;;  %v9826_v4 = vmax.f32 %v7505_v33, 0.0  ;;  %v1566_v21 = vmax.f32 %v7196_v11, %v1565_v26  ;;  %v1768_v0 = vrot.slane %v1754_v60, %v7396_v57  ;;  %v1820_v17 = vcombine.high %v7220_v62, %v7447_v46 }
 0x1eb   :  { %v7518_v15 = vrot.slane %v9824_v12, %v7199_v19  ;;  %v5309_v32 = vpop.f32.mrb[134].mxu0  ;;  %v7523_v24 = vadd.f32 %v7145_v47, %v1573_v55  ;;  %v7530_v54 = vcombine.high %v1704_v6, %v9942_v50  ;;  %v1738_v12 = vcombine.high %v1705_v14, %v9942_v50 }
 0x1ec   :  { %v1586_v53 = vsel %vm1391_vm4, %v5309_v32, -inf  ;;  %v1342_v30 = vpop.f32.mrb[135].mxu0  ;;  %v7538_v26 = vrot.slane %v9826_v4, %v7199_v19  ;;  %v7542_v60 = vadd.f32 %v7145_v47, %v1566_v21  ;;  %v1834_v40 = vrot.slane %v1820_v17, %v7396_v57 }
 0x1ed   :  { %9959 = vst [vmem:[#allocation24_spill] sm:$0xff] %v7518_v15  ;;  %9960 = vst [vmem:[#allocation8_spill] sm:$0xff] %v7530_v54  ;;  %v1587_v32 = vmax.f32 %v7211_v37, %v1586_v53  ;;  %v7547_v54 = vrot.slane %v1704_v6, %v7199_v19  ;;  %v1579_v11 = vsel %vm1391_vm4, %v1342_v30, -inf  ;;  %v1786_v4 = vcombine.high %v1768_v0, %v9942_v50 }
 0x1ee   :  { %v9961_v55 = vmax.f32 %v7411_v39, 0.0  ;;  %v9962_v37 = vmax.f32 %v7523_v24, 0.0  ;;  %v9833_v6 = vmax.f32 %v7542_v60, 0.0  ;;  %v5632_v13 = vpack.i.bf16 %v1768_v0, %v1834_v40 }
 0x1ef   :  { %v5312_v42 = vpop.f32.mrb[136].mxu0  ;;  %v7563_v17 = vadd.f32 %v7145_v47, %v1587_v32  ;;  %v1580_v30 = vmax.f32 %v7217_v16, %v1579_v11  ;;  %v1852_v15 = vcombine.high %v1834_v40, %v9942_v50  ;;  %v7569_v39 = vcombine.high %v1703_v8, %v9942_v50 }
 0x1f0   :  { %v1804_v21 = vcombine.high %v9961_v55, %v9942_v50  ;;  %v7559_v53 = vrot.slane %v9962_v37, %v7199_v19  ;;  %v1352_v14 = vpop.f32.mrb[137].mxu0  ;;  %v1600_v58 = vsel %vm1391_vm4, %v5312_v42, -inf  ;;  %v1752_v55 = vrot.slane %v1738_v12, %v7199_v19  ;;  %5633 = vrot.lane.b32.xlu0 %v5632_v13, %s5975_s14 }
 0x1f1   :  { %9963 = vst [vmem:[#allocation14_spill] sm:$0xff] %v7569_v39  ;;  %v7577_v32 = vrot.slane %v9833_v6, %v7199_v19  ;;  %v7582_v16 = vadd.f32 %v7145_v47, %v1580_v30  ;;  %v5642_v42 = vpack.i.bf16 %v1786_v4, %v1852_v15  ;;  %v1601_v40 = vmax.f32 %v7245_v27, %v1600_v58 }
 0x1f2   :  { %v7586_v11 = vrot.slane %v1804_v21, %v7199_v19  ;;  %v9964_v6 = vcombine.low %v7223_v63, %v7457_v43  ;;  %v9966_v13 = vcombine.low %v7220_v62, %v7447_v46  ;;  %v9968_v58 = vmax.f32 %v7450_v2, 0.0 }
 0x1f3   :  { %v5315_v12 = vpop.f32.mrb[138].mxu0  ;;  %v9969_v21 = vmax.f32 %v7563_v17, 0.0  ;;  %v9836_v63 = vmax.f32 %v7582_v16, 0.0  ;;  %5643 = vrot.lane.b32.xlu1 %v5642_v42, %s5976_s15  ;;  %v7613_v43 = vadd.f32 %v7145_v47, %v1601_v40  ;;  %v1593_v2 = vsel %vm1391_vm4, %v1352_v14, -inf }
 0x1f4   :  { %v7594_v0 = vrot.slane %v9964_v6, %v7396_v57  ;;  %v7600_v15 = vrot.slane %v9966_v13, %v7396_v57  ;;  %v1362_v27 = vpop.f32.mrb[139].mxu0  ;;  %v1936_v4 = vcombine.high %v9968_v58, %v9942_v50  ;;  %v1769_v6 = vcombine.low %v7240_v3, %v1752_v55 }
 0x1f5   :  { %v7608_v30 = vrot.slane %v9969_v21, %v7199_v19  ;;  %v7622_v13 = vrot.slane %v1703_v8, %v7199_v19  ;;  %v9970_v58 = vmax.f32 %v7460_v35, 0.0  ;;  %v7632_v21 = vrot.slane %v9836_v63, %v7199_v19 }
 0x1f6   :  { %9965 = vst [vmem:[#allocation9_spill] sm:$0xff] %v7594_v0  ;;  %9967 = vst [vmem:[#allocation15_spill] sm:$0xff] %v7600_v15  ;;  %v1785_v62 = vcombine.high %v7594_v0, %v9942_v50  ;;  %v1851_v46 = vcombine.high %v7600_v15, %v9942_v50  ;;  %v1594_v0 = vmax.f32 %v7258_v29, %v1593_v2  ;;  %v1614_v63 = vsel %vm1391_vm4, %v5315_v12, -inf }
 0x1f7   :  { %v1870_v42 = vcombine.high %v9970_v58, %v9942_v50  ;;  %v5318_v37 = vpop.f32.mrb[140].mxu0  ;;  %v1777_v8 = vrot.slane %v1769_v6, %v7396_v57  ;;  %v7638_v35 = vrot.slane %v1936_v4, %v7199_v19  ;;  %v1835_v40 = vcombine.low %v7237_v10, %v7586_v11 }
 0x1f8   :  { %v5637_v15 = vpack.i.bf16 %v1785_v62, %v1851_v46  ;;  %v1372_v39 = vpop.f32.mrb[141].mxu0  ;;  %v9971_v14 = vmax.f32 %v7487_v22, 0.0  ;;  %v9972_v29 = vmax.f32 %v7613_v43, 0.0  ;;  %v7655_v4 = vadd.f32 %v7145_v47, %v1594_v0 }
 0x1f9   :  { %v1615_v2 = vmax.f32 %v7287_v20, %v1614_v63  ;;  %v1843_v6 = vrot.slane %v1835_v40, %v7396_v57  ;;  %v1787_v12 = vcombine.high %v1777_v8, %v9942_v50  ;;  %v1607_v22 = vsel %vm1391_vm4, %v1362_v27, -inf }
 0x1fa   :  { %v2068_v62 = vcombine.high %v9971_v14, %v9942_v50  ;;  %v7651_v46 = vrot.slane %v9972_v29, %v7199_v19  ;;  %5638 = vrot.lane.b32.xlu0 %v5637_v15, %s5977_s16  ;;  %v1770_v14 = vcombine.high %v7240_v3, %v1752_v55  ;;  %v9973_v29 = vmax.f32 %v7505_v33, 0.0 }
 0x1fb   :  { %v5321_v58 = vpop.f32.mrb[142].mxu0  ;;  %v9839_v0 = vmax.f32 %v7655_v4, 0.0  ;;  %v7669_v20 = vadd.f32 %v7145_v47, %v1615_v2  ;;  %v7674_v40 = vrot.slane %v1870_v42, %v7199_v19  ;;  %v5647_v27 = vpack.i.bf16 %v1777_v8, %v1843_v6 }
 0x1fc   :  { %v2002_v59 = vcombine.high %v9973_v29, %v9942_v50  ;;  %v7671_v63 = vpop.f32.mrb[143].mxu0  ;;  %v1853_v3 = vcombine.high %v1843_v6, %v9942_v50  ;;  %v1608_v55 = vmax.f32 %v7302_v36, %v1607_v22  ;;  %v1784_v2 = vrot.slane %v1770_v14, %v7396_v57 }
 0x1fd   :  { %v7681_v33 = vrot.slane %v9839_v0, %v7199_v19  ;;  %v9841_v29 = vmax.f32 %v7669_v20, 0.0  ;;  %v1836_v15 = vcombine.high %v7237_v10, %v7586_v11  ;;  %v7688_v42 = vrot.slane %v2068_v62, %v7199_v19  ;;  %5648 = vrot.lane.b32.xlu1 %v5647_v27, %s5978_s17 }
 0x1fe   :  { %v5657_v8 = vpack.i.bf16 %v1787_v12, %v1853_v3  ;;  %v7692_v36 = vadd.f32 %v7145_v47, %v1608_v55  ;;  %v1628_v6 = vsel %vm1391_vm4, %v5318_v37, -inf  ;;  %v7696_v22 = vrot.slane %v2002_v59, %v7199_v19 }
 0x1ff   :  { %v9974_v14 = vmax.f32 %v7523_v24, 0.0  ;;  %v7706_v11 = vrot.slane %v9841_v29, %v7199_v19  ;;  %v1850_v59 = vrot.slane %v1836_v15, %v7396_v57  ;;  %v1629_v62 = vmax.f32 %v7317_v9, %v1628_v6 }
 0x200   :  { %5658 = vrot.lane.b32.xlu0 %v5657_v8, %s5979_s18  ;;  %v9840_v37 = vmax.f32 %v7692_v36, 0.0  ;;  %v1621_v24 = vsel %vm1391_vm4, %v1372_v39, -inf  ;;  %v1788_v27 = vcombine.high %v1784_v2, %v9942_v50  ;;  %v9975_v55 = vcombine.low %v7252_v38, %v7496_v48 }
 0x201   :  { %v2200_v0 = vcombine.high %v9974_v14, %v9942_v50  ;;  %v1622_v3 = vmax.f32 %v7330_v44, %v1621_v24  ;;  %v9977_v15 = vmax.f32 %v7542_v60, 0.0  ;;  %v5652_v39 = vpack.i.bf16 %v1784_v2, %v1850_v59 }
 0x202   :  { %v7721_v8 = vrot.slane %v9975_v55, %v7396_v57  ;;  %v7729_v9 = vrot.slane %v9840_v37, %v7199_v19  ;;  %v7732_v6 = vadd.f32 %v7145_v47, %v1629_v62  ;;  %v1854_v44 = vcombine.high %v1850_v59, %v9942_v50 }
 0x203   :  { %v2134_v14 = vcombine.high %v9977_v15, %v9942_v50  ;;  %v7736_v24 = vadd.f32 %v7145_v47, %v1622_v3  ;;  %v9978_v60 = vcombine.low %v7249_v45, %v7484_v34  ;;  %v9980_v2 = vmax.f32 %v7563_v17, 0.0  ;;  %5653 = vrot.lane.b32.xlu1 %v5652_v39, %s5980_s19 }
 0x204   :  { %9976 = vst [vmem:[#allocation10_spill] sm:$0xff] %v7721_v8  ;;  %v1917_v55 = vcombine.high %v7721_v8, %v9942_v50  ;;  %v9845_v59 = vmax.f32 %v7732_v6, 0.0  ;;  %v1642_v3 = vsel %vm1391_vm4, %v5321_v58, -inf  ;;  %v5662_v10 = vpack.i.bf16 %v1788_v27, %v1854_v44 }
 0x205   :  { %v7744_v15 = vrot.slane %v9978_v60, %v7396_v57  ;;  %v2332_v12 = vcombine.high %v9980_v2, %v9942_v50  ;;  %v9844_v37 = vmax.f32 %v7736_v24, 0.0  ;;  %v1643_v29 = vmax.f32 %v7352_v52, %v1642_v3 }
 0x206   :  { %v7759_v17 = vrot.slane %v2200_v0, %v7199_v19  ;;  %v7764_v2 = vrot.slane %v9845_v59, %v7199_v19  ;;  %v1886_v39 = vcombine.high %v7252_v38, %v7496_v48  ;;  %v1952_v58 = vcombine.high %v7249_v45, %v7484_v34  ;;  %5663 = vrot.lane.b32.xlu0 %v5662_v10, %s5981_s20 }
 0x207   :  { %9979 = vst [vmem:[#allocation16_spill] sm:$0xff] %v7744_v15  ;;  %v1983_v60 = vcombine.high %v7744_v15, %v9942_v50  ;;  %v9982_v27 = vmax.f32 %v7582_v16, 0.0  ;;  %v7777_v52 = vrot.slane %v9844_v37, %v7199_v19  ;;  %v7780_v3 = vadd.f32 %v7145_v47, %v1643_v29  ;;  %v9993_v37 = vld [vmem:[#allocation26_spill] sm:$0xff]  ;;  %v10020_v15 = vld [vmem:[#allocation21_spill] sm:$0xff] }
 0x208   :  { %9981 = vst [vmem:[#allocation27_spill] sm:$0xff] %v7764_v2  ;;  %v7783_v38 = vrot.slane %v2134_v14, %v7199_v19  ;;  %v1900_v34 = vrot.slane %v1886_v39, %v7396_v57  ;;  %v1966_v48 = vrot.slane %v1952_v58, %v7396_v57  ;;  %v7790_v16 = vrot.slane %v2332_v12, %v7199_v19 }
 0x209   :  { %v2266_v44 = vcombine.high %v9982_v27, %v9942_v50  ;;  %v5672_v0 = vpack.i.bf16 %v1917_v55, %v1983_v60  ;;  %v9843_v29 = vmax.f32 %v7780_v3, 0.0  ;;  %v1635_v14 = vsel %vm1391_vm4, %v7671_v63, -inf }
 0x20a   :  { %v5667_v55 = vpack.i.bf16 %v1900_v34, %v1966_v48  ;;  %v1636_v60 = vmax.f32 %v7362_v49, %v1635_v14  ;;  %v1918_v39 = vcombine.high %v1900_v34, %v9942_v50  ;;  %v1984_v58 = vcombine.high %v1966_v48, %v9942_v50 }
 0x20b   :  { %5673 = vrot.lane.b32.xlu1 %v5672_v0, %s5977_s16  ;;  %v7802_v12 = vrot.slane %v2266_v44, %v7199_v19  ;;  %v7807_v27 = vrot.slane %v9843_v29, %v7199_v19  ;;  %v1901_v0 = vcombine.low %v7272_v56, %v7674_v40  ;;  %v1967_v63 = vcombine.low %v7261_v28, %v7638_v35  ;;  %v9992_v29 = vld [vmem:[#allocation17_spill] sm:$0xff] }
 0x20c   :  { %5668 = vrot.lane.b32.xlu0 %v5667_v55, %s5975_s14  ;;  %v7815_v49 = vadd.f32 %v7145_v47, %v1636_v60  ;;  %v5677_v34 = vpack.i.bf16 %v1918_v39, %v1984_v58  ;;  %v1902_v44 = vcombine.high %v7272_v56, %v7674_v40  ;;  %v1968_v48 = vcombine.high %v7261_v28, %v7638_v35  ;;  %v9986_v58 = vld [vmem:[#allocation25_spill] sm:$0xff] }
 0x20d   :  { %v9983_v14 = vmax.f32 %v7613_v43, 0.0  ;;  %v1909_v62 = vrot.slane %v1901_v0, %v7396_v57  ;;  %v1975_v55 = vrot.slane %v1967_v63, %v7396_v57  ;;  %v9984_v28 = vcombine.low %v7297_v61, %v7538_v26  ;;  %v9987_v0 = vld [vmem:[#allocation24_spill] sm:$0xff] }
 0x20e   :  { %v9842_v47 = vmax.f32 %v7815_v49, 0.0  ;;  %v1916_v56 = vrot.slane %v1902_v44, %v7396_v57  ;;  %v1982_v40 = vrot.slane %v1968_v48, %v7396_v57  ;;  %v9988_v63 = vcombine.low %v9986_v58, %v9987_v0 }
 0x20f   :  { %v2464_v45 = vcombine.high %v9983_v14, %v9942_v50  ;;  %5678 = vrot.lane.b32.xlu1 %v5677_v34, %s5976_s15  ;;  %v7836_v43 = vrot.slane %v9984_v28, %v7396_v57  ;;  %v5682_v35 = vpack.i.bf16 %v1909_v62, %v1975_v55  ;;  %v1919_v60 = vcombine.high %v1909_v62, %v9942_v50 }
 0x210   :  { %v1985_v39 = vcombine.high %v1975_v55, %v9942_v50  ;;  %v7844_v34 = vrot.slane %v9988_v63, %v7396_v57  ;;  %v9990_v44 = vmax.f32 %v7655_v4, 0.0  ;;  %v7852_v14 = vrot.slane %v9842_v47, %v7199_v19 }
 0x211   :  { %9985 = vst [vmem:[#allocation28_spill] sm:$0xff] %v7836_v43  ;;  %v5687_v28 = vpack.i.bf16 %v1916_v56, %v1982_v40  ;;  %v1920_v62 = vcombine.high %v1916_v56, %v9942_v50  ;;  %5683 = vrot.lane.b32.xlu0 %v5682_v35, %s5978_s17  ;;  %v1986_v10 = vcombine.high %v1982_v40, %v9942_v50  ;;  %v9991_v40 = vmax.f32 %v7669_v20, 0.0 }
 0x212   :  { %9989 = vst [vmem:[#allocation25_spill] sm:$0xff] %v7844_v34  ;;  %v2398_v48 = vcombine.high %v9990_v44, %v9942_v50  ;;  %v5692_v55 = vpack.i.bf16 %v1919_v60, %v1985_v39  ;;  %v2049_v63 = vcombine.high %v7836_v43, %v9942_v50  ;;  %v2115_v4 = vcombine.high %v7844_v34, %v9942_v50 }
 0x213   :  { %v7862_v44 = vrot.slane %v2464_v45, %v7199_v19  ;;  %v2018_v56 = vcombine.high %v7297_v61, %v7538_v26  ;;  %v2084_v35 = vcombine.high %v9986_v58, %v9987_v0  ;;  %v2596_v60 = vcombine.high %v9991_v40, %v9942_v50 }
 0x214   :  { %5693 = vrot.lane.b32.xlu1 %v5692_v55, %s5979_s18  ;;  %v5697_v39 = vpack.i.bf16 %v1920_v62, %v1986_v10  ;;  %v2033_v45 = vcombine.low %v9992_v29, %v7696_v22  ;;  %v2099_v59 = vcombine.low %v9993_v37, %v7688_v42  ;;  %v2034_v26 = vcombine.high %v9992_v29, %v7696_v22 }
 0x215   :  { %v2032_v47 = vrot.slane %v2018_v56, %v7396_v57  ;;  %v2098_v61 = vrot.slane %v2084_v35, %v7396_v57  ;;  %v2100_v20 = vcombine.high %v9993_v37, %v7688_v42  ;;  %v7885_v58 = vrot.slane %v2398_v48, %v7199_v19  ;;  %5688 = vrot.lane.b32.xlu0 %v5687_v28, %s5980_s19 }
 0x216   :  { %v5707_v10 = vpack.i.bf16 %v2049_v63, %v2115_v4  ;;  %v2041_v0 = vrot.slane %v2033_v45, %v7396_v57  ;;  %v2107_v62 = vrot.slane %v2099_v59, %v7396_v57  ;;  %v2048_v22 = vrot.slane %v2034_v26, %v7396_v57 }
 0x217   :  { %v5702_v55 = vpack.i.bf16 %v2032_v47, %v2098_v61  ;;  %v2050_v56 = vcombine.high %v2032_v47, %v9942_v50  ;;  %v2116_v35 = vcombine.high %v2098_v61, %v9942_v50  ;;  %v2114_v48 = vrot.slane %v2100_v20, %v7396_v57  ;;  %v9997_v20 = vld [vmem:[#allocation5_spill] sm:$0xff] }
 0x218   :  { %5698 = vrot.lane.b32.xlu1 %v5697_v39, %s5981_s20  ;;  %v5717_v42 = vpack.i.bf16 %v2041_v0, %v2107_v62  ;;  %v2051_v37 = vcombine.high %v2041_v0, %v9942_v50  ;;  %v2117_v29 = vcombine.high %v2107_v62, %v9942_v50  ;;  %v7898_v28 = vrot.slane %v2596_v60, %v7199_v19 }
 0x219   :  { %v9994_v59 = vmax.f32 %v7692_v36, 0.0  ;;  %v5712_v63 = vpack.i.bf16 %v2050_v56, %v2116_v35  ;;  %v2052_v4 = vcombine.high %v2048_v22, %v9942_v50  ;;  %5708 = vrot.lane.b32.xlu0 %v5707_v10, %s5977_s16  ;;  %v5722_v39 = vpack.i.bf16 %v2048_v22, %v2114_v48  ;;  %v9998_v10 = vld [vmem:[#allocation18_spill] sm:$0xff] }
 0x21a   :  { %v5727_v40 = vpack.i.bf16 %v2051_v37, %v2117_v29  ;;  %v2118_v45 = vcombine.high %v2114_v48, %v9942_v50  ;;  %v2150_v61 = vcombine.high %v7336_v1, %v7577_v32  ;;  %v9995_v60 = vcombine.low %v7336_v1, %v7577_v32 }
 0x21b   :  { %v2530_v47 = vcombine.high %v9994_v59, %v9942_v50  ;;  %v2216_v36 = vcombine.high %v7321_v31, %v7559_v53  ;;  %v2165_v0 = vcombine.low %v9997_v20, %v7783_v38  ;;  %v2231_v62 = vcombine.low %v9998_v10, %v7759_v17 }
 0x21c   :  { %v7912_v26 = vrot.slane %v9995_v60, %v7396_v57  ;;  %5703 = vrot.lane.b32.xlu1 %v5702_v55, %s5975_s14  ;;  %v5732_v56 = vpack.i.bf16 %v2052_v4, %v2118_v45  ;;  %v2164_v35 = vrot.slane %v2150_v61, %v7396_v57  ;;  %v2166_v22 = vcombine.high %v9997_v20, %v7783_v38 }
 0x21d   :  { %v2232_v1 = vcombine.high %v9998_v10, %v7759_v17  ;;  %v9999_v32 = vcombine.low %v7321_v31, %v7559_v53  ;;  %v2230_v29 = vrot.slane %v2216_v36, %v7396_v57  ;;  %v7934_v48 = vrot.slane %v2165_v0, %v7396_v57  ;;  %5713 = vrot.lane.b32.xlu0 %v5712_v63, %s5976_s15 }
 0x21e   :  { %9996 = vst [vmem:[#allocation24_spill] sm:$0xff] %v7912_v26  ;;  %v7937_v55 = vrot.slane %v2231_v62, %v7396_v57  ;;  %v7940_v59 = vrot.slane %v2530_v47, %v7199_v19  ;;  %v7944_v17 = vcombine.high %v2164_v35, %v9942_v50  ;;  %v7947_v31 = vrot.slane %v2166_v22, %v7396_v57  ;;  %v10001_v22 = vld [vmem:[#allocation11_spill] sm:$0xff] }
 0x21f   :  { %v7930_v37 = vrot.slane %v9999_v32, %v7396_v57  ;;  %v7950_v53 = vrot.slane %v2232_v1, %v7396_v57  ;;  %v5737_v38 = vpack.i.bf16 %v2164_v35, %v2230_v29  ;;  %v2248_v4 = vcombine.high %v2230_v29, %v9942_v50  ;;  %v10002_v32 = vld [vmem:[#allocation6_spill] sm:$0xff] }
 0x220   :  { %v7957_v47 = vcombine.high %v7934_v48, %v9942_v50  ;;  %5718 = vrot.lane.b32.xlu1 %v5717_v42, %s5978_s17  ;;  %v7962_v63 = vcombine.high %v7937_v55, %v9942_v50  ;;  %v7968_v60 = vcombine.high %v7947_v31, %v9942_v50  ;;  %v2181_v20 = vcombine.high %v7912_v26, %v9942_v50 }
 0x221   :  { %10000 = vst [vmem:[#allocation17_spill] sm:$0xff] %v7930_v37  ;;  %v7972_v36 = vcombine.high %v7950_v53, %v9942_v50  ;;  %v2247_v42 = vcombine.high %v7930_v37, %v9942_v50  ;;  %v5747_v0 = vpack.i.bf16 %v7944_v17, %v2248_v4  ;;  %v2282_v10 = vcombine.high %v7368_v41, %v7632_v21 }
 0x222   :  { %5728 = vrot.lane.b32.xlu0 %v5727_v40, %s5979_s18  ;;  %v5762_v62 = vpack.i.bf16 %v7957_v47, %v7962_v63  ;;  %v2348_v1 = vcombine.high %v10001_v22, %v7608_v30  ;;  %v2297_v29 = vcombine.low %v10002_v32, %v7802_v12  ;;  %v10003_v17 = vmax.f32 %v7732_v6, 0.0  ;;  %v10004_v40 = vld [vmem:[#allocation19_spill] sm:$0xff] }
 0x223   :  { %v7994_v61 = vrot.slane %v2282_v10, %v7396_v57  ;;  %v2363_v45 = vcombine.low %v10004_v40, %v7790_v16  ;;  %v2298_v47 = vcombine.high %v10002_v32, %v7802_v12  ;;  %v10005_v63 = vmax.f32 %v7736_v24, 0.0 }
 0x224   :  { %v2728_v4 = vcombine.high %v10003_v17, %v9942_v50  ;;  %5723 = vrot.lane.b32.xlu1 %v5722_v39, %s5980_s19  ;;  %v8005_v26 = vrot.slane %v2348_v1, %v7396_v57  ;;  %v8008_v6 = vrot.slane %v2297_v29, %v7396_v57  ;;  %v2364_v10 = vcombine.high %v10004_v40, %v7790_v16 }
 0x225   :  { %v2662_v35 = vcombine.high %v10005_v63, %v9942_v50  ;;  %v5742_v17 = vpack.i.bf16 %v2181_v20, %v2247_v42  ;;  %v8014_v37 = vcombine.high %v7994_v61, %v9942_v50  ;;  %v8017_v12 = vrot.slane %v2363_v45, %v7396_v57 }
 0x226   :  { %v8020_v24 = vrot.slane %v2298_v47, %v7396_v57  ;;  %5733 = vrot.lane.b32.xlu0 %v5732_v56, %s5981_s20  ;;  %v8027_v1 = vcombine.high %v8005_v26, %v9942_v50  ;;  %v8031_v16 = vcombine.high %v8008_v6, %v9942_v50  ;;  %v8034_v20 = vrot.slane %v2364_v10, %v7396_v57 }
 0x227   :  { %v8037_v45 = vrot.slane %v2728_v4, %v7199_v19  ;;  %v8043_v42 = vcombine.high %v8017_v12, %v9942_v50  ;;  %v10006_v29 = vcombine.low %v7368_v41, %v7632_v21  ;;  %v2480_v41 = vcombine.high %v7374_v51, %v7651_v46  ;;  %v10008_v21 = vld [vmem:[#allocation20_spill] sm:$0xff] }
 0x228   :  { %v8047_v32 = vcombine.high %v8020_v24, %v9942_v50  ;;  %5743 = vrot.lane.b32.xlu1 %v5742_v17, %s5977_s16  ;;  %v8062_v63 = vcombine.high %v8034_v20, %v9942_v50  ;;  %v2414_v17 = vcombine.high %v7377_v5, %v7681_v33  ;;  %v10009_v47 = vcombine.low %v10001_v22, %v7608_v30  ;;  %v10011_v4 = vld [vmem:[#allocation12_spill] sm:$0xff] }
 0x229   :  { %v8054_v40 = vrot.slane %v10006_v29, %v7396_v57  ;;  %v2429_v29 = vcombine.low %v10008_v21, %v7885_v58  ;;  %v2495_v39 = vcombine.low %v10011_v4, %v7862_v44  ;;  %v2430_v43 = vcombine.high %v10008_v21, %v7885_v58 }
 0x22a   :  { %5738 = vrot.lane.b32.xlu0 %v5737_v38, %s5975_s14  ;;  %v8077_v56 = vrot.slane %v10009_v47, %v7396_v57  ;;  %v8086_v34 = vrot.slane %v2414_v17, %v7396_v57  ;;  %v8089_v38 = vrot.slane %v2480_v41, %v7396_v57  ;;  %v2496_v30 = vcombine.high %v10011_v4, %v7862_v44 }
 0x22b   :  { %10007 = vst [vmem:[#allocation26_spill] sm:$0xff] %v8054_v40  ;;  %v8092_v8 = vrot.slane %v2429_v29, %v7396_v57  ;;  %v8097_v22 = vrot.slane %v2662_v35, %v7199_v19  ;;  %v10012_v47 = vmax.f32 %v7780_v3, 0.0  ;;  %v8106_v58 = vrot.slane %v2495_v39, %v7396_v57 }
 0x22c   :  { %10010 = vst [vmem:[#allocation5_spill] sm:$0xff] %v8077_v56  ;;  %5748 = vrot.lane.b32.xlu1 %v5747_v0, %s5976_s15  ;;  %v8109_v17 = vrot.slane %v2430_v43, %v7396_v57  ;;  %v8115_v44 = vcombine.high %v8086_v34, %v9942_v50  ;;  %v8119_v3 = vcombine.high %v8089_v38, %v9942_v50 }
 0x22d   :  { %v8102_v10 = vcombine.high %v10012_v47, %v9942_v50  ;;  %v8123_v0 = vcombine.high %v8092_v8, %v9942_v50  ;;  %v10015_v43 = vpack.i.bf16 %v7934_v48, %v7937_v55  ;;  %v8133_v39 = vcombine.high %v8106_v58, %v9942_v50 }
 0x22e   :  { %10013 = vst [vmem:[#allocation18_spill] sm:$0xff] %v8109_v17  ;;  %v8136_v4 = vrot.slane %v2496_v30, %v7396_v57  ;;  %v8140_v21 = vcombine.high %v8109_v17, %v9942_v50  ;;  %v2313_v29 = vcombine.high %v8054_v40, %v9942_v50  ;;  %v2379_v48 = vcombine.high %v8077_v56, %v9942_v50 }
 0x22f   :  { %10014 = vst [vmem:[#allocation11_spill] sm:$0xff] %v8123_v0  ;;  %5753 = vrot.lane.b32.xlu0 %v10015_v43, %s5978_s17  ;;  %10016 = vst [vmem:[#allocation6_spill] sm:$0xff] %v8133_v39  ;;  %v2546_v47 = vcombine.high %v7408_v18, %v7729_v9  ;;  %v2612_v41 = vcombine.high %v7405_v23, %v7706_v11  ;;  %v10018_v55 = vmax.f32 %v7815_v49, 0.0 }
 0x230   :  { %10017 = vst [vmem:[#allocation19_spill] sm:$0xff] %v8136_v4  ;;  %5763 = vrot.lane.b32.xlu1 %v5762_v62, %s5979_s18  ;;  %v8157_v35 = vcombine.high %v8136_v4, %v9942_v50  ;;  %v10019_v62 = vld [vmem:[#allocation22_spill] sm:$0xff]  ;;  %v2627_v43 = vcombine.low %v10020_v15, %v7898_v28  ;;  %v10021_v4 = vpack.i.bf16 %v7947_v31, %v7950_v53 }
 0x231   :  { %v2794_v40 = vcombine.high %v10018_v55, %v9942_v50  ;;  %v8165_v56 = vrot.slane %v2546_v47, %v7396_v57  ;;  %v2561_v30 = vcombine.low %v10019_v62, %v7940_v59  ;;  %v8178_v49 = vrot.slane %v2612_v41, %v7396_v57 }
 0x232   :  { %v2562_v55 = vcombine.high %v10019_v62, %v7940_v59  ;;  %v2628_v47 = vcombine.high %v10020_v15, %v7898_v28  ;;  %v5777_v39 = vpack.i.bf16 %v2313_v29, %v2379_v48  ;;  %v8192_v53 = vrot.slane %v2627_v43, %v7396_v57  ;;  %v10032_v43 = vld [vmem:[#allocation13_spill] sm:$0xff] }
 0x233   :  { %5758 = vrot.lane.b32.xlu0 %v10021_v4, %s5980_s19  ;;  %v8186_v0 = vcombine.high %v8165_v56, %v9942_v50  ;;  %v8189_v31 = vrot.slane %v2561_v30, %v7396_v57  ;;  %v10024_v41 = vpack.i.bf16 %v7968_v60, %v7972_v36  ;;  %v8202_v15 = vcombine.high %v8178_v49, %v9942_v50  ;;  %v3549_v30 = vld [vmem:[%s9787_s3 + $0x10] sm:$0xff] }
 0x234   :  { %10023 = vst [vmem:[#allocation12_spill] sm:$0xff] %v8192_v53  ;;  %v8205_v28 = vrot.slane %v2562_v55, %v7396_v57  ;;  %v8208_v4 = vrot.slane %v2628_v47, %v7396_v57  ;;  %v8211_v29 = vrot.slane %v2794_v40, %v7199_v19  ;;  %v8221_v48 = vcombine.high %v8192_v53, %v9942_v50  ;;  %v3550_v40 = vld [vmem:[%s9787_s3 + $0x18] sm:$0xff] }
 0x235   :  { %10022 = vst [vmem:[#allocation20_spill] sm:$0xff] %v8189_v31  ;;  %5768 = vrot.lane.b32.xlu1 %v10024_v41, %s5981_s20  ;;  %v8217_v36 = vcombine.high %v8189_v31, %v9942_v50  ;;  %v3567_v41 = vld [vmem:[%s9787_s3 + $0xa0] sm:$0xff]  ;;  %v10029_v62 = vcombine.low %v7377_v5, %v7681_v33  ;;  %v2678_v59 = vcombine.high %v7469_v25, %v7777_v52 }
 0x236   :  { %10025 = vst [vmem:[#allocation22_spill] sm:$0xff] %v8205_v28  ;;  %10026 = vst [vmem:[#allocation21_spill] sm:$0xff] %v8208_v4  ;;  %v8236_v55 = vcombine.high %v8205_v28, %v9942_v50  ;;  %v8240_v47 = vcombine.high %v8208_v4, %v9942_v50  ;;  %v2744_v17 = vcombine.high %v7442_v7, %v7764_v2  ;;  %v3551_v4 = vld [vmem:[%s9787_s3 + $0x20] sm:$0xff]  ;;  %v3552_v28 = vld [vmem:[%s9787_s3 + $0x28] sm:$0xff] }
 0x237   :  { %10027 = vst [vmem:[#allocation29_spill] sm:$0xff] %v8217_v36  ;;  %10028 = vst [vmem:[#allocation30_spill] sm:$0xff] %v8221_v48  ;;  %5778 = vrot.lane.b32.xlu0 %v5777_v39, %s5977_s16  ;;  %v3568_v39 = vld [vmem:[%s9787_s3 + $0xa8] sm:$0xff]  ;;  %v8252_v60 = vrot.slane %v10029_v62, %v7396_v57  ;;  %v10031_v5 = vpack.i.bf16 %v7994_v61, %v8005_v26  ;;  %v5338_v62 = vpack.c.bf16 %v3550_v40, %v3549_v30  ;;  %v10033_v36 = vld [vmem:[#allocation7_spill] sm:$0xff] }
 0x238   :  { %v2693_v48 = vcombine.low %v10032_v43, %v8097_v22  ;;  %v2759_v53 = vcombine.low %v10033_v36, %v8037_v45  ;;  %v10034_v31 = vcombine.low %v7374_v51, %v7651_v46  ;;  %v8283_v7 = vrot.slane %v2678_v59, %v7396_v57 }
 0x239   :  { %10030 = vst [vmem:[#allocation31_spill] sm:$0xff] %v8252_v60  ;;  %5773 = vrot.lane.b32.xlu1 %v10031_v5, %s5975_s14  ;;  %v8286_v26 = vrot.slane %v2744_v17, %v7396_v57  ;;  %v5340_v61 = vpack.c.bf16 %v3568_v39, %v3567_v41  ;;  %v10035_v30 = vpack.i.bf16 %v8014_v37, %v8027_v1  ;;  %v3570_v17 = vld [vmem:[%s9787_s3 + $0xb8] sm:$0xff] }
 0x23a   :  { %v8280_v2 = vrot.slane %v10034_v31, %v7396_v57  ;;  %5339 = vmatpush3.bf16.msra.mxu1 %v5338_v62  ;;  %v8293_v40 = vrot.slane %v2693_v48, %v7396_v57  ;;  %v8296_v51 = vrot.slane %v2759_v53, %v7396_v57  ;;  %v5342_v46 = vpack.c.bf16 %v3552_v28, %v3551_v4  ;;  %v3569_v31 = vld [vmem:[%s9787_s3 + $0xb0] sm:$0xff]  ;;  %v3554_v4 = vld [vmem:[%s9787_s3 + $0x38] sm:$0xff] }
 0x23b   :  { %5783 = vrot.lane.b32.xlu0 %v10035_v30, %s5976_s15  ;;  %v2445_v37 = vcombine.high %v8252_v60, %v9942_v50  ;;  %v8310_v59 = vcombine.high %v8283_v7, %v9942_v50  ;;  %v8314_v53 = vcombine.high %v8286_v26, %v9942_v50  ;;  %5341 = vmatprep.subr.bf16.mxu1 %v5340_v61  ;;  %v3553_v28 = vld [vmem:[%s9787_s3 + $0x30] sm:$0xff]  ;;  %v3571_v61 = vld [vmem:[%s9787_s3 + $0xc0] sm:$0xff] }
 0x23c   :  { %v10036_v48 = vpack.i.bf16 %v8008_v6, %v8017_v12  ;;  %v8330_v39 = vcombine.high %v8293_v40, %v9942_v50  ;;  %v8334_v5 = vcombine.high %v8296_v51, %v9942_v50  ;;  %v2694_v62 = vcombine.high %v10032_v43, %v8097_v22  ;;  %v3572_v6 = vld [vmem:[%s9787_s3 + $0xc8] sm:$0xff] }
 0x23d   :  { %v2511_v12 = vcombine.high %v8280_v2, %v9942_v50  ;;  %v5344_v41 = vpack.c.bf16 %v3570_v17, %v3569_v31  ;;  %v10037_v22 = vpack.i.bf16 %v8031_v16, %v8043_v42  ;;  %v5346_v33 = vpack.c.bf16 %v3554_v4, %v3553_v28  ;;  %v3555_v42 = vld [vmem:[%s9787_s3 + $0x40] sm:$0xff] }
 0x23e   :  { %5788 = vrot.lane.b32.xlu1 %v10036_v48, %s5978_s17  ;;  %v2760_v48 = vcombine.high %v10033_v36, %v8037_v45  ;;  %v5902_v43 = vpack.i.bf16 %v8330_v39, %v8334_v5  ;;  %5343 = vmatpush3.bf16.msra.mxu1 %v5342_v46  ;;  %v8357_v1 = vrot.slane %v2694_v62, %v7396_v57  ;;  %v3556_v36 = vld [vmem:[%s9787_s3 + $0x48] sm:$0xff]  ;;  %v10038_v46 = vld [vmem:[#allocation8_spill] sm:$0xff]  ;;  %v3573_v62 = vld [vmem:[%s9787_s3 + $0xd0] sm:$0xff] }
 0x23f   :  { %5798 = vrot.lane.b32.xlu0 %v10037_v22, %s5979_s18  ;;  %v2874_v30 = vrot.slane %v8102_v10, %v7199_v19  ;;  %5345 = vmatprep.subr.bf16.mxu1 %v5344_v41  ;;  %v5348_v45 = vpack.c.bf16 %v3572_v6, %v3571_v61  ;;  %v2810_v16 = vcombine.high %v7622_v13, %v7852_v14  ;;  %v10039_v10 = vld [vmem:[#allocation14_spill] sm:$0xff] }
 0x240   :  { %v8362_v60 = vrot.slane %v2760_v48, %v7396_v57  ;;  %v2859_v31 = vrot.slane %v10038_v46, %v7199_v19  ;;  %v2793_v17 = vrot.slane %v10039_v10, %v7199_v19  ;;  %v10040_v28 = vpack.i.bf16 %v8020_v24, %v8034_v20  ;;  %v3574_v19 = vld [vmem:[%s9787_s3 + $0xd8] sm:$0xff]  ;;  %v3557_v46 = vld [vmem:[%s9787_s3 + $0x50] sm:$0xff] }
 0x241   :  { %v8382_v4 = vcombine.high %v8357_v1, %v9942_v50  ;;  %v2876_v41 = vcombine.high %v7547_v54, %v7807_v27  ;;  %v5812_v61 = vpack.i.bf16 %v2445_v37, %v2511_v12  ;;  %v8399_v6 = vrot.slane %v2810_v16, %v7396_v57  ;;  %v3558_v16 = vld [vmem:[%s9787_s3 + $0x58] sm:$0xff] }
 0x242   :  { %5793 = vrot.lane.b32.xlu1 %v10040_v28, %s5980_s19  ;;  %v8396_v20 = vcombine.high %v8362_v60, %v9942_v50  ;;  %v10041_v48 = vpack.i.bf16 %v8047_v32, %v8062_v63  ;;  %5347 = vmatpush3.bf16.msra.mxu1 %v5346_v33  ;;  %v5350_v37 = vpack.c.bf16 %v3556_v36, %v3555_v42  ;;  %v3575_v42 = vld [vmem:[%s9787_s3 + $0xe0] sm:$0xff]  ;;  %v3576_v36 = vld [vmem:[%s9787_s3 + $0xe8] sm:$0xff] }
 0x243   :  { %v8406_v22 = vrot.slane %v2876_v41, %v7396_v57  ;;  %v2825_v12 = vcombine.low %v2793_v17, %v8211_v29  ;;  %5349 = vmatprep.subr.bf16.mxu1 %v5348_v45  ;;  %v8419_v32 = vcombine.high %v8399_v6, %v9942_v50  ;;  %v5352_v63 = vpack.c.bf16 %v3574_v19, %v3573_v62 }
 0x244   :  { %5803 = vrot.lane.b32.xlu0 %v10041_v48, %s5981_s20  ;;  %v2891_v33 = vcombine.low %v2859_v31, %v2874_v30  ;;  %v5354_v19 = vpack.c.bf16 %v3558_v16, %v3557_v46  ;;  %v2826_v48 = vcombine.high %v2793_v17, %v8211_v29  ;;  %v2892_v10 = vcombine.high %v2859_v31, %v2874_v30  ;;  %v3559_v30 = vld [vmem:[%s9787_s3 + $0x60] sm:$0xff]  ;;  %v3560_v31 = vld [vmem:[%s9787_s3 + $0x68] sm:$0xff] }
 0x245   :  { %v8432_v45 = vcombine.high %v8406_v22, %v9942_v50  ;;  %v8435_v41 = vrot.slane %v2825_v12, %v7396_v57  ;;  %v5356_v24 = vpack.c.bf16 %v3576_v36, %v3575_v42  ;;  %v10043_v17 = vpack.i.bf16 %v8115_v44, %v8119_v3  ;;  %v3578_v44 = vld [vmem:[%s9787_s3 + $0xf8] sm:$0xff] }
 0x246   :  { %5813 = vrot.lane.b32.xlu1 %v5812_v61, %s5977_s16  ;;  %v8438_v62 = vrot.slane %v2891_v33, %v7396_v57  ;;  %v10042_v61 = vpack.i.bf16 %v8086_v34, %v8089_v38  ;;  %5351 = vmatpush3.bf16.msra.mxu1 %v5350_v37  ;;  %v8458_v34 = vrot.slane %v2826_v48, %v7396_v57  ;;  %v3577_v33 = vld [vmem:[%s9787_s3 + $0xf0] sm:$0xff] }
 0x247   :  { %v5922_v28 = vpack.i.bf16 %v8419_v32, %v8432_v45  ;;  %v8449_v12 = vcombine.high %v8435_v41, %v9942_v50  ;;  %5353 = vmatprep.subr.bf16.mxu1 %v5352_v63  ;;  %v8461_v38 = vrot.slane %v2892_v10, %v7396_v57  ;;  %v10044_v37 = vcombine.low %v7408_v18, %v7729_v9 }
 0x248   :  { %5808 = vrot.lane.b32.xlu0 %v10042_v61, %s5975_s14  ;;  %v5927_v46 = vpack.i.bf16 %v8435_v41, %v8438_v62  ;;  %v8455_v29 = vcombine.high %v8438_v62, %v9942_v50  ;;  %v10045_v10 = vcombine.low %v7405_v23, %v7706_v11  ;;  %v8497_v9 = vcombine.high %v8458_v34, %v9942_v50  ;;  %v3561_v61 = vld [vmem:[%s9787_s3 + $0x70] sm:$0xff] }
 0x249   :  { %v8477_v16 = vrot.slane %v10044_v37, %v7396_v57  ;;  %v5937_v18 = vpack.i.bf16 %v8458_v34, %v8461_v38  ;;  %v8501_v23 = vcombine.high %v8461_v38, %v9942_v50  ;;  %v10046_v11 = vpack.i.bf16 %v8092_v8, %v8106_v58  ;;  %v10047_v37 = vld [vmem:[#allocation11_spill] sm:$0xff] }
 0x24a   :  { %5818 = vrot.lane.b32.xlu1 %v10043_v17, %s5976_s15  ;;  %v8483_v63 = vrot.slane %v10045_v10, %v7396_v57  ;;  %v5932_v3 = vpack.i.bf16 %v8449_v12, %v8455_v29  ;;  %5355 = vmatpush3.bf16.msra.mxu1 %v5354_v19  ;;  %v5358_v42 = vpack.c.bf16 %v3560_v31, %v3559_v30  ;;  %v3562_v17 = vld [vmem:[%s9787_s3 + $0x78] sm:$0xff]  ;;  %v10048_v10 = vld [vmem:[#allocation6_spill] sm:$0xff]  ;;  %v3595_v19 = vld [vmem:[%s9787_s3 + $0x180] sm:$0xff] }
 0x24b   :  { %5357 = vmatprep.subr.bf16.mxu1 %v5356_v24  ;;  %v5360_v48 = vpack.c.bf16 %v3578_v44, %v3577_v33  ;;  %v10049_v8 = vpack.i.bf16 %v10047_v37, %v10048_v10  ;;  %v2577_v58 = vcombine.high %v8477_v16, %v9942_v50  ;;  %v3596_v30 = vld [vmem:[%s9787_s3 + $0x188] sm:$0xff]  ;;  %v10051_v33 = vld [vmem:[#allocation19_spill] sm:$0xff]  ;;  %v10053_v10 = vpack.i.bf16 %v8140_v21, %v8157_v35 }
 0x24c   :  { %5823 = vrot.lane.b32.xlu0 %v10046_v11, %s5978_s17  ;;  %v2643_v24 = vcombine.high %v8483_v63, %v9942_v50  ;;  %v10050_v31 = vld [vmem:[#allocation18_spill] sm:$0xff]  ;;  %v5362_v11 = vpack.c.bf16 %v3562_v17, %v3561_v61  ;;  %v5364_v37 = vpack.c.bf16 %v3596_v30, %v3595_v19  ;;  %v10054_v36 = vpack.i.bf16 %v8165_v56, %v8178_v49  ;;  %v10058_v61 = vld [vmem:[#allocation27_spill] sm:$0xff]  ;;  %v10060_v56 = vld [vmem:[#allocation20_spill] sm:$0xff] }
 0x24d   :  { %v10052_v44 = vpack.i.bf16 %v10050_v31, %v10051_v33  ;;  %v10056_v35 = vcombine.low %v7469_v25, %v7777_v52  ;;  %v10061_v49 = vld [vmem:[#allocation12_spill] sm:$0xff]  ;;  %v10066_v19 = vld [vmem:[#allocation22_spill] sm:$0xff]  ;;  %v10067_v30 = vld [vmem:[#allocation21_spill] sm:$0xff]  ;;  %v10069_v33 = vpack.i.bf16 %v8236_v55, %v8240_v47  ;;  %v10073_v55 = vcombine.low %v7547_v54, %v7807_v27 }
 0x24e   :  { %5833 = vrot.lane.b32.xlu1 %v10049_v8, %s5979_s18  ;;  %5359 = vmatpush3.bf16.msra.mxu1 %v5358_v42  ;;  %v5847_v8 = vpack.i.bf16 %v2577_v58, %v2643_v24  ;;  %v10055_v42 = vpack.i.bf16 %v8186_v0, %v8202_v15  ;;  %v10063_v0 = vld [vmem:[#allocation29_spill] sm:$0xff]  ;;  %v10064_v15 = vld [vmem:[#allocation30_spill] sm:$0xff]  ;;  %v10068_v31 = vpack.i.bf16 %v10066_v19, %v10067_v30 }
 0x24f   :  { %5361 = vmatprep.subr.bf16.mxu1 %v5360_v48  ;;  %v8550_v21 = vrot.slane %v10056_v35, %v7396_v57  ;;  %v10057_v48 = vld [vmem:[#allocation23_spill] sm:$0xff]  ;;  %v10065_v24 = vpack.i.bf16 %v10063_v0, %v10064_v15  ;;  %v8597_v47 = vrot.slane %v10073_v55, %v7396_v57  ;;  %v10076_v27 = vpack.i.bf16 %v8382_v4, %v8396_v20  ;;  %v3580_v12 = vld [vmem:[%s9787_s3 + $0x108] sm:$0xff] }
 0x250   :  { %5828 = vrot.lane.b32.xlu0 %v10052_v44, %s5980_s19  ;;  %v10059_v17 = vcombine.low %v10057_v48, %v10058_v61  ;;  %v10079_v4 = vpack.i.bf16 %v8399_v6, %v8406_v22  ;;  %v10080_v29 = vpack.i.bf16 %v8497_v9, %v8501_v23  ;;  %v3600_v55 = vld [vmem:[%s9787_s3 + $0x1a8] sm:$0xff] }
 0x251   :  { %v2709_v25 = vcombine.high %v8550_v21, %v9942_v50 }
 0x252   :  { %5838 = vrot.lane.b32.xlu1 %v10053_v10, %s5981_s20  ;;  %5363 = vmatpush3.bf16.msra.mxu1 %v5362_v11  ;;  %v8556_v58 = vrot.slane %v10059_v17, %v7396_v57  ;;  %v10070_v11 = vpack.i.bf16 %v8283_v7, %v8286_v26  ;;  %v10072_v10 = vcombine.low %v7622_v13, %v7852_v14 }
 0x253   :  { %5365 = vmatprep.subr.bf16.mxu1 %v5364_v37  ;;  %v10071_v37 = vpack.i.bf16 %v8310_v59, %v8314_v53  ;;  %v10074_v7 = vpack.i.bf16 %v8293_v40, %v8296_v51  ;;  %v2907_v14 = vcombine.high %v8597_v47, %v9942_v50 }
 0x254   :  { %5848 = vrot.lane.b32.xlu0 %v5847_v8, %s5977_s16  ;;  %v2775_v52 = vcombine.high %v8556_v58, %v9942_v50  ;;  %v8591_v8 = vrot.slane %v10072_v10, %v7396_v57  ;;  %v10075_v57 = vpack.i.bf16 %v8357_v1, %v8362_v60  ;;  %v10077_v60 = vld [vmem:[#allocation9_spill] sm:$0xff] }
 0x255   :  { %v3599_v10 = vld [vmem:[%s9787_s3 + $0x1a0] sm:$0xff] }
 0x256   :  { %5843 = vrot.lane.b32.xlu1 %v10054_v36, %s5975_s14  ;;  %v10062_v36 = vpack.i.bf16 %v10060_v56, %v10061_v49  ;;  %v5882_v44 = vpack.i.bf16 %v2709_v25, %v2775_v52  ;;  %v2841_v13 = vcombine.high %v8591_v8, %v9942_v50  ;;  %v3598_v25 = vld [vmem:[%s9787_s3 + $0x198] sm:$0xff] }
 0x258   :  { %5853 = vrot.lane.b32.xlu0 %v10055_v42, %s5976_s15  ;;  %v5917_v40 = vpack.i.bf16 %v2841_v13, %v2907_v14  ;;  %v10078_v42 = vld [vmem:[#allocation15_spill] sm:$0xff] }
 0x25a   :  { %5858 = vrot.lane.b32.xlu1 %v10062_v36, %s5978_s17 }
 0x25c   :  { %5868 = vrot.lane.b32.xlu0 %v10065_v24, %s5979_s18 }
 0x25e   :  { %5863 = vrot.lane.b32.xlu1 %v10068_v31, %s5980_s19 }
 0x260   :  { %5873 = vrot.lane.b32.xlu0 %v10069_v33, %s5981_s20 }
 0x262   :  { %5883 = vrot.lane.b32.xlu1 %v5882_v44, %s5977_s16  ;;  %v5634_v26 = vpop.permute.xlu0 %5633 }
 0x263   :  { %v5636_v39 = vunpack.i.h.bf16 %v5634_v26  ;;  %v5635_v50 = vunpack.i.l.bf16 %v5634_v26 }
 0x264   :  { %5878 = vrot.lane.b32.xlu0 %v10070_v11, %s5975_s14  ;;  %v3581_v11 = vld [vmem:[%s9787_s3 + $0x110] sm:$0xff] }
 0x265   :  { %v5644_v54 = vpop.permute.xlu1 %5643 }
 0x266   :  { %5888 = vrot.lane.b32.xlu1 %v10071_v37, %s5976_s15  ;;  %v5646_v5 = vunpack.i.h.bf16 %v5644_v54  ;;  %v3582_v37 = vld [vmem:[%s9787_s3 + $0x118] sm:$0xff] }
 0x268   :  { %5893 = vrot.lane.b32.xlu0 %v10074_v7, %s5978_s17  ;;  %v10081_v7 = vld [vmem:[#allocation16_spill] sm:$0xff] }
 0x26a   :  { %5903 = vrot.lane.b32.xlu1 %v5902_v43, %s5979_s18  ;;  %v5645_v43 = vunpack.i.l.bf16 %v5644_v54 }
 0x26c   :  { %5898 = vrot.lane.b32.xlu0 %v10075_v57, %s5980_s19  ;;  %v5639_v51 = vpop.permute.xlu0 %5638  ;;  %v5370_v57 = vpack.c.bf16 %v3582_v37, %v3581_v11  ;;  %v10083_v11 = vld [vmem:[#allocation25_spill] sm:$0xff] }
 0x26d   :  { %v5641_v59 = vunpack.i.h.bf16 %v5639_v51  ;;  %v5640_v53 = vunpack.i.l.bf16 %v5639_v51  ;;  %v3584_v51 = vld [vmem:[%s9787_s3 + $0x128] sm:$0xff] }
 0x26e   :  { %5908 = vrot.lane.b32.xlu1 %v10076_v27, %s5981_s20  ;;  %v5372_v27 = vpack.c.bf16 %v3600_v55, %v3599_v10 }
 0x26f   :  { %v3415_v1 = vsel %vm1391_vm4, %v10077_v60, %v5641_v59  ;;  %v3428_v35 = vsel %vm1391_vm4, %v10078_v42, %v5640_v53  ;;  %v5649_v56 = vpop.permute.xlu1 %5648 }
 0x270   :  { %5918 = vrot.lane.b32.xlu0 %v5917_v40, %s5977_s16  ;;  %v3417_v20 = vsel %vm3416_vm5, %v3415_v1, %v5636_v39  ;;  %v3429_v48 = vsel %vm3416_vm5, %v3428_v35, %v5635_v50  ;;  %v5651_v49 = vunpack.i.h.bf16 %v5649_v56  ;;  %v5650_v36 = vunpack.i.l.bf16 %v5649_v56  ;;  %v3583_v40 = vld [vmem:[%s9787_s3 + $0x120] sm:$0xff]  ;;  %v3601_v39 = vld [vmem:[%s9787_s3 + $0x1b0] sm:$0xff]  ;;  %v3602_v50 = vld [vmem:[%s9787_s3 + $0x1b8] sm:$0xff] }
 0x271   :  { %v3419_v61 = vsel %vm3418_vm6, %v3417_v20, %v5646_v5  ;;  %v3430_v17 = vsel %vm3418_vm6, %v3429_v48, %v5645_v43  ;;  %v5374_v60 = vpack.c.bf16 %v3584_v51, %v3583_v40  ;;  %v5376_v42 = vpack.c.bf16 %v3602_v50, %v3601_v39  ;;  %v3585_v35 = vld [vmem:[%s9787_s3 + $0x130] sm:$0xff]  ;;  %v3603_v48 = vld [vmem:[%s9787_s3 + $0x1c0] sm:$0xff] }
 0x272   :  { %5913 = vrot.lane.b32.xlu1 %v10079_v4, %s5975_s14  ;;  %v5659_v0 = vpop.permute.xlu0 %5658  ;;  %v3421_v6 = vsel %vm3420_vm7, %v3419_v61, %v5651_v49  ;;  %v3431_v22 = vsel %vm3420_vm7, %v3430_v17, %v5650_v36  ;;  %v3586_v4 = vld [vmem:[%s9787_s3 + $0x138] sm:$0xff]  ;;  %v3604_v61 = vld [vmem:[%s9787_s3 + $0x1c8] sm:$0xff] }
 0x273   :  { %v5661_v15 = vunpack.i.h.bf16 %v5659_v0  ;;  %v5660_v24 = vunpack.i.l.bf16 %v5659_v0  ;;  %v5378_v0 = vpack.c.bf16 %v3586_v4, %v3585_v35  ;;  %v3593_v4 = vld [vmem:[%s9787_s3 + $0x170] sm:$0xff] }
 0x274   :  { %5923 = vrot.lane.b32.xlu0 %v5922_v28, %s5976_s15 }
 0x275   :  { %v5654_v32 = vpop.permute.xlu1 %5653  ;;  %v3432_v28 = vsel %vm3422_vm8, %v3431_v22, %v5660_v24  ;;  %v3423_v45 = vsel %vm3422_vm8, %v3421_v6, %v5661_v15  ;;  %v5380_v15 = vpack.c.bf16 %v3604_v61, %v3603_v48  ;;  %v3587_v24 = vld [vmem:[%s9787_s3 + $0x140] sm:$0xff]  ;;  %v3594_v48 = vld [vmem:[%s9787_s3 + $0x178] sm:$0xff] }
 0x276   :  { %5928 = vrot.lane.b32.xlu1 %v5927_v46, %s5978_s17  ;;  %v5656_v41 = vunpack.i.h.bf16 %v5654_v32  ;;  %v5655_v62 = vunpack.i.l.bf16 %v5654_v32  ;;  %v3579_v46 = vld [vmem:[%s9787_s3 + $0x100] sm:$0xff]  ;;  %v3588_v32 = vld [vmem:[%s9787_s3 + $0x148] sm:$0xff] }
 0x277   :  { %v5366_v31 = vpack.c.bf16 %v3580_v12, %v3579_v46 }
 0x278   :  { %5933 = vrot.lane.b32.xlu0 %v5932_v3, %s5979_s18  ;;  %v5664_v3 = vpop.permute.xlu0 %5663  ;;  %v3433_v34 = vsel %vm3424_vm9, %v3432_v28, %v5655_v62  ;;  %v3425_v38 = vsel %vm3424_vm9, %v3423_v45, %v5656_v41  ;;  %v3605_v45 = vld [vmem:[%s9787_s3 + $0x1d0] sm:$0xff]  ;;  %v3606_v41 = vld [vmem:[%s9787_s3 + $0x1d8] sm:$0xff] }
 0x279   :  { %v5666_v52 = vunpack.i.h.bf16 %v5664_v3  ;;  %v5665_v19 = vunpack.i.l.bf16 %v5664_v3 }
 0x27a   :  { %5938 = vrot.lane.b32.xlu1 %v5937_v18, %s5980_s19  ;;  %v3597_v18 = vld [vmem:[%s9787_s3 + $0x190] sm:$0xff] }
 0x27b   :  { %v3434_v23 = vsel %vm3426_vm10, %v3433_v34, %v5665_v19  ;;  %v3427_v33 = vsel %vm3426_vm10, %v3425_v38, %v5666_v52  ;;  %v5368_v44 = vpack.c.bf16 %v3598_v25, %v3597_v18  ;;  %v5382_v38 = vpack.c.bf16 %v3588_v32, %v3587_v24  ;;  %v3589_v19 = vld [vmem:[%s9787_s3 + $0x150] sm:$0xff]  ;;  %v3611_v32 = vld [vmem:[%s9787_s3 + $0x200] sm:$0xff] }
 0x27c   :  { %5943 = vrot.lane.b32.xlu0 %v10080_v29, %s5981_s20  ;;  %3906 = vmatprep.mubr.f32.mxu1 %v3434_v23  ;;  %v10082_v29 = vld [vmem:[#allocation10_spill] sm:$0xff]  ;;  %v5384_v52 = vpack.c.bf16 %v3606_v41, %v3605_v45  ;;  %v3607_v23 = vld [vmem:[%s9787_s3 + $0x1e0] sm:$0xff] }
 0x27d   :  { %v5674_v30 = vpop.permute.xlu1 %5673  ;;  %3907 = vmatmul.mubr.f32.vlgmr.msra.gmra.mrb[0].mxu1 %v3427_v33  ;;  %v3608_v33 = vld [vmem:[%s9787_s3 + $0x1e8] sm:$0xff] }
 0x27e   :  { %v5675_v9 = vunpack.i.l.bf16 %v5674_v30  ;;  %v5669_v13 = vpop.permute.xlu0 %5668  ;;  %5367 = vmatpush3.bf16.msra.mxu1 %v5366_v31  ;;  %v5676_v49 = vunpack.i.h.bf16 %v5674_v30  ;;  %v3590_v30 = vld [vmem:[%s9787_s3 + $0x158] sm:$0xff]  ;;  %v3612_v45 = vld [vmem:[%s9787_s3 + $0x208] sm:$0xff] }
 0x27f   :  { %v5670_v14 = vunpack.i.l.bf16 %v5669_v13  ;;  %5369 = vmatprep.subr.bf16.mxu1 %v5368_v44  ;;  %v5671_v62 = vunpack.i.h.bf16 %v5669_v13 }
 0x280   :  { %v3442_v26 = vsel %vm1391_vm4, %v10081_v7, %v5675_v9  ;;  %v3435_v3 = vsel %vm1391_vm4, %v10082_v29, %v5676_v49  ;;  %v5386_v7 = vpack.c.bf16 %v3590_v30, %v3589_v19  ;;  %v3631_v19 = vld [vmem:[%s9787_s3 + $0x2a0] sm:$0xff]  ;;  %v3632_v30 = vld [vmem:[%s9787_s3 + $0x2a8] sm:$0xff] }
 0x281   :  { %v8686_v54 = vpop.permute.xlu1 %5678  ;;  %v3443_v59 = vsel %vm3416_vm5, %v3442_v26, %v5670_v14  ;;  %v3436_v44 = vsel %vm3416_vm5, %v3435_v3, %v5671_v62  ;;  %v3629_v62 = vld [vmem:[%s9787_s3 + $0x290] sm:$0xff]  ;;  %v5398_v3 = vpack.c.bf16 %v3612_v45, %v3611_v32  ;;  %v3640_v32 = vld [vmem:[%s9787_s3 + $0x2e8] sm:$0xff] }
 0x282   :  { %v5680_v53 = vunpack.i.l.bf16 %v8686_v54  ;;  %5371 = vmatpush3.bf16.msra.mxu1 %v5370_v57  ;;  %v5681_v31 = vunpack.i.h.bf16 %v8686_v54  ;;  %v5388_v57 = vpack.c.bf16 %v3608_v33, %v3607_v23  ;;  %v3591_v54 = vld [vmem:[%s9787_s3 + $0x160] sm:$0xff]  ;;  %v5404_v33 = vpack.c.bf16 %v3632_v30, %v3631_v19 }
 0x283   :  { %v8703_v43 = vpop.permute.xlu0 %5683  ;;  %5373 = vmatprep.subr.bf16.mxu1 %v5372_v27  ;;  %v3592_v27 = vld [vmem:[%s9787_s3 + $0x168] sm:$0xff] }
 0x284   :  { %v3444_v5 = vsel %vm3418_vm6, %v3443_v59, %v5680_v53  ;;  %v5685_v1 = vunpack.i.l.bf16 %v8703_v43  ;;  %v5686_v26 = vunpack.i.h.bf16 %v8703_v43  ;;  %v3437_v40 = vsel %vm3418_vm6, %v3436_v44, %v5681_v31  ;;  %v3609_v59 = vld [vmem:[%s9787_s3 + $0x1f0] sm:$0xff]  ;;  %v3610_v53 = vld [vmem:[%s9787_s3 + $0x1f8] sm:$0xff]  ;;  %v3615_v44 = vld [vmem:[%s9787_s3 + $0x220] sm:$0xff] }
 0x285   :  { %v5392_v35 = vpack.c.bf16 %v3610_v53, %v3609_v59 }
 0x286   :  { %v8712_v20 = vpop.permute.xlu1 %5693  ;;  %v3445_v17 = vsel %vm3420_vm7, %v3444_v5, %v5685_v1  ;;  %5375 = vmatpush3.bf16.msra.mxu1 %v5374_v60  ;;  %v5390_v60 = vpack.c.bf16 %v3592_v27, %v3591_v54  ;;  %v3438_v1 = vsel %vm3420_vm7, %v3437_v40, %v5686_v26  ;;  %v3635_v54 = vld [vmem:[%s9787_s3 + $0x2c0] sm:$0xff]  ;;  %v3636_v27 = vld [vmem:[%s9787_s3 + $0x2c8] sm:$0xff] }
 0x287   :  { %v5695_v56 = vunpack.i.l.bf16 %v8712_v20  ;;  %v8722_v36 = vpop.permute.xlu0 %5688  ;;  %5377 = vmatprep.subr.bf16.mxu1 %v5376_v42  ;;  %v5696_v5 = vunpack.i.h.bf16 %v8712_v20 }
 0x288   :  { %v5690_v6 = vunpack.i.l.bf16 %v8722_v36  ;;  %v5691_v49 = vunpack.i.h.bf16 %v8722_v36 }
 0x289   :  { %v3446_v22 = vsel %vm3422_vm8, %v3445_v17, %v5695_v56  ;;  %v3627_v17 = vld [vmem:[%s9787_s3 + $0x280] sm:$0xff]  ;;  %v3628_v56 = vld [vmem:[%s9787_s3 + $0x288] sm:$0xff] }
 0x28a   :  { %v8732_v28 = vpop.permute.xlu1 %5698  ;;  %v3447_v12 = vsel %vm3424_vm9, %v3446_v22, %v5690_v6  ;;  %5379 = vmatpush3.bf16.msra.mxu1 %v5378_v0  ;;  %v3439_v0 = vsel %vm3422_vm8, %v3438_v1, %v5696_v5  ;;  %v5396_v24 = vpack.c.bf16 %v3628_v56, %v3627_v17  ;;  %v3619_v5 = vld [vmem:[%s9787_s3 + $0x240] sm:$0xff]  ;;  %v3638_v1 = vld [vmem:[%s9787_s3 + $0x2d8] sm:$0xff] }
 0x28b   :  { %v5700_v46 = vunpack.i.l.bf16 %v8732_v28  ;;  %v8744_v34 = vpop.permute.xlu0 %5708  ;;  %5381 = vmatprep.subr.bf16.mxu1 %v5380_v15  ;;  %v5394_v15 = vpack.c.bf16 %v3594_v48, %v3593_v4  ;;  %v5701_v41 = vunpack.i.h.bf16 %v8732_v28  ;;  %v3440_v29 = vsel %vm3424_vm9, %v3439_v0, %v5691_v49  ;;  %v3613_v28 = vld [vmem:[%s9787_s3 + $0x210] sm:$0xff]  ;;  %v10085_v56 = vld [vmem:[#allocation17_spill] sm:$0xff] }
 0x28c   :  { %v5710_v18 = vunpack.i.l.bf16 %v8744_v34  ;;  %v5711_v40 = vunpack.i.h.bf16 %v8744_v34  ;;  %v3637_v34 = vld [vmem:[%s9787_s3 + $0x2d0] sm:$0xff] }
 0x28d   :  { %v3448_v25 = vsel %vm3426_vm10, %v3447_v12, %v5700_v46  ;;  %v3630_v46 = vld [vmem:[%s9787_s3 + $0x298] sm:$0xff]  ;;  %v5416_v0 = vpack.c.bf16 %v3638_v1, %v3637_v34 }
 0x28e   :  { %3976 = vmatprep.mubr.f32.mxu1 %v3448_v25  ;;  %v8755_v9 = vpop.permute.xlu1 %5703  ;;  %v3456_v37 = vsel %vm1391_vm4, %v10083_v11, %v5710_v18  ;;  %5383 = vmatpush3.bf16.msra.mxu1 %v5382_v38  ;;  %v5400_v18 = vpack.c.bf16 %v3630_v46, %v3629_v62  ;;  %v3614_v25 = vld [vmem:[%s9787_s3 + $0x218] sm:$0xff]  ;;  %v3616_v11 = vld [vmem:[%s9787_s3 + $0x228] sm:$0xff] }
 0x28f   :  { %v5705_v10 = vunpack.i.l.bf16 %v8755_v9  ;;  %v8767_v55 = vpop.permute.xlu0 %5713  ;;  %5385 = vmatprep.subr.bf16.mxu1 %v5384_v52  ;;  %v3441_v52 = vsel %vm3426_vm10, %v3440_v29, %v5701_v41  ;;  %v5402_v23 = vpack.c.bf16 %v3614_v25, %v3613_v28  ;;  %v3623_v29 = vld [vmem:[%s9787_s3 + $0x260] sm:$0xff]  ;;  %v3642_v25 = vld [vmem:[%s9787_s3 + $0x2f8] sm:$0xff] }
 0x290   :  { %v5715_v14 = vunpack.i.l.bf16 %v8767_v55 }
 0x291   :  { %v3457_v13 = vsel %vm3416_vm5, %v3456_v37, %v5705_v10  ;;  %v3633_v37 = vld [vmem:[%s9787_s3 + $0x2b0] sm:$0xff]  ;;  %v3634_v10 = vld [vmem:[%s9787_s3 + $0x2b8] sm:$0xff] }
 0x292   :  { %v8779_v51 = vpop.permute.xlu1 %5718  ;;  %v3458_v39 = vsel %vm3418_vm6, %v3457_v13, %v5715_v14  ;;  %5387 = vmatpush3.bf16.msra.mxu1 %v5386_v7  ;;  %v5406_v7 = vpack.c.bf16 %v3616_v11, %v3615_v44  ;;  %v5408_v26 = vpack.c.bf16 %v3634_v10, %v3633_v37  ;;  %v3617_v13 = vld [vmem:[%s9787_s3 + $0x230] sm:$0xff]  ;;  %v3618_v14 = vld [vmem:[%s9787_s3 + $0x238] sm:$0xff]  ;;  %v3659_v10 = vld [vmem:[%s9787_s3 + $0x380] sm:$0xff] }
 0x293   :  { %v5720_v50 = vunpack.i.l.bf16 %v8779_v51  ;;  %5389 = vmatprep.subr.bf16.mxu1 %v5388_v57  ;;  %v5410_v59 = vpack.c.bf16 %v3618_v14, %v3617_v13  ;;  %v3625_v11 = vld [vmem:[%s9787_s3 + $0x270] sm:$0xff]  ;;  %v3626_v37 = vld [vmem:[%s9787_s3 + $0x278] sm:$0xff] }
 0x294   :  { %v8790_v43 = vpop.permute.xlu0 %5728 }
 0x295   :  { %v5730_v42 = vunpack.i.l.bf16 %v8790_v43  ;;  %v3459_v20 = vsel %vm3420_vm7, %v3458_v39, %v5720_v50  ;;  %v5412_v50 = vpack.c.bf16 %v3636_v27, %v3635_v54  ;;  %v5731_v19 = vunpack.i.h.bf16 %v8790_v43 }
 0x296   :  { %v8801_v61 = vpop.permute.xlu1 %5723  ;;  %5391 = vmatpush3.bf16.msra.mxu1 %v5390_v60  ;;  %v3620_v60 = vld [vmem:[%s9787_s3 + $0x248] sm:$0xff]  ;;  %v5426_v27 = vpack.c.bf16 %v3626_v37, %v3625_v11 }
 0x297   :  { %v5725_v6 = vunpack.i.l.bf16 %v8801_v61  ;;  %5393 = vmatprep.subr.bf16.mxu1 %v5392_v35  ;;  %v3460_v36 = vsel %vm3422_vm8, %v3459_v20, %v5730_v42  ;;  %v5706_v42 = vunpack.i.h.bf16 %v8755_v9  ;;  %v10084_v35 = vld [vmem:[#allocation28_spill] sm:$0xff]  ;;  %v5414_v17 = vpack.c.bf16 %v3620_v60, %v3619_v5  ;;  %v3661_v5 = vld [vmem:[%s9787_s3 + $0x390] sm:$0xff] }
 0x298   :  { %v8812_v22 = vpop.permute.xlu0 %5733  ;;  %v3449_v4 = vsel %vm1391_vm4, %v10084_v35, %v5711_v40  ;;  %v3622_v9 = vld [vmem:[%s9787_s3 + $0x258] sm:$0xff] }
 0x299   :  { %v5735_v12 = vunpack.i.l.bf16 %v8812_v22  ;;  %v3461_v38 = vsel %vm3424_vm9, %v3460_v36, %v5725_v6  ;;  %v3621_v6 = vld [vmem:[%s9787_s3 + $0x250] sm:$0xff]  ;;  %v3450_v45 = vsel %vm3416_vm5, %v3449_v4, %v5706_v42  ;;  %v3662_v60 = vld [vmem:[%s9787_s3 + $0x398] sm:$0xff] }
 0x29a   :  { %5395 = vmatpush3.bf16.msra.mxu1 %v5394_v15  ;;  %v8863_v57 = vpop.permute.xlu1 %5743  ;;  %v5716_v15 = vunpack.i.h.bf16 %v8767_v55  ;;  %v5418_v46 = vpack.c.bf16 %v3622_v9, %v3621_v6  ;;  %v5721_v55 = vunpack.i.h.bf16 %v8779_v51  ;;  %v3641_v51 = vld [vmem:[%s9787_s3 + $0x2f0] sm:$0xff]  ;;  %v5432_v4 = vpack.c.bf16 %v3662_v60, %v3661_v5 }
 0x29b   :  { %5397 = vmatprep.subr.bf16.mxu1 %v5396_v24  ;;  %v3462_v31 = vsel %vm3426_vm10, %v3461_v38, %v5735_v12  ;;  %v5745_v53 = vunpack.i.l.bf16 %v8863_v57  ;;  %v3639_v24 = vld [vmem:[%s9787_s3 + $0x2e0] sm:$0xff]  ;;  %v5424_v44 = vpack.c.bf16 %v3642_v25, %v3641_v51 }
 0x29c   :  { %v8873_v39 = vpop.permute.xlu0 %5738  ;;  %v5420_v12 = vpack.c.bf16 %v3640_v32, %v3639_v24  ;;  %v3451_v38 = vsel %vm3418_vm6, %v3450_v45, %v5716_v15  ;;  %v3647_v15 = vld [vmem:[%s9787_s3 + $0x320] sm:$0xff]  ;;  %v3648_v24 = vld [vmem:[%s9787_s3 + $0x328] sm:$0xff]  ;;  %v3665_v32 = vld [vmem:[%s9787_s3 + $0x3b0] sm:$0xff] }
 0x29d   :  { %3977 = vmatmul.mubr.f32.vlgmr.msra.gmra.mrb[2].mxu1 %v3441_v52  ;;  %v5740_v48 = vunpack.i.l.bf16 %v8873_v39  ;;  %v3470_v49 = vsel %vm1391_vm4, %v10085_v56, %v5745_v53  ;;  %v3644_v53 = vld [vmem:[%s9787_s3 + $0x308] sm:$0xff]  ;;  %v3663_v56 = vld [vmem:[%s9787_s3 + $0x3a0] sm:$0xff]  ;;  %v3666_v45 = vld [vmem:[%s9787_s3 + $0x3b8] sm:$0xff] }
 0x29e   :  { %5399 = vmatpush3.bf16.msra.mxu1 %v5398_v3  ;;  %4046 = vmatprep.mubr.f32.mxu1 %v3462_v31  ;;  %v8891_v20 = vpop.permute.xlu1 %5748  ;;  %v3624_v3 = vld [vmem:[%s9787_s3 + $0x268] sm:$0xff]  ;;  %v3452_v31 = vsel %vm3420_vm7, %v3451_v38, %v5721_v55  ;;  %v3650_v55 = vld [vmem:[%s9787_s3 + $0x338] sm:$0xff]  ;;  %v5746_v38 = vunpack.i.h.bf16 %v8863_v57  ;;  %v3669_v57 = vld [vmem:[%s9787_s3 + $0x3d0] sm:$0xff] }
 0x29f   :  { %5401 = vmatprep.subr.bf16.mxu1 %v5400_v18  ;;  %v5750_v36 = vunpack.i.l.bf16 %v8891_v20  ;;  %v3471_v62 = vsel %vm3416_vm5, %v3470_v49, %v5740_v48  ;;  %v5422_v30 = vpack.c.bf16 %v3624_v3, %v3623_v29  ;;  %v3453_v13 = vsel %vm3422_vm8, %v3452_v31, %v5731_v19  ;;  %v3646_v48 = vld [vmem:[%s9787_s3 + $0x318] sm:$0xff]  ;;  %v3664_v49 = vld [vmem:[%s9787_s3 + $0x3a8] sm:$0xff]  ;;  %v3667_v29 = vld [vmem:[%s9787_s3 + $0x3c0] sm:$0xff] }
 0x2a0   :  { %v5436_v9 = vpack.c.bf16 %v3664_v49, %v3663_v56  ;;  %v3668_v3 = vld [vmem:[%s9787_s3 + $0x3c8] sm:$0xff]  ;;  %v3651_v19 = vld [vmem:[%s9787_s3 + $0x340] sm:$0xff]  ;;  %v3670_v31 = vld [vmem:[%s9787_s3 + $0x3d8] sm:$0xff] }
 0x2a1   :  { %v8910_v41 = vpop.permute.xlu0 %5753  ;;  %v3472_v52 = vsel %vm3418_vm6, %v3471_v62, %v5750_v36  ;;  %v5438_v36 = vpack.c.bf16 %v3648_v24, %v3647_v15  ;;  %v5440_v62 = vpack.c.bf16 %v3666_v45, %v3665_v32  ;;  %v3657_v24 = vld [vmem:[%s9787_s3 + $0x370] sm:$0xff]  ;;  %v3658_v32 = vld [vmem:[%s9787_s3 + $0x378] sm:$0xff]  ;;  %v3691_v45 = vld [vmem:[%s9787_s3 + $0x480] sm:$0xff] }
 0x2a2   :  { %5403 = vmatpush3.bf16.msra.mxu1 %v5402_v23  ;;  %v5755_v18 = vunpack.i.l.bf16 %v8910_v41  ;;  %v8922_v28 = vpop.permute.xlu1 %5763 }
 0x2a3   :  { %5405 = vmatprep.subr.bf16.mxu1 %v5404_v33  ;;  %v5765_v23 = vunpack.i.l.bf16 %v8922_v28  ;;  %v5766_v56 = vunpack.i.h.bf16 %v8922_v28 }
 0x2a4   :  { %v3473_v43 = vsel %vm3420_vm7, %v3472_v52, %v5755_v18  ;;  %v5444_v52 = vpack.c.bf16 %v3668_v3, %v3667_v29  ;;  %v5458_v3 = vpack.c.bf16 %v3658_v32, %v3657_v24 }
 0x2a5   :  { %v8934_v33 = vpop.permute.xlu0 %5758 }
 0x2a6   :  { %5407 = vmatpush3.bf16.msra.mxu1 %v5406_v7  ;;  %v3660_v7 = vld [vmem:[%s9787_s3 + $0x388] sm:$0xff]  ;;  %v5760_v14 = vunpack.i.l.bf16 %v8934_v33 }
 0x2a7   :  { %5409 = vmatprep.subr.bf16.mxu1 %v5408_v26  ;;  %v5726_v26 = vunpack.i.h.bf16 %v8801_v61  ;;  %v8952_v54 = vpop.permute.xlu1 %5768  ;;  %v5428_v40 = vpack.c.bf16 %v3660_v7, %v3659_v10  ;;  %v3474_v61 = vsel %vm3422_vm8, %v3473_v43, %v5765_v23  ;;  %v5741_v23 = vunpack.i.h.bf16 %v8873_v39  ;;  %v10087_v7 = vld [vmem:[#allocation5_spill] sm:$0xff]  ;;  %v3654_v39 = vld [vmem:[%s9787_s3 + $0x358] sm:$0xff] }
 0x2a8   :  { %v5770_v34 = vunpack.i.l.bf16 %v8952_v54  ;;  %v3475_v35 = vsel %vm3424_vm9, %v3474_v61, %v5760_v14  ;;  %v3653_v14 = vld [vmem:[%s9787_s3 + $0x350] sm:$0xff] }
 0x2a9   :  { %v3454_v1 = vsel %vm3424_vm9, %v3453_v13, %v5726_v26  ;;  %v5448_v13 = vpack.c.bf16 %v3670_v31, %v3669_v57  ;;  %v5450_v60 = vpack.c.bf16 %v3654_v39, %v3653_v14 }
 0x2aa   :  { %5411 = vmatpush3.bf16.msra.mxu1 %v5410_v59  ;;  %v3643_v59 = vld [vmem:[%s9787_s3 + $0x300] sm:$0xff] }
 0x2ab   :  { %5413 = vmatprep.subr.bf16.mxu1 %v5412_v50  ;;  %v5736_v50 = vunpack.i.h.bf16 %v8812_v22  ;;  %v5430_v42 = vpack.c.bf16 %v3644_v53, %v3643_v59  ;;  %v3645_v22 = vld [vmem:[%s9787_s3 + $0x310] sm:$0xff]  ;;  %v9013_v25 = vpop.permute.xlu1 %5773  ;;  %v3672_v59 = vld [vmem:[%s9787_s3 + $0x3e8] sm:$0xff] }
 0x2ac   :  { %v5434_v6 = vpack.c.bf16 %v3646_v48, %v3645_v22  ;;  %v5775_v37 = vunpack.i.l.bf16 %v9013_v25  ;;  %v3674_v48 = vld [vmem:[%s9787_s3 + $0x3f8] sm:$0xff] }
 0x2ae   :  { %5415 = vmatpush3.bf16.msra.mxu1 %v5414_v17  ;;  %v3455_v17 = vsel %vm3426_vm10, %v3454_v1, %v5736_v50  ;;  %v3655_v1 = vld [vmem:[%s9787_s3 + $0x360] sm:$0xff] }
 0x2af   :  { %5417 = vmatprep.subr.bf16.mxu1 %v5416_v0  ;;  %v3476_v0 = vsel %vm3426_vm10, %v3475_v35, %v5770_v34 }
 0x2b0   :  { %v9050_v50 = vpop.permute.xlu1 %5788 }
 0x2b2   :  { %5419 = vmatpush3.bf16.msra.mxu1 %v5418_v46  ;;  %v3649_v46 = vld [vmem:[%s9787_s3 + $0x330] sm:$0xff] }
 0x2b3   :  { %5421 = vmatprep.subr.bf16.mxu1 %v5420_v12  ;;  %v9003_v12 = vpop.permute.xlu0 %5778  ;;  %v5442_v18 = vpack.c.bf16 %v3650_v55, %v3649_v46 }
 0x2b4   :  { %v5780_v51 = vunpack.i.l.bf16 %v9003_v12 }
 0x2b6   :  { %5423 = vmatpush3.bf16.msra.mxu1 %v5422_v30  ;;  %v3652_v30 = vld [vmem:[%s9787_s3 + $0x348] sm:$0xff]  ;;  %v3484_v26 = vsel %vm1391_vm4, %v10087_v7, %v5780_v51  ;;  %v3695_v7 = vld [vmem:[%s9787_s3 + $0x4a0] sm:$0xff] }
 0x2b7   :  { %5425 = vmatprep.subr.bf16.mxu1 %v5424_v44  ;;  %v10086_v44 = vld [vmem:[#allocation24_spill] sm:$0xff]  ;;  %v9031_v43 = vpop.permute.xlu0 %5783  ;;  %v5446_v10 = vpack.c.bf16 %v3652_v30, %v3651_v19  ;;  %v3485_v5 = vsel %vm3416_vm5, %v3484_v26, %v5775_v37  ;;  %v3676_v51 = vld [vmem:[%s9787_s3 + $0x408] sm:$0xff]  ;;  %v3693_v19 = vld [vmem:[%s9787_s3 + $0x490] sm:$0xff] }
 0x2b8   :  { %v3463_v11 = vsel %vm1391_vm4, %v10086_v44, %v5746_v38  ;;  %v5785_v61 = vunpack.i.l.bf16 %v9031_v43  ;;  %v3694_v30 = vld [vmem:[%s9787_s3 + $0x498] sm:$0xff]  ;;  %v3696_v26 = vld [vmem:[%s9787_s3 + $0x4a8] sm:$0xff] }
 0x2b9   :  { %v3464_v53 = vsel %vm3416_vm5, %v3463_v11, %v5741_v23  ;;  %v5464_v11 = vpack.c.bf16 %v3694_v30, %v3693_v19  ;;  %v3678_v37 = vld [vmem:[%s9787_s3 + $0x418] sm:$0xff]  ;;  %v5468_v39 = vpack.c.bf16 %v3696_v26, %v3695_v7  ;;  %v3687_v30 = vld [vmem:[%s9787_s3 + $0x460] sm:$0xff] }
 0x2ba   :  { %5427 = vmatpush3.bf16.msra.mxu1 %v5426_v27  ;;  %v5751_v27 = vunpack.i.h.bf16 %v8891_v20  ;;  %v5756_v20 = vunpack.i.h.bf16 %v8910_v41  ;;  %v3673_v41 = vld [vmem:[%s9787_s3 + $0x3f0] sm:$0xff] }
 0x2bb   :  { %5429 = vmatprep.subr.bf16.mxu1 %v5428_v40  ;;  %v3671_v40 = vld [vmem:[%s9787_s3 + $0x3e0] sm:$0xff]  ;;  %v9062_v22 = vpop.permute.xlu0 %5798  ;;  %v5456_v15 = vpack.c.bf16 %v3674_v48, %v3673_v41 }
 0x2bc   :  { %v5452_v34 = vpack.c.bf16 %v3672_v59, %v3671_v40  ;;  %v3465_v35 = vsel %vm3418_vm6, %v3464_v53, %v5751_v27  ;;  %v3679_v27 = vld [vmem:[%s9787_s3 + $0x420] sm:$0xff]  ;;  %v3680_v40 = vld [vmem:[%s9787_s3 + $0x428] sm:$0xff]  ;;  %v3697_v59 = vld [vmem:[%s9787_s3 + $0x4b0] sm:$0xff] }
 0x2bd   :  { %4047 = vmatmul.mubr.f32.vlgmr.msra.gmra.mrb[4].mxu1 %v3455_v17  ;;  %v3486_v17 = vsel %vm3418_vm6, %v3485_v5, %v5785_v61  ;;  %v3698_v53 = vld [vmem:[%s9787_s3 + $0x4b8] sm:$0xff]  ;;  %v5470_v61 = vpack.c.bf16 %v3680_v40, %v3679_v27  ;;  %v3723_v40 = vld [vmem:[%s9787_s3 + $0x580] sm:$0xff] }
 0x2be   :  { %5431 = vmatpush3.bf16.msra.mxu1 %v5430_v42  ;;  %4116 = vmatprep.mubr.f32.mxu1 %v3476_v0  ;;  %v3656_v42 = vld [vmem:[%s9787_s3 + $0x368] sm:$0xff]  ;;  %v3466_v0 = vsel %vm3420_vm7, %v3465_v35, %v5756_v20  ;;  %v5472_v5 = vpack.c.bf16 %v3698_v53, %v3697_v59  ;;  %v3682_v20 = vld [vmem:[%s9787_s3 + $0x438] sm:$0xff]  ;;  %v5781_v35 = vunpack.i.h.bf16 %v9003_v12  ;;  %v3701_v12 = vld [vmem:[%s9787_s3 + $0x4d0] sm:$0xff] }
 0x2bf   :  { %5433 = vmatprep.subr.bf16.mxu1 %v5432_v4  ;;  %v5790_v4 = vunpack.i.l.bf16 %v9050_v50  ;;  %v5454_v49 = vpack.c.bf16 %v3656_v42, %v3655_v1  ;;  %v3467_v46 = vsel %vm3422_vm8, %v3466_v0, %v5766_v56  ;;  %v9092_v29 = vpop.permute.xlu0 %5803  ;;  %v3699_v1 = vld [vmem:[%s9787_s3 + $0x4c0] sm:$0xff]  ;;  %v3700_v42 = vld [vmem:[%s9787_s3 + $0x4c8] sm:$0xff]  ;;  %v3702_v0 = vld [vmem:[%s9787_s3 + $0x4d8] sm:$0xff] }
 0x2c0   :  { %v5805_v57 = vunpack.i.l.bf16 %v9092_v29  ;;  %v3683_v56 = vld [vmem:[%s9787_s3 + $0x440] sm:$0xff]  ;;  %v3690_v27 = vld [vmem:[%s9787_s3 + $0x478] sm:$0xff]  ;;  %v3724_v59 = vld [vmem:[%s9787_s3 + $0x588] sm:$0xff] }
 0x2c1   :  { %v3487_v28 = vsel %vm3420_vm7, %v3486_v17, %v5790_v4  ;;  %v5476_v17 = vpack.c.bf16 %v3700_v42, %v3699_v1  ;;  %v5492_v1 = vpack.c.bf16 %v3724_v59, %v3723_v40  ;;  %v3707_v42 = vld [vmem:[%s9787_s3 + $0x500] sm:$0xff] }
 0x2c2   :  { %5435 = vmatpush3.bf16.msra.mxu1 %v5434_v6  ;;  %v5800_v6 = vunpack.i.l.bf16 %v9062_v22 }
 0x2c3   :  { %5437 = vmatprep.subr.bf16.mxu1 %v5436_v9  ;;  %v9074_v9 = vpop.permute.xlu1 %5793  ;;  %v9153_v48 = vpop.permute.xlu0 %5808 }
 0x2c4   :  { %v5795_v55 = vunpack.i.l.bf16 %v9074_v9  ;;  %v5810_v32 = vunpack.i.l.bf16 %v9153_v48  ;;  %v5796_v53 = vunpack.i.h.bf16 %v9074_v9 }
 0x2c6   :  { %5439 = vmatpush3.bf16.msra.mxu1 %v5438_v36  ;;  %v3692_v36 = vld [vmem:[%s9787_s3 + $0x488] sm:$0xff] }
 0x2c7   :  { %5441 = vmatprep.subr.bf16.mxu1 %v5440_v62  ;;  %v5761_v62 = vunpack.i.h.bf16 %v8934_v33  ;;  %v5460_v38 = vpack.c.bf16 %v3692_v36, %v3691_v45  ;;  %v3488_v33 = vsel %vm3422_vm8, %v3487_v28, %v5800_v6  ;;  %v5776_v6 = vunpack.i.h.bf16 %v9013_v25  ;;  %v3686_v25 = vld [vmem:[%s9787_s3 + $0x458] sm:$0xff] }
 0x2c8   :  { %v3489_v44 = vsel %vm3424_vm9, %v3488_v33, %v5795_v55  ;;  %v5786_v55 = vunpack.i.h.bf16 %v9031_v43  ;;  %v5791_v43 = vunpack.i.h.bf16 %v9050_v50  ;;  %v3705_v50 = vld [vmem:[%s9787_s3 + $0x4f0] sm:$0xff] }
 0x2c9   :  { %v3468_v31 = vsel %vm3424_vm9, %v3467_v46, %v5761_v62  ;;  %v5480_v62 = vpack.c.bf16 %v3702_v0, %v3701_v12  ;;  %v3685_v46 = vld [vmem:[%s9787_s3 + $0x450] sm:$0xff] }
 0x2ca   :  { %5443 = vmatpush3.bf16.msra.mxu1 %v5442_v18  ;;  %v3675_v18 = vld [vmem:[%s9787_s3 + $0x400] sm:$0xff] }
 0x2cb   :  { %5445 = vmatprep.subr.bf16.mxu1 %v5444_v52  ;;  %v5771_v52 = vunpack.i.h.bf16 %v8952_v54  ;;  %v5462_v23 = vpack.c.bf16 %v3676_v51, %v3675_v18  ;;  %v3677_v54 = vld [vmem:[%s9787_s3 + $0x410] sm:$0xff]  ;;  %v9190_v51 = vpop.permute.xlu0 %5823 }
 0x2cc   :  { %v5466_v14 = vpack.c.bf16 %v3678_v37, %v3677_v54  ;;  %v5801_v37 = vunpack.i.h.bf16 %v9062_v22 }
 0x2ce   :  { %5447 = vmatpush3.bf16.msra.mxu1 %v5446_v10  ;;  %v3469_v10 = vsel %vm3426_vm10, %v3468_v31, %v5771_v52  ;;  %v5482_v52 = vpack.c.bf16 %v3686_v25, %v3685_v46  ;;  %v3711_v25 = vld [vmem:[%s9787_s3 + $0x520] sm:$0xff] }
 0x2cf   :  { %5449 = vmatprep.subr.bf16.mxu1 %v5448_v13  ;;  %v3490_v13 = vsel %vm3426_vm10, %v3489_v44, %v5805_v57  ;;  %v3688_v57 = vld [vmem:[%s9787_s3 + $0x468] sm:$0xff] }
 0x2d2   :  { %5451 = vmatpush3.bf16.msra.mxu1 %v5450_v60  ;;  %v3681_v60 = vld [vmem:[%s9787_s3 + $0x430] sm:$0xff] }
 0x2d3   :  { %5453 = vmatprep.subr.bf16.mxu1 %v5452_v34  ;;  %v9143_v34 = vpop.permute.xlu1 %5813  ;;  %v5474_v4 = vpack.c.bf16 %v3682_v20, %v3681_v60 }
 0x2d4   :  { %v5815_v41 = vunpack.i.l.bf16 %v9143_v34 }
 0x2d6   :  { %5455 = vmatpush3.bf16.msra.mxu1 %v5454_v49  ;;  %v3684_v49 = vld [vmem:[%s9787_s3 + $0x448] sm:$0xff]  ;;  %v3498_v36 = vsel %vm1391_vm4, %v8280_v2, %v5815_v41  ;;  %v3725_v41 = vld [vmem:[%s9787_s3 + $0x590] sm:$0xff] }
 0x2d7   :  { %5457 = vmatprep.subr.bf16.mxu1 %v5456_v15  ;;  %v10088_v15 = vld [vmem:[#allocation26_spill] sm:$0xff]  ;;  %v9171_v28 = vpop.permute.xlu1 %5818  ;;  %v5478_v45 = vpack.c.bf16 %v3684_v49, %v3683_v56  ;;  %v3499_v33 = vsel %vm3416_vm5, %v3498_v36, %v5810_v32  ;;  %v3727_v32 = vld [vmem:[%s9787_s3 + $0x5a0] sm:$0xff] }
 0x2d8   :  { %v3477_v24 = vsel %vm1391_vm4, %v10088_v15, %v5781_v35  ;;  %v3704_v2 = vld [vmem:[%s9787_s3 + $0x4e8] sm:$0xff]  ;;  %v5820_v18 = vunpack.i.l.bf16 %v9171_v28  ;;  %v3710_v15 = vld [vmem:[%s9787_s3 + $0x518] sm:$0xff] }
 0x2d9   :  { %v3708_v35 = vld [vmem:[%s9787_s3 + $0x508] sm:$0xff] }
 0x2da   :  { %5459 = vmatpush3.bf16.msra.mxu1 %v5458_v3  ;;  %v3703_v3 = vld [vmem:[%s9787_s3 + $0x4e0] sm:$0xff]  ;;  %v3500_v54 = vsel %vm3418_vm6, %v3499_v33, %v5820_v18  ;;  %v5494_v12 = vpack.c.bf16 %v3708_v35, %v3707_v42  ;;  %v3713_v33 = vld [vmem:[%s9787_s3 + $0x530] sm:$0xff] }
 0x2db   :  { %5461 = vmatprep.subr.bf16.mxu1 %v5460_v38  ;;  %v3478_v38 = vsel %vm3416_vm5, %v3477_v24, %v5776_v6  ;;  %v5484_v19 = vpack.c.bf16 %v3704_v2, %v3703_v3  ;;  %v9202_v44 = vpop.permute.xlu1 %5833  ;;  %v3729_v3 = vld [vmem:[%s9787_s3 + $0x5b0] sm:$0xff]  ;;  %v3730_v2 = vld [vmem:[%s9787_s3 + $0x5b8] sm:$0xff] }
 0x2dc   :  { %v3479_v31 = vsel %vm3418_vm6, %v3478_v38, %v5786_v55  ;;  %v5835_v26 = vunpack.i.l.bf16 %v9202_v44  ;;  %v3712_v55 = vld [vmem:[%s9787_s3 + $0x528] sm:$0xff]  ;;  %v5504_v18 = vpack.c.bf16 %v3730_v2, %v3729_v3 }
 0x2dd   :  { %4117 = vmatmul.mubr.f32.vlgmr.msra.gmra.mrb[6].mxu1 %v3469_v10  ;;  %v5486_v10 = vpack.c.bf16 %v3688_v57, %v3687_v30  ;;  %v3480_v7 = vsel %vm3420_vm7, %v3479_v31, %v5791_v43  ;;  %v5502_v38 = vpack.c.bf16 %v3712_v55, %v3711_v25  ;;  %v3732_v30 = vld [vmem:[%s9787_s3 + $0x5c8] sm:$0xff]  ;;  %v5816_v57 = vunpack.i.h.bf16 %v9143_v34  ;;  %v3733_v34 = vld [vmem:[%s9787_s3 + $0x5d0] sm:$0xff]  ;;  %v3755_v25 = vld [vmem:[%s9787_s3 + $0x680] sm:$0xff] }
 0x2de   :  { %5463 = vmatpush3.bf16.msra.mxu1 %v5462_v23  ;;  %4186 = vmatprep.mubr.f32.mxu1 %v3490_v13  ;;  %v5825_v23 = vunpack.i.l.bf16 %v9190_v51  ;;  %v9214_v13 = vpop.permute.xlu0 %5828  ;;  %v3756_v55 = vld [vmem:[%s9787_s3 + $0x688] sm:$0xff] }
 0x2df   :  { %5465 = vmatprep.subr.bf16.mxu1 %v5464_v11  ;;  %v3706_v11 = vld [vmem:[%s9787_s3 + $0x4f8] sm:$0xff]  ;;  %v9232_v60 = vpop.permute.xlu1 %5838  ;;  %v5831_v3 = vunpack.i.h.bf16 %v9214_v13 }
 0x2e0   :  { %v3501_v22 = vsel %vm3420_vm7, %v3500_v54, %v5825_v23  ;;  %v5840_v56 = vunpack.i.l.bf16 %v9232_v60  ;;  %v3715_v54 = vld [vmem:[%s9787_s3 + $0x540] sm:$0xff] }
 0x2e1   :  { %v3502_v9 = vsel %vm3422_vm8, %v3501_v22, %v5835_v26  ;;  %v10089_v26 = vld [vmem:[#allocation31_spill] sm:$0xff] }
 0x2e2   :  { %5467 = vmatpush3.bf16.msra.mxu1 %v5466_v14  ;;  %v5488_v14 = vpack.c.bf16 %v3706_v11, %v3705_v50  ;;  %v9283_v43 = vpop.permute.xlu0 %5848 }
 0x2e3   :  { %5469 = vmatprep.subr.bf16.mxu1 %v5468_v39  ;;  %v3689_v39 = vld [vmem:[%s9787_s3 + $0x470] sm:$0xff]  ;;  %v5850_v23 = vunpack.i.l.bf16 %v9283_v43  ;;  %v9293_v50 = vpop.permute.xlu1 %5843 }
 0x2e4   :  { %v5490_v20 = vpack.c.bf16 %v3690_v27, %v3689_v39  ;;  %v5845_v39 = vunpack.i.l.bf16 %v9293_v50 }
 0x2e5   :  { %v3512_v40 = vsel %vm1391_vm4, %v8483_v63, %v5850_v23  ;;  %v3736_v63 = vld [vmem:[%s9787_s3 + $0x5e8] sm:$0xff]  ;;  %v3758_v23 = vld [vmem:[%s9787_s3 + $0x698] sm:$0xff] }
 0x2e6   :  { %5471 = vmatpush3.bf16.msra.mxu1 %v5470_v61  ;;  %v3481_v61 = vsel %vm3422_vm8, %v3480_v7, %v5801_v37  ;;  %v3716_v37 = vld [vmem:[%s9787_s3 + $0x548] sm:$0xff]  ;;  %v5811_v7 = vunpack.i.h.bf16 %v9153_v48  ;;  %v9311_v27 = vpop.permute.xlu0 %5853  ;;  %v3718_v48 = vld [vmem:[%s9787_s3 + $0x558] sm:$0xff]  ;;  %v3513_v35 = vsel %vm3416_vm5, %v3512_v40, %v5845_v39 }
 0x2e7   :  { %5473 = vmatprep.subr.bf16.mxu1 %v5472_v5  ;;  %v5830_v5 = vunpack.i.l.bf16 %v9214_v13  ;;  %v3482_v49 = vsel %vm3424_vm9, %v3481_v61, %v5796_v53  ;;  %v5510_v22 = vpack.c.bf16 %v3716_v37, %v3715_v54  ;;  %v3717_v53 = vld [vmem:[%s9787_s3 + $0x550] sm:$0xff]  ;;  %v5821_v61 = vunpack.i.h.bf16 %v9171_v28  ;;  %v9330_v42 = vpop.permute.xlu1 %5858  ;;  %v3760_v39 = vld [vmem:[%s9787_s3 + $0x6a8] sm:$0xff] }
 0x2e8   :  { %v5826_v28 = vunpack.i.h.bf16 %v9190_v51  ;;  %v3737_v51 = vld [vmem:[%s9787_s3 + $0x5f0] sm:$0xff] }
 0x2e9   :  { %v3503_v0 = vsel %vm3424_vm9, %v3502_v9, %v5830_v5  ;;  %v3735_v5 = vld [vmem:[%s9787_s3 + $0x5e0] sm:$0xff]  ;;  %v5514_v9 = vpack.c.bf16 %v3718_v48, %v3717_v53  ;;  %v3744_v48 = vld [vmem:[%s9787_s3 + $0x628] sm:$0xff] }
 0x2ea   :  { %5475 = vmatpush3.bf16.msra.mxu1 %v5474_v4  ;;  %v5806_v4 = vunpack.i.h.bf16 %v9092_v29  ;;  %v3709_v29 = vld [vmem:[%s9787_s3 + $0x510] sm:$0xff]  ;;  %v3504_v36 = vsel %vm3426_vm10, %v3503_v0, %v5840_v56  ;;  %v3738_v0 = vld [vmem:[%s9787_s3 + $0x5f8] sm:$0xff]  ;;  %v3743_v53 = vld [vmem:[%s9787_s3 + $0x620] sm:$0xff] }
 0x2eb   :  { %5477 = vmatprep.subr.bf16.mxu1 %v5476_v17  ;;  %v3726_v17 = vld [vmem:[%s9787_s3 + $0x598] sm:$0xff] }
 0x2ec   :  { %v5496_v6 = vpack.c.bf16 %v3726_v17, %v3725_v41  ;;  %v3483_v24 = vsel %vm3426_vm10, %v3482_v49, %v5806_v4  ;;  %v5516_v4 = vpack.c.bf16 %v3736_v63, %v3735_v5  ;;  %v3719_v41 = vld [vmem:[%s9787_s3 + $0x560] sm:$0xff]  ;;  %v3720_v17 = vld [vmem:[%s9787_s3 + $0x568] sm:$0xff]  ;;  %v5860_v49 = vunpack.i.l.bf16 %v9330_v42  ;;  %v3762_v5 = vld [vmem:[%s9787_s3 + $0x6b8] sm:$0xff] }
 0x2ed   :  { %v5534_v63 = vpack.c.bf16 %v3744_v48, %v3743_v53 }
 0x2ee   :  { %5479 = vmatpush3.bf16.msra.mxu1 %v5478_v45  ;;  %v3728_v45 = vld [vmem:[%s9787_s3 + $0x5a8] sm:$0xff] }
 0x2ef   :  { %5481 = vmatprep.subr.bf16.mxu1 %v5480_v62  ;;  %v5498_v62 = vpack.c.bf16 %v3710_v15, %v3709_v29  ;;  %v5500_v46 = vpack.c.bf16 %v3728_v45, %v3727_v32  ;;  %v5836_v29 = vunpack.i.h.bf16 %v9202_v44  ;;  %v5518_v15 = vpack.c.bf16 %v3720_v17, %v3719_v41  ;;  %v9354_v45 = vpop.permute.xlu1 %5863 }
 0x2f0   :  { %v5851_v41 = vunpack.i.h.bf16 %v9283_v43  ;;  %v3765_v43 = vld [vmem:[%s9787_s3 + $0x6d0] sm:$0xff] }
 0x2f2   :  { %5483 = vmatpush3.bf16.msra.mxu1 %v5482_v52  ;;  %v3714_v52 = vld [vmem:[%s9787_s3 + $0x538] sm:$0xff] }
 0x2f3   :  { %5485 = vmatprep.subr.bf16.mxu1 %v5484_v19  ;;  %v3731_v19 = vld [vmem:[%s9787_s3 + $0x5c0] sm:$0xff]  ;;  %v5506_v31 = vpack.c.bf16 %v3714_v52, %v3713_v33  ;;  %v5524_v52 = vpack.c.bf16 %v3756_v55, %v3755_v25  ;;  %v3749_v25 = vld [vmem:[%s9787_s3 + $0x650] sm:$0xff] }
 0x2f4   :  { %v5508_v11 = vpack.c.bf16 %v3732_v30, %v3731_v19  ;;  %v3739_v19 = vld [vmem:[%s9787_s3 + $0x600] sm:$0xff]  ;;  %v3740_v30 = vld [vmem:[%s9787_s3 + $0x608] sm:$0xff] }
 0x2f5   :  { %v5526_v37 = vpack.c.bf16 %v3740_v30, %v3739_v19  ;;  %v3767_v55 = vld [vmem:[%s9787_s3 + $0x6e0] sm:$0xff] }
 0x2f6   :  { %5487 = vmatpush3.bf16.msra.mxu1 %v5486_v10  ;;  %v3734_v10 = vld [vmem:[%s9787_s3 + $0x5d8] sm:$0xff]  ;;  %v3751_v30 = vld [vmem:[%s9787_s3 + $0x660] sm:$0xff] }
 0x2f7   :  { %5489 = vmatprep.subr.bf16.mxu1 %v5488_v14  ;;  %v3491_v14 = vsel %vm1391_vm4, %v10089_v26, %v5816_v57  ;;  %v5512_v59 = vpack.c.bf16 %v3734_v10, %v3733_v34  ;;  %v5841_v57 = vunpack.i.h.bf16 %v9232_v60  ;;  %v3741_v60 = vld [vmem:[%s9787_s3 + $0x610] sm:$0xff] }
 0x2fa   :  { %5491 = vmatpush3.bf16.msra.mxu1 %v5490_v20  ;;  %v3492_v20 = vsel %vm3416_vm5, %v3491_v14, %v5811_v7  ;;  %v3742_v7 = vld [vmem:[%s9787_s3 + $0x618] sm:$0xff]  ;;  %v3759_v14 = vld [vmem:[%s9787_s3 + $0x6a0] sm:$0xff] }
 0x2fb   :  { %5493 = vmatprep.subr.bf16.mxu1 %v5492_v1  ;;  %v5855_v1 = vunpack.i.l.bf16 %v9311_v27  ;;  %v3493_v56 = vsel %vm3418_vm6, %v3492_v20, %v5821_v61  ;;  %v5530_v40 = vpack.c.bf16 %v3742_v7, %v3741_v60  ;;  %v3761_v61 = vld [vmem:[%s9787_s3 + $0x6b0] sm:$0xff] }
 0x2fc   :  { %v5536_v20 = vpack.c.bf16 %v3762_v5, %v3761_v61 }
 0x2fd   :  { %4187 = vmatmul.mubr.f32.vlgmr.msra.gmra.mrb[8].mxu1 %v3483_v24  ;;  %v3494_v24 = vsel %vm3420_vm7, %v3493_v56, %v5826_v28  ;;  %v3763_v28 = vld [vmem:[%s9787_s3 + $0x6c0] sm:$0xff] }
 0x2fe   :  { %5495 = vmatpush3.bf16.msra.mxu1 %v5494_v12  ;;  %4256 = vmatprep.mubr.f32.mxu1 %v3504_v36  ;;  %v9342_v12 = vpop.permute.xlu0 %5868  ;;  %v5520_v36 = vpack.c.bf16 %v3738_v0, %v3737_v51  ;;  %v3495_v2 = vsel %vm3422_vm8, %v3494_v24, %v5836_v29  ;;  %v3747_v0 = vld [vmem:[%s9787_s3 + $0x640] sm:$0xff]  ;;  %v3766_v29 = vld [vmem:[%s9787_s3 + $0x6d8] sm:$0xff]  ;;  %v3505_v24 = vsel %vm1391_vm4, %v8477_v16, %v5851_v41  ;;  %v5856_v16 = vunpack.i.h.bf16 %v9311_v27 }
 0x2ff   :  { %5497 = vmatprep.subr.bf16.mxu1 %v5496_v6  ;;  %v3514_v6 = vsel %vm3418_vm6, %v3513_v35, %v5855_v1  ;;  %v5870_v32 = vunpack.i.l.bf16 %v9342_v12  ;;  %v3496_v54 = vsel %vm3424_vm9, %v3495_v2, %v5831_v3  ;;  %v3745_v1 = vld [vmem:[%s9787_s3 + $0x630] sm:$0xff]  ;;  %v3746_v35 = vld [vmem:[%s9787_s3 + $0x638] sm:$0xff]  ;;  %v5861_v27 = vunpack.i.h.bf16 %v9330_v42 }
 0x300   :  { %v3515_v44 = vsel %vm3420_vm7, %v3514_v6, %v5860_v49  ;;  %v3497_v26 = vsel %vm3426_vm10, %v3496_v54, %v5841_v57  ;;  %v5538_v17 = vpack.c.bf16 %v3746_v35, %v3745_v1  ;;  %v3748_v6 = vld [vmem:[%s9787_s3 + $0x648] sm:$0xff]  ;;  %v3769_v42 = vld [vmem:[%s9787_s3 + $0x6f0] sm:$0xff] }
 0x301   :  { %v3516_v13 = vsel %vm3422_vm8, %v3515_v44, %v5870_v32  ;;  %v5544_v44 = vpack.c.bf16 %v3766_v29, %v3765_v43  ;;  %v3772_v1 = vld [vmem:[%s9787_s3 + $0x708] sm:$0xff]  ;;  %v3791_v29 = vld [vmem:[%s9787_s3 + $0x7a0] sm:$0xff] }
 0x302   :  { %5499 = vmatpush3.bf16.msra.mxu1 %v5498_v62  ;;  %v3721_v62 = vld [vmem:[%s9787_s3 + $0x570] sm:$0xff] }
 0x303   :  { %5501 = vmatprep.subr.bf16.mxu1 %v5500_v46  ;;  %v3722_v46 = vld [vmem:[%s9787_s3 + $0x578] sm:$0xff] }
 0x304   :  { %v5522_v33 = vpack.c.bf16 %v3722_v46, %v3721_v62  ;;  %v5542_v62 = vpack.c.bf16 %v3748_v6, %v3747_v0  ;;  %v3774_v6 = vld [vmem:[%s9787_s3 + $0x718] sm:$0xff] }
 0x306   :  { %5503 = vmatpush3.bf16.msra.mxu1 %v5502_v38  ;;  %v5865_v38 = vunpack.i.l.bf16 %v9354_v45 }
 0x307   :  { %5505 = vmatprep.subr.bf16.mxu1 %v5504_v18  ;;  %v9372_v18 = vpop.permute.xlu0 %5873 }
 0x308   :  { %v3517_v34 = vsel %vm3424_vm9, %v3516_v13, %v5865_v38  ;;  %v3752_v13 = vld [vmem:[%s9787_s3 + $0x668] sm:$0xff]  ;;  %v5876_v35 = vunpack.i.h.bf16 %v9372_v18 }
 0x30a   :  { %5507 = vmatpush3.bf16.msra.mxu1 %v5506_v31  ;;  %v3757_v31 = vld [vmem:[%s9787_s3 + $0x690] sm:$0xff] }
 0x30b   :  { %5509 = vmatprep.subr.bf16.mxu1 %v5508_v11  ;;  %v5875_v11 = vunpack.i.l.bf16 %v9372_v18  ;;  %v5528_v10 = vpack.c.bf16 %v3758_v23, %v3757_v31  ;;  %v9433_v49 = vpop.permute.xlu0 %5878  ;;  %v3773_v18 = vld [vmem:[%s9787_s3 + $0x710] sm:$0xff] }
 0x30c   :  { %v5880_v32 = vunpack.i.l.bf16 %v9433_v49 }
 0x30e   :  { %5511 = vmatpush3.bf16.msra.mxu1 %v5510_v22  ;;  %v3518_v22 = vsel %vm3426_vm10, %v3517_v34, %v5875_v11  ;;  %v3770_v11 = vld [vmem:[%s9787_s3 + $0x6f8] sm:$0xff]  ;;  %v5550_v34 = vpack.c.bf16 %v3752_v13, %v3751_v30 }
 0x30f   :  { %5513 = vmatprep.subr.bf16.mxu1 %v5512_v59  ;;  %v5532_v59 = vpack.c.bf16 %v3760_v39, %v3759_v14  ;;  %v9470_v38 = vpop.permute.xlu0 %5893  ;;  %v3753_v14 = vld [vmem:[%s9787_s3 + $0x670] sm:$0xff]  ;;  %v3754_v39 = vld [vmem:[%s9787_s3 + $0x678] sm:$0xff] }
 0x310   :  { %v5895_v31 = vunpack.i.l.bf16 %v9470_v38  ;;  %v5554_v5 = vpack.c.bf16 %v3754_v39, %v3753_v14  ;;  %v3781_v39 = vld [vmem:[%s9787_s3 + $0x750] sm:$0xff] }
 0x312   :  { %5515 = vmatpush3.bf16.msra.mxu1 %v5514_v9  ;;  %v9423_v9 = vpop.permute.xlu1 %5883 }
 0x313   :  { %5517 = vmatprep.subr.bf16.mxu1 %v5516_v4  ;;  %v3764_v4 = vld [vmem:[%s9787_s3 + $0x6c8] sm:$0xff]  ;;  %v5885_v56 = vunpack.i.l.bf16 %v9423_v9  ;;  %v9494_v7 = vpop.permute.xlu0 %5898 }
 0x314   :  { %v5540_v51 = vpack.c.bf16 %v3764_v4, %v3763_v28  ;;  %v5900_v48 = vunpack.i.l.bf16 %v9494_v7  ;;  %v3789_v28 = vld [vmem:[%s9787_s3 + $0x790] sm:$0xff]  ;;  %v3790_v4 = vld [vmem:[%s9787_s3 + $0x798] sm:$0xff] }
 0x315   :  { %v3526_v46 = vsel %vm1391_vm4, %v8556_v58, %v5885_v56  ;;  %v3768_v58 = vld [vmem:[%s9787_s3 + $0x6e8] sm:$0xff]  ;;  %v5560_v0 = vpack.c.bf16 %v3790_v4, %v3789_v28  ;;  %v3802_v4 = vld [vmem:[%s9787_s3 + $0x7f8] sm:$0xff] }
 0x316   :  { %5519 = vmatpush3.bf16.msra.mxu1 %v5518_v15  ;;  %v5846_v15 = vunpack.i.h.bf16 %v9293_v50  ;;  %v3750_v50 = vld [vmem:[%s9787_s3 + $0x658] sm:$0xff]  ;;  %v5548_v19 = vpack.c.bf16 %v3768_v58, %v3767_v55  ;;  %v3777_v58 = vld [vmem:[%s9787_s3 + $0x730] sm:$0xff] }
 0x317   :  { %5521 = vmatprep.subr.bf16.mxu1 %v5520_v36  ;;  %v9451_v36 = vpop.permute.xlu1 %5888 }
 0x318   :  { %v3506_v3 = vsel %vm3416_vm5, %v3505_v24, %v5846_v15  ;;  %v5890_v2 = vunpack.i.l.bf16 %v9451_v36  ;;  %v3792_v15 = vld [vmem:[%s9787_s3 + $0x7a8] sm:$0xff] }
 0x319   :  { %v3507_v57 = vsel %vm3418_vm6, %v3506_v3, %v5856_v16  ;;  %v3778_v3 = vld [vmem:[%s9787_s3 + $0x738] sm:$0xff] }
 0x31a   :  { %5523 = vmatpush3.bf16.msra.mxu1 %v5522_v33  ;;  %v3527_v33 = vsel %vm3416_vm5, %v3526_v46, %v5880_v32  ;;  %v5562_v32 = vpack.c.bf16 %v3774_v6, %v3773_v18  ;;  %v3775_v46 = vld [vmem:[%s9787_s3 + $0x720] sm:$0xff] }
 0x31b   :  { %5525 = vmatprep.subr.bf16.mxu1 %v5524_v52  ;;  %v5546_v52 = vpack.c.bf16 %v3750_v50, %v3749_v25  ;;  %v9482_v23 = vpop.permute.xlu1 %5903  ;;  %v3528_v54 = vsel %vm3418_vm6, %v3527_v33, %v5890_v2  ;;  %v3793_v25 = vld [vmem:[%s9787_s3 + $0x7b0] sm:$0xff]  ;;  %v3794_v50 = vld [vmem:[%s9787_s3 + $0x7b8] sm:$0xff]  ;;  %v9563_v2 = vpop.permute.xlu0 %5918  ;;  %v3795_v33 = vld [vmem:[%s9787_s3 + $0x7c0] sm:$0xff] }
 0x31c   :  { %v5905_v60 = vunpack.i.l.bf16 %v9482_v23  ;;  %v5568_v55 = vpack.c.bf16 %v3794_v50, %v3793_v25  ;;  %v5920_v30 = vunpack.i.l.bf16 %v9563_v2 }
 0x31d   :  { %4257 = vmatmul.mubr.f32.vlgmr.msra.gmra.mrb[10].mxu1 %v3497_v26  ;;  %v5552_v26 = vpack.c.bf16 %v3770_v11, %v3769_v42  ;;  %v3780_v42 = vld [vmem:[%s9787_s3 + $0x748] sm:$0xff]  ;;  %v3798_v11 = vld [vmem:[%s9787_s3 + $0x7d8] sm:$0xff] }
 0x31e   :  { %5527 = vmatpush3.bf16.msra.mxu1 %v5526_v37  ;;  %4326 = vmatprep.mubr.f32.mxu1 %v3518_v22  ;;  %v5871_v37 = vunpack.i.h.bf16 %v9342_v12  ;;  %v3529_v12 = vsel %vm3420_vm7, %v3528_v54, %v5895_v31  ;;  %v3787_v22 = vld [vmem:[%s9787_s3 + $0x780] sm:$0xff]  ;;  %v5881_v54 = vunpack.i.h.bf16 %v9433_v49  ;;  %v3782_v49 = vld [vmem:[%s9787_s3 + $0x758] sm:$0xff] }
 0x31f   :  { %5529 = vmatprep.subr.bf16.mxu1 %v5528_v10  ;;  %v3508_v10 = vsel %vm3420_vm7, %v3507_v57, %v5861_v27  ;;  %v9512_v61 = vpop.permute.xlu1 %5908  ;;  %v5886_v27 = vunpack.i.h.bf16 %v9423_v9  ;;  %v3779_v31 = vld [vmem:[%s9787_s3 + $0x740] sm:$0xff]  ;;  %v3797_v9 = vld [vmem:[%s9787_s3 + $0x7d0] sm:$0xff] }
 0x320   :  { %v3509_v53 = vsel %vm3422_vm8, %v3508_v10, %v5871_v37  ;;  %v5910_v41 = vunpack.i.l.bf16 %v9512_v61  ;;  %v9591_v10 = vpop.permute.xlu0 %5923  ;;  %v5576_v14 = vpack.c.bf16 %v3798_v11, %v3797_v9  ;;  %v3806_v9 = vld [vmem:[%s9787_s3 + $0x818] sm:$0xff] }
 0x321   :  { %v3519_v37 = vsel %vm1391_vm4, %v8550_v21, %v5886_v27  ;;  %v5891_v21 = vunpack.i.h.bf16 %v9451_v36  ;;  %v5896_v36 = vunpack.i.h.bf16 %v9470_v38  ;;  %v3801_v38 = vld [vmem:[%s9787_s3 + $0x7f0] sm:$0xff]  ;;  %v3822_v27 = vld [vmem:[%s9787_s3 + $0x898] sm:$0xff] }
 0x322   :  { %5531 = vmatpush3.bf16.msra.mxu1 %v5530_v40  ;;  %v3788_v40 = vld [vmem:[%s9787_s3 + $0x788] sm:$0xff] }
 0x323   :  { %5533 = vmatprep.subr.bf16.mxu1 %v5532_v59  ;;  %v5866_v59 = vunpack.i.h.bf16 %v9354_v45  ;;  %v3530_v45 = vsel %vm3422_vm8, %v3529_v12, %v5905_v60  ;;  %v9573_v13 = vpop.permute.xlu1 %5913  ;;  %v5574_v60 = vpack.c.bf16 %v3780_v42, %v3779_v31  ;;  %v3799_v12 = vld [vmem:[%s9787_s3 + $0x7e0] sm:$0xff] }
 0x326   :  { %5535 = vmatpush3.bf16.msra.mxu1 %v5534_v63  ;;  %v5556_v63 = vpack.c.bf16 %v3788_v40, %v3787_v22  ;;  %v3520_v22 = vsel %vm3416_vm5, %v3519_v37, %v5881_v54  ;;  %v5925_v40 = vunpack.i.l.bf16 %v9591_v10  ;;  %v3823_v54 = vld [vmem:[%s9787_s3 + $0x8a0] sm:$0xff]  ;;  %v3824_v37 = vld [vmem:[%s9787_s3 + $0x8a8] sm:$0xff] }
 0x327   :  { %5537 = vmatprep.subr.bf16.mxu1 %v5536_v20  ;;  %v3771_v20 = vld [vmem:[%s9787_s3 + $0x700] sm:$0xff] }
 0x328   :  { %v5558_v56 = vpack.c.bf16 %v3772_v1, %v3771_v20  ;;  %v3784_v20 = vld [vmem:[%s9787_s3 + $0x768] sm:$0xff]  ;;  %v3521_v1 = vsel %vm3418_vm6, %v3520_v22, %v5891_v21  ;;  %v3826_v21 = vld [vmem:[%s9787_s3 + $0x8b8] sm:$0xff]  ;;  %v3809_v22 = vld [vmem:[%s9787_s3 + $0x830] sm:$0xff] }
 0x329   :  { %v3522_v18 = vsel %vm3420_vm7, %v3521_v1, %v5896_v36  ;;  %v5921_v36 = vunpack.i.h.bf16 %v9563_v2  ;;  %v3812_v1 = vld [vmem:[%s9787_s3 + $0x848] sm:$0xff]  ;;  %v3830_v2 = vld [vmem:[%s9787_s3 + $0x8d8] sm:$0xff] }
 0x32a   :  { %5539 = vmatpush3.bf16.msra.mxu1 %v5538_v17  ;;  %v3510_v17 = vsel %vm3424_vm9, %v3509_v53, %v5866_v59  ;;  %v9610_v59 = vpop.permute.xlu1 %5928 }
 0x32b   :  { %5541 = vmatprep.subr.bf16.mxu1 %v5540_v51  ;;  %v3531_v51 = vsel %vm3424_vm9, %v3530_v45, %v5900_v48  ;;  %v3511_v43 = vsel %vm3426_vm10, %v3510_v17, %v5876_v35  ;;  %v5578_v48 = vpack.c.bf16 %v3782_v49, %v3781_v39  ;;  %v5930_v45 = vunpack.i.l.bf16 %v9610_v59  ;;  %v9622_v35 = vpop.permute.xlu0 %5933  ;;  %v3808_v39 = vld [vmem:[%s9787_s3 + $0x828] sm:$0xff]  ;;  %v3825_v49 = vld [vmem:[%s9787_s3 + $0x8b0] sm:$0xff] }
 0x32c   :  { %v3532_v24 = vsel %vm3426_vm10, %v3531_v51, %v5910_v41  ;;  %v5935_v6 = vunpack.i.l.bf16 %v9622_v35 }
 0x32e   :  { %5543 = vmatpush3.bf16.msra.mxu1 %v5542_v62  ;;  %v5564_v62 = vpack.c.bf16 %v3792_v15, %v3791_v29  ;;  %v5584_v29 = vpack.c.bf16 %v3802_v4, %v3801_v38  ;;  %v3785_v15 = vld [vmem:[%s9787_s3 + $0x770] sm:$0xff]  ;;  %v3533_v38 = vsel %vm1391_vm4, %v8591_v8, %v5921_v36  ;;  %v3832_v8 = vld [vmem:[%s9787_s3 + $0x8e8] sm:$0xff] }
 0x32f   :  { %5545 = vmatprep.subr.bf16.mxu1 %v5544_v44  ;;  %v3776_v44 = vld [vmem:[%s9787_s3 + $0x728] sm:$0xff]  ;;  %v9654_v50 = vpop.permute.xlu0 %5943 }
 0x330   :  { %v5566_v16 = vpack.c.bf16 %v3776_v44, %v3775_v46  ;;  %v5901_v46 = vunpack.i.h.bf16 %v9494_v7 }
 0x332   :  { %5547 = vmatpush3.bf16.msra.mxu1 %v5546_v52  ;;  %v3796_v52 = vld [vmem:[%s9787_s3 + $0x7c8] sm:$0xff] }
 0x333   :  { %5549 = vmatprep.subr.bf16.mxu1 %v5548_v19  ;;  %v5570_v19 = vpack.c.bf16 %v3778_v3, %v3777_v58  ;;  %v5572_v57 = vpack.c.bf16 %v3796_v52, %v3795_v33  ;;  %v3803_v58 = vld [vmem:[%s9787_s3 + $0x800] sm:$0xff]  ;;  %v3804_v3 = vld [vmem:[%s9787_s3 + $0x808] sm:$0xff]  ;;  %v5911_v33 = vunpack.i.h.bf16 %v9512_v61  ;;  %v3821_v52 = vld [vmem:[%s9787_s3 + $0x890] sm:$0xff] }
 0x334   :  { %v5592_v42 = vpack.c.bf16 %v3822_v27, %v3821_v52  ;;  %v3805_v61 = vld [vmem:[%s9787_s3 + $0x810] sm:$0xff]  ;;  %v3818_v52 = vld [vmem:[%s9787_s3 + $0x878] sm:$0xff] }
 0x336   :  { %5551 = vmatpush3.bf16.msra.mxu1 %v5550_v34  ;;  %v5915_v34 = vunpack.i.l.bf16 %v9573_v13 }
 0x337   :  { %5553 = vmatprep.subr.bf16.mxu1 %v5552_v26  ;;  %v3540_v26 = vsel %vm1391_vm4, %v8597_v47, %v5920_v30  ;;  %v3800_v47 = vld [vmem:[%s9787_s3 + $0x7e8] sm:$0xff] }
 0x338   :  { %v3541_v53 = vsel %vm3416_vm5, %v3540_v26, %v5915_v34  ;;  %v5596_v26 = vpack.c.bf16 %v3824_v37, %v3823_v54 }
 0x339   :  { %v3542_v41 = vsel %vm3418_vm6, %v3541_v53, %v5925_v40  ;;  %v3810_v40 = vld [vmem:[%s9787_s3 + $0x838] sm:$0xff]  ;;  %v3827_v53 = vld [vmem:[%s9787_s3 + $0x8c0] sm:$0xff] }
 0x33a   :  { %5555 = vmatpush3.bf16.msra.mxu1 %v5554_v5  ;;  %v5580_v5 = vpack.c.bf16 %v3800_v47, %v3799_v12  ;;  %v5600_v47 = vpack.c.bf16 %v3826_v21, %v3825_v49 }
 0x33b   :  { %5557 = vmatprep.subr.bf16.mxu1 %v5556_v63  ;;  %v3783_v63 = vld [vmem:[%s9787_s3 + $0x760] sm:$0xff] }
 0x33d   :  { %4327 = vmatmul.mubr.f32.vlgmr.msra.gmra.mrb[12].mxu1 %v3511_v43  ;;  %v9636_v43 = vpop.permute.xlu1 %5938 }
 0x33e   :  { %5559 = vmatpush3.bf16.msra.mxu1 %v5558_v56  ;;  %4396 = vmatprep.mubr.f32.mxu1 %v3532_v24  ;;  %v5906_v56 = vunpack.i.h.bf16 %v9482_v23  ;;  %v3786_v23 = vld [vmem:[%s9787_s3 + $0x778] sm:$0xff]  ;;  %v3543_v24 = vsel %vm3420_vm7, %v3542_v41, %v5930_v45  ;;  %v5940_v25 = vunpack.i.l.bf16 %v9636_v43  ;;  %v3829_v45 = vld [vmem:[%s9787_s3 + $0x8d0] sm:$0xff] }
 0x33f   :  { %5561 = vmatprep.subr.bf16.mxu1 %v5560_v0  ;;  %v5582_v0 = vpack.c.bf16 %v3784_v20, %v3783_v63  ;;  %v3544_v7 = vsel %vm3422_vm8, %v3543_v24, %v5935_v6  ;;  %v3811_v20 = vld [vmem:[%s9787_s3 + $0x840] sm:$0xff]  ;;  %v5608_v41 = vpack.c.bf16 %v3830_v2, %v3829_v45  ;;  %v3816_v24 = vld [vmem:[%s9787_s3 + $0x868] sm:$0xff] }
 0x340   :  { %v3523_v44 = vsel %vm3422_vm8, %v3522_v18, %v5906_v56  ;;  %v3545_v31 = vsel %vm3424_vm9, %v3544_v7, %v5940_v25  ;;  %v5606_v4 = vpack.c.bf16 %v3812_v1, %v3811_v20  ;;  %v3814_v56 = vld [vmem:[%s9787_s3 + $0x858] sm:$0xff]  ;;  %v5936_v25 = vunpack.i.h.bf16 %v9622_v35 }
 0x341   :  { %v3524_v30 = vsel %vm3424_vm9, %v3523_v44, %v5901_v46  ;;  %v3834_v46 = vld [vmem:[%s9787_s3 + $0x8f8] sm:$0xff]  ;;  %v5941_v35 = vunpack.i.h.bf16 %v9636_v43 }
 0x342   :  { %5563 = vmatpush3.bf16.msra.mxu1 %v5562_v32  ;;  %v3819_v32 = vld [vmem:[%s9787_s3 + $0x880] sm:$0xff]  ;;  %v3525_v11 = vsel %vm3426_vm10, %v3524_v30, %v5911_v33  ;;  %v3817_v33 = vld [vmem:[%s9787_s3 + $0x870] sm:$0xff]  ;;  %v5946_v30 = vunpack.i.h.bf16 %v9654_v50 }
 0x343   :  { %5565 = vmatprep.subr.bf16.mxu1 %v5564_v62  ;;  %v3820_v62 = vld [vmem:[%s9787_s3 + $0x888] sm:$0xff] }
 0x346   :  { %5567 = vmatpush3.bf16.msra.mxu1 %v5566_v16  ;;  %v5586_v16 = vpack.c.bf16 %v3786_v23, %v3785_v15  ;;  %v4634_v15 = vld [vmem:[%s9788_s4] ss:$0 sm:$0xff] }
 0x347   :  { %5569 = vmatprep.subr.bf16.mxu1 %v5568_v55  ;;  %v5588_v55 = vpack.c.bf16 %v3820_v62, %v3819_v32  ;;  %v3815_v23 = vld [vmem:[%s9787_s3 + $0x860] sm:$0xff] }
 0x34a   :  { %5571 = vmatpush3.bf16.msra.mxu1 %v5570_v19  ;;  %v5945_v19 = vunpack.i.l.bf16 %v9654_v50 }
 0x34b   :  { %5573 = vmatprep.subr.bf16.mxu1 %v5572_v57  ;;  %v5590_v57 = vpack.c.bf16 %v3804_v3, %v3803_v58  ;;  %v5614_v58 = vpack.c.bf16 %v3816_v24, %v3815_v23 }
 0x34c   :  { %v3546_v34 = vsel %vm3426_vm10, %v3545_v31, %v5945_v19  ;;  %v5618_v19 = vpack.c.bf16 %v3818_v52, %v3817_v33 }
 0x34e   :  { %5575 = vmatpush3.bf16.msra.mxu1 %v5574_v60  ;;  %v5594_v60 = vpack.c.bf16 %v3806_v9, %v3805_v61 }
 0x34f   :  { %5577 = vmatprep.subr.bf16.mxu1 %v5576_v14  ;;  %v3807_v14 = vld [vmem:[%s9787_s3 + $0x820] sm:$0xff] }
 0x350   :  { %v4815_v28 = vpop.f32.mrb[0].mxu1  ;;  %v5598_v12 = vpack.c.bf16 %v3808_v39, %v3807_v14 }
 0x351   :  { %v4816_v17 = vpop.f32.mrb[1].mxu1 }
 0x352   :  { %v9632_v51 = vadd.f32 %v4816_v17, %v4815_v28  ;;  %5579 = vmatpush3.bf16.msra.mxu1 %v5578_v48  ;;  %v3828_v48 = vld [vmem:[%s9787_s3 + $0x8c8] sm:$0xff]  ;;  %v5916_v28 = vunpack.i.h.bf16 %v9573_v13  ;;  %v3813_v17 = vld [vmem:[%s9787_s3 + $0x850] sm:$0xff]  ;;  %v3831_v13 = vld [vmem:[%s9787_s3 + $0x8e0] sm:$0xff] }
 0x353   :  { %5581 = vmatprep.subr.bf16.mxu1 %v5580_v5  ;;  %v5602_v5 = vpack.c.bf16 %v3810_v40, %v3809_v22  ;;  %v5604_v63 = vpack.c.bf16 %v3828_v48, %v3827_v53  ;;  %v5610_v6 = vpack.c.bf16 %v3814_v56, %v3813_v17 }
 0x354   :  { %v3534_v18 = vsel %vm3416_vm5, %v3533_v38, %v5916_v28 }
 0x356   :  { %5583 = vmatpush3.bf16.msra.mxu1 %v5582_v0  ;;  %v5926_v0 = vunpack.i.h.bf16 %v9591_v10  ;;  %v5612_v10 = vpack.c.bf16 %v3832_v8, %v3831_v13 }
 0x357   :  { %5585 = vmatprep.subr.bf16.mxu1 %v5584_v29  ;;  %v5931_v29 = vunpack.i.h.bf16 %v9610_v59  ;;  %v3833_v59 = vld [vmem:[%s9787_s3 + $0x8f0] sm:$0xff]  ;;  %s5982_s3 = smov [#allocation2]  }
 0x358   :  { %v3535_v32 = vsel %vm3418_vm6, %v3534_v18, %v5926_v0  ;;  %v5616_v7 = vpack.c.bf16 %v3834_v46, %v3833_v59  ;;  %s4480_s19 = sshll.u32 %s5982_s3, 4  ;;  %s4481_s19 = int_to_ptr.vmem [resolvable:$true] %s4480_s19 }
 0x359   :  { %v3536_v3 = vsel %vm3420_vm7, %v3535_v32, %v5931_v29  ;;  %s5947_s7 = scalar_lea.vmem %s4481_s19, 32  ;;  %p5952_p1 = scmp.lt.s32.totalorder %s4481_s19, %s4481_s19 }
 0x35a   :  { %5587 = vmatpush3.bf16.msra.mxu1 %v5586_v16  ;;  %v3909_v16 = vadd.f32 %v9632_v51, %v4634_v15  ;;  %v3537_v51 = vsel %vm3422_vm8, %v3536_v3, %v5936_v25  ;;  %p5948_p0 = scmp.ne.s32.totalorder %s4481_s19, %s5947_s7  ;;  %p5953_p2 = scmp.lt.s32.totalorder %s5947_s7, %s5947_s7 }
 0x35b   :  { %5589 = vmatprep.subr.bf16.mxu1 %v5588_v55 }
 0x35c   :  { %p5954_p3 = por %p5953_p2, %p5952_p1 }
 0x35d   :  { %4397 = vmatmul.mubr.f32.vlgmr.msra.gmra.mrb[14].mxu1 %v3525_v11 }
 0x35e   :  { %5591 = vmatpush3.bf16.msra.mxu1 %v5590_v57  ;;  %4466 = vmatprep.mubr.f32.mxu1 %v3546_v34  ;;  %v3538_v57 = vsel %vm3424_vm9, %v3537_v51, %v5941_v35  ;;  %p5955_p4 = pnand %p5954_p3, %p5948_p0 }
 0x35f   :  { %5593 = vmatprep.subr.bf16.mxu1 %v5592_v42  ;;  %v3539_v31 = vsel %vm3426_vm10, %v3538_v57, %v5946_v30 }
 0x362   :  { %5595 = vmatpush3.bf16.msra.mxu1 %v5594_v60 }
 0x363   :  { %5597 = vmatprep.subr.bf16.mxu1 %v5596_v26 }
 0x366   :  { %5599 = vmatpush3.bf16.msra.mxu1 %v5598_v12 }
 0x367   :  { %5601 = vmatprep.subr.bf16.mxu1 %v5600_v47 }
 0x36a   :  { %5603 = vmatpush3.bf16.msra.mxu1 %v5602_v5 }
 0x36b   :  { %5605 = vmatprep.subr.bf16.mxu1 %v5604_v63 }
 0x36e   :  { %5607 = vmatpush3.bf16.msra.mxu1 %v5606_v4 }
 0x36f   :  { %5609 = vmatprep.subr.bf16.mxu1 %v5608_v41 }
 0x370   :  { %v4850_v62 = vpop.f32.mrb[2].mxu1 }
 0x371   :  { %v4851_v44 = vpop.f32.mrb[3].mxu1 }
 0x372   :  { %v4852_v55 = vadd.f32 %v4851_v44, %v4850_v62  ;;  %5611 = vmatpush3.bf16.msra.mxu1 %v5610_v6 }
 0x373   :  { %5613 = vmatprep.subr.bf16.mxu1 %v5612_v10 }
 0x374   :  { %v3979_v27 = vadd.f32 %v4852_v55, %v3909_v16 }
 0x376   :  { %5615 = vmatpush3.bf16.msra.mxu1 %v5614_v58 }
 0x377   :  { %5617 = vmatprep.subr.bf16.mxu1 %v5616_v7 }
 0x37a   :  { %5619 = vmatpush3.bf16.msra.mxu1 %v5618_v19 }
 0x37d   :  { %4467 = vmatmul.mubr.f32.vlgmr.msra.gmra.mrb[16].mxu1 %v3539_v31 }
 0x390   :  { %v4885_v42 = vpop.f32.mrb[4].mxu1 }
 0x391   :  { %v4886_v61 = vpop.f32.mrb[5].mxu1 }
 0x392   :  { %v4887_v9 = vadd.f32 %v4886_v61, %v4885_v42 }
 0x394   :  { %v4049_v11 = vadd.f32 %v4887_v9, %v3979_v27 }
 0x3b0   :  { %v4920_v54 = vpop.f32.mrb[6].mxu1 }
 0x3b1   :  { %v4921_v37 = vpop.f32.mrb[7].mxu1 }
 0x3b2   :  { %v4922_v43 = vadd.f32 %v4921_v37, %v4920_v54 }
 0x3b4   :  { %v4119_v34 = vadd.f32 %v4922_v43, %v4049_v11 }
 0x3d0   :  { %v4955_v60 = vpop.f32.mrb[8].mxu1 }
 0x3d1   :  { %v4956_v26 = vpop.f32.mrb[9].mxu1 }
 0x3d2   :  { %v4957_v14 = vadd.f32 %v4956_v26, %v4955_v60 }
 0x3d4   :  { %v4189_v39 = vadd.f32 %v4957_v14, %v4119_v34 }
 0x3f0   :  { %v4990_v49 = vpop.f32.mrb[10].mxu1 }
 0x3f1   :  { %v4991_v50 = vpop.f32.mrb[11].mxu1 }
 0x3f2   :  { %v4992_v21 = vadd.f32 %v4991_v50, %v4990_v49 }
 0x3f4   :  { %v4259_v12 = vadd.f32 %v4992_v21, %v4189_v39 }
 0x410   :  { %v5025_v47 = vpop.f32.mrb[12].mxu1 }
 0x411   :  { %v5026_v22 = vpop.f32.mrb[13].mxu1 }
 0x412   :  { %v5027_v40 = vadd.f32 %v5026_v22, %v5025_v47 }
 0x414   :  { %v4329_v53 = vadd.f32 %v5027_v40, %v4259_v12 }
 0x430   :  { %v5060_v48 = vpop.f32.mrb[14].mxu1 }
 0x431   :  { %v5061_v36 = vpop.f32.mrb[15].mxu1 }
 0x432   :  { %v5062_v5 = vadd.f32 %v5061_v36, %v5060_v48 }
 0x434   :  { %v4399_v63 = vadd.f32 %v5062_v5, %v4329_v53 }
 0x450   :  { %v5095_v20 = vpop.f32.mrb[16].mxu1 }
 0x451   :  { %v5096_v1 = vpop.f32.mrb[17].mxu1 }
 0x452   :  { %v5097_v45 = vadd.f32 %v5096_v1, %v5095_v20 }
 0x454   :  { %v4469_v2 = vadd.f32 %v5097_v45, %v4399_v63 }
 0x456   :  { %4473 = vst.msk [vmem:[#allocation2] sm:$0x3] %vm4472_vm11, %v4469_v2 }
 0x457   :  { %5958 = shalt.err (!%p5955_p4)
}
 0x458   :  { %s5959_s9 = scalar_lea.hbm %s9789_s5, 32 }
 0x459   :  { %p5960_p5 = scmp.ne.s32.totalorder %s9789_s5, %s5959_s9  ;;  %p5963_p6 = scmp.lt.u32.totalorder %s5959_s9, %s9789_s5 }
 0x45b   :  { %p5965_p7 = pnand %p5963_p6, %p5960_p5 }
 0x45d   :  { %5968 = shalt.err (!%p5965_p7)
}
 0x45e   :  { %4483 = dma.vmem_to_hbm [thread:$0]  %s4481_s19, 32, %s9789_s5, [#allocation3]  }
 0x45f   :  { %5969 = dma.done.wait [#allocation3], 32  }
 0x460   :  { %5970 = vsyncadd [#allocation3], 4294967264 }
 0x461   :  { %4487 = vsyncpa [#allocation3], 1 }

</bundles_post_ra>
